<compile_context>
chip_gen: v7x
topology: tpu7x:2x2x1
jax: 0.10.0
libtpu: 0.0.40
codegen_flags: <defaults>
</compile_context>

<pallas_src>
import math

import jax
import jax.numpy as jnp
from jax import lax
from jax.experimental import pallas as pl
from jax.experimental.pallas import tpu as pltpu

_EPS = 1e-5  # nn.BatchNorm1d default eps


def _batchnorm(x, gamma, beta):
    """Training-mode BatchNorm1d over rows of (N, D); mean-shifted variance, f32 stats."""
    inv_n = 1.0 / x.shape[0]
    mean = jnp.sum(x, axis=0, keepdims=True) * inv_n
    xc = x - mean
    var = jnp.sum(xc * xc, axis=0, keepdims=True) * inv_n
    return xc * lax.rsqrt(var + _EPS) * gamma + beta


def _make_critic_kernel(B, G, I, D, Hd, n_heads):
    N = B * G
    H = n_heads
    dk = D // H
    norm = 1.0 / math.sqrt(dk)

    def kernel(x_hbm, iw_hbm, ib_ref,
               wqkv_ref, wo_ref, bn1g_ref, bn1b_ref,
               ff1w_ref, ff1b_ref, ff2w_ref, ff2b_ref,
               bn2g_ref, bn2b_ref,
               vw1_hbm, vb1_ref, vw2_ref, vb2_ref,
               val_ref, h_ref, heads_ref):
        l = pl.program_id(0)

        # ---- step 0: DMA x / init_embed weight from HBM (not VMEM-resident across layers),
        #      compute init_embed Linear(input_dim -> D) over flattened tokens ----
        @pl.when(l == 0)
        def _():
            def init_body(xbuf, wbuf, sem):
                cx = pltpu.make_async_copy(x_hbm, xbuf, sem.at[0])
                cw = pltpu.make_async_copy(iw_hbm, wbuf, sem.at[1])
                cx.start(); cw.start()
                cx.wait(); cw.wait()
                h_ref[...] = (
                    jnp.dot(xbuf[...].astype(jnp.bfloat16), wbuf[...],
                            preferred_element_type=jnp.float32)
                    + ib_ref[...])
            pl.run_scoped(init_body,
                          pltpu.VMEM((N, I), jnp.float32),
                          pltpu.VMEM((I, D), jnp.bfloat16),
                          pltpu.SemaphoreType.DMA((2,)))

        h = h_ref[...]                                     # (N, D) f32, N = B*G
        h_bf = h.astype(jnp.bfloat16)

        # ---- fused QKV projection: one (N, D) @ (D, 3D) matmul ----
        qkv = jnp.dot(h_bf, wqkv_ref[0], preferred_element_type=jnp.float32)   # (N, 3D)
        # Fold 1/sqrt(dk) into q (one pass over (N, D)) instead of scaling (B, G, G) scores.
        q_all = (qkv[:, :D] * norm).astype(jnp.bfloat16)
        k_all = qkv[:, D:2 * D].astype(jnp.bfloat16)
        v_all = qkv[:, 2 * D:].astype(jnp.bfloat16)

        # ---- per-head attention, batched over B; each head written straight into the
        #      (N, D) heads scratch at its static lane offset (no concatenate, no parts list) ----
        for hd in range(H):
            sl = slice(hd * dk, (hd + 1) * dk)
            q = q_all[:, sl].reshape(B, G, dk)
            k = k_all[:, sl].reshape(B, G, dk)
            v = v_all[:, sl].reshape(B, G, dk)
            s = jnp.einsum('bqd,bkd->bqk', q, k, preferred_element_type=jnp.float32)
            s = s - jnp.max(s, axis=-1, keepdims=True)
            e = jnp.exp(s)
            p = e * pl.reciprocal(jnp.sum(e, axis=-1, keepdims=True), approx=True)
            o = jnp.einsum('bqk,bkd->bqd', p.astype(jnp.bfloat16), v,
                           preferred_element_type=jnp.float32)
            heads_ref[:, sl] = o.reshape(N, dk).astype(jnp.bfloat16)

        # ---- fused output projection (single (N, H*dk)@(H*dk, D)) + residual ----
        mha = jnp.dot(heads_ref[...], wo_ref[0], preferred_element_type=jnp.float32)
        s1 = h + mha

        # ---- BatchNorm1d #1 ----
        x1 = _batchnorm(s1, bn1g_ref[0], bn1b_ref[0])

        # ---- feed-forward over B*G: (N,D)@(D,F) -> ReLU (bf16) -> (N,F)@(F,D) ----
        mid = jnp.maximum(
            jnp.dot(x1.astype(jnp.bfloat16), ff1w_ref[0],
                    preferred_element_type=jnp.float32) + ff1b_ref[0],
            0.0).astype(jnp.bfloat16)                       # bf16 right after ReLU: halves live temp
        ffo = jnp.dot(mid, ff2w_ref[0], preferred_element_type=jnp.float32) + ff2b_ref[0]
        s2 = x1 + ffo

        # ---- BatchNorm1d #2; write the layer output back into the resident carry ----
        h_new = _batchnorm(s2, bn2g_ref[0], bn2b_ref[0])
        h_ref[...] = h_new

        # ---- last step: graph-mean + value head (Linear -> ReLU -> Linear(->1)) ----
        @pl.when(l == pl.num_programs(0) - 1)
        def _():
            def head_body(w1buf, sem):
                cw = pltpu.make_async_copy(vw1_hbm, w1buf, sem.at[0])
                cw.start(); cw.wait()
                ge = jnp.mean(h_new.reshape(B, G, D), axis=1)            # (B, D)
                hid = jnp.maximum(
                    jnp.dot(ge.astype(jnp.bfloat16), w1buf[...],
                            preferred_element_type=jnp.float32) + vb1_ref[...],
                    0.0)                                                  # (B, Hd)
                # second Linear(Hd -> 1) as elementwise-mul + lane reduce (weight stored (1, Hd))
                val_ref[...] = (jnp.sum(hid * vw2_ref[...], axis=-1, keepdims=True)
                                + vb2_ref[...])
            pl.run_scoped(head_body,
                          pltpu.VMEM((D, Hd), jnp.bfloat16),
                          pltpu.SemaphoreType.DMA((1,)))

    return kernel


def _vmem_limit_bytes():
    """Generation-aware VMEM limit: generous on 128 MiB parts, headroom on v7x's 64 MiB."""
    cap = 128 * 1024 * 1024
    try:
        info = pltpu.get_tpu_info()
        cap = int(getattr(info, "vmem_capacity_bytes", cap))
    except Exception:
        pass
    return int(max(32 * 1024 * 1024, min(cap - 16 * 1024 * 1024, 100 * 1024 * 1024)))


def critic_network_forward(x, params):
    B, G, I = x.shape
    D = params["init_w"].shape[1]
    L = params["wqkv"].shape[0]
    F = params["ff1_w"].shape[2]
    Hd = params["vh_w1"].shape[1]
    N = B * G

    def _const(shape):
        return pl.BlockSpec(shape, lambda l: (0,) * len(shape))

    def _per_layer(shape):  # shape excludes the leading L axis
        nd = len(shape)
        return pl.BlockSpec((1,) + shape, lambda l: (l,) + (0,) * nd)

    hbm = pl.BlockSpec(memory_space=pl.ANY)   # only touched on first / last grid step

    in_specs = [
        hbm,                     # x_flat        (step 0 only)
        hbm,                     # init_w        (step 0 only)
        _const((1, D)),          # init_b
        _per_layer((D, 3 * D)),  # wqkv
        _per_layer((D, D)),      # wo
        _per_layer((1, D)),      # bn1_g
        _per_layer((1, D)),      # bn1_b
        _per_layer((D, F)),      # ff1_w
        _per_layer((1, F)),      # ff1_b
        _per_layer((F, D)),      # ff2_w
        _per_layer((1, D)),      # ff2_b
        _per_layer((1, D)),      # bn2_g
        _per_layer((1, D)),      # bn2_b
        hbm,                     # vh_w1         (last step only)
        _const((1, Hd)),         # vh_b1
        _const((1, Hd)),         # vh_w2 (stored transposed, (1, Hd))
        _const((1, 1)),          # vh_b2
    ]

    kernel = _make_critic_kernel(B, G, I, D, Hd, params["n_heads"])
    return pl.pallas_call(
        kernel,
        out_shape=jax.ShapeDtypeStruct((B, 1), jnp.float32),
        grid_spec=pltpu.PrefetchScalarGridSpec(
            num_scalar_prefetch=0,
            grid=(L,),
            in_specs=in_specs,
            out_specs=pl.BlockSpec((B, 1), lambda l: (0, 0)),
            scratch_shapes=[
                pltpu.VMEM((N, D), jnp.float32),    # resident h carry
                pltpu.VMEM((N, D), jnp.bfloat16),   # per-layer heads buffer (no concat)
            ],
        ),
        compiler_params=pltpu.CompilerParams(
            dimension_semantics=("arbitrary",),       # layers are sequential
            vmem_limit_bytes=_vmem_limit_bytes(),
        ),
    )(x.reshape(N, I), params["init_w"], params["init_b"],
      params["wqkv"], params["wo"], params["bn1_g"], params["bn1_b"],
      params["ff1_w"], params["ff1_b"], params["ff2_w"], params["ff2_b"],
      params["bn2_g"], params["bn2_b"],
      params["vh_w1"], params["vh_b1"], params["vh_w2"], params["vh_b2"])


# ---------------------------------------------------------------------------
# Deterministic parameter construction (shapes / init ranges follow the PyTorch
# module; MHA weights stored head-concatenated, layers stacked along L).
# ---------------------------------------------------------------------------
def init_params(key, input_dim, embed_dim, hidden_dim, n_layers,
                n_heads=8, feed_forward_hidden=512):
    dk = embed_dim // n_heads
    bf = jnp.bfloat16

    def uni(k, shape, fan, dtype=jnp.float32):
        s = 1.0 / math.sqrt(fan)
        return jax.random.uniform(k, shape, jnp.float32, -s, s).astype(dtype)

    keys = iter(jax.random.split(key, 6 + 6 * n_layers))
    params = {
        "n_heads": n_heads,
        "init_w": uni(next(keys), (input_dim, embed_dim), input_dim, bf),
        "init_b": uni(next(keys), (1, embed_dim), input_dim),
        "vh_w1": uni(next(keys), (embed_dim, hidden_dim), embed_dim, bf),
        "vh_b1": uni(next(keys), (1, hidden_dim), embed_dim),
        "vh_w2": uni(next(keys), (1, hidden_dim), hidden_dim),     # Linear(Hd->1) weight, (1, Hd)
        "vh_b2": uni(next(keys), (1, 1), hidden_dim),
    }

    wqkv, wo, bn1g, bn1b = [], [], [], []
    ff1w, ff1b, ff2w, ff2b, bn2g, bn2b = [], [], [], [], [], []
    for _ in range(n_layers):
        # Head-concatenated [W_query | W_key | W_val], stdv = 1/sqrt(dk) (init_parameters()).
        wqkv.append(uni(next(keys), (embed_dim, 3 * embed_dim), dk, bf))
        # Row-stacked W_out (H*dk, D), stdv = 1/sqrt(D).
        wo.append(uni(next(keys), (embed_dim, embed_dim), embed_dim, bf))
        bn1g.append(jnp.ones((1, embed_dim), jnp.float32))
        bn1b.append(jnp.zeros((1, embed_dim), jnp.float32))
        ff1w.append(uni(next(keys), (embed_dim, feed_forward_hidden), embed_dim, bf))
        ff1b.append(uni(next(keys), (1, feed_forward_hidden), embed_dim))
        ff2w.append(uni(next(keys), (feed_forward_hidden, embed_dim),
                        feed_forward_hidden, bf))
        ff2b.append(uni(next(keys), (1, embed_dim), feed_forward_hidden))
        bn2g.append(jnp.ones((1, embed_dim), jnp.float32))
        bn2b.append(jnp.zeros((1, embed_dim), jnp.float32))

    params.update({
        "wqkv": jnp.stack(wqkv), "wo": jnp.stack(wo),
        "bn1_g": jnp.stack(bn1g), "bn1_b": jnp.stack(bn1b),
        "ff1_w": jnp.stack(ff1w), "ff1_b": jnp.stack(ff1b),
        "ff2_w": jnp.stack(ff2w), "ff2_b": jnp.stack(ff2b),
        "bn2_g": jnp.stack(bn2g), "bn2_b": jnp.stack(bn2b),
    })
    return params


if __name__ == "__main__":
    # Small shapes consistent with CriticNetwork(inputs: (B, graph_size, input_dim))
    B, G = 2, 8
    input_dim, embedding_dim, hidden_dim, n_layers = 8, 64, 32, 2

    key = jax.random.PRNGKey(0)
    kx, kp = jax.random.split(key)
    x = jax.random.normal(kx, (B, G, input_dim), jnp.float32)
    params = init_params(kp, input_dim, embedding_dim, hidden_dim, n_layers)

    out = critic_network_forward(x, params)
    out = jax.block_until_ready(out)
    assert out.shape == (B, 1) and out.dtype == jnp.float32
    print("KERNEL_OK")
</pallas_src>

<mosaic_0001>
module attributes {stable_mosaic.version = 11 : i64} {
  func.func @kernel(%arg0: i32, %arg1: memref<16x8xf32, #tpu.memory_space<any>>, %arg2: memref<8x64xbf16, #tpu.memory_space<any>>, %arg3: memref<1x64xf32, #tpu.memory_space<vmem>>, %arg4: memref<1x64x192xbf16, #tpu.memory_space<vmem>>, %arg5: memref<1x64x64xbf16, #tpu.memory_space<vmem>>, %arg6: memref<1x1x64xf32, #tpu.memory_space<vmem>>, %arg7: memref<1x1x64xf32, #tpu.memory_space<vmem>>, %arg8: memref<1x64x512xbf16, #tpu.memory_space<vmem>>, %arg9: memref<1x1x512xf32, #tpu.memory_space<vmem>>, %arg10: memref<1x512x64xbf16, #tpu.memory_space<vmem>>, %arg11: memref<1x1x64xf32, #tpu.memory_space<vmem>>, %arg12: memref<1x1x64xf32, #tpu.memory_space<vmem>>, %arg13: memref<1x1x64xf32, #tpu.memory_space<vmem>>, %arg14: memref<64x32xbf16, #tpu.memory_space<any>>, %arg15: memref<1x32xf32, #tpu.memory_space<vmem>>, %arg16: memref<1x32xf32, #tpu.memory_space<vmem>>, %arg17: memref<1x1xf32, #tpu.memory_space<vmem>>, %arg18: memref<2x1xf32, #tpu.memory_space<vmem>>, %arg19: memref<16x64xf32, #tpu.memory_space<vmem>>, %arg20: memref<16x64xbf16, #tpu.memory_space<vmem>>) attributes {dimension_semantics = [#tpu.dimension_semantics<arbitrary>], iteration_bounds = array<i64: 2>, scalar_prefetch = 0 : i64, scratch_operands = 2 : i64, tpu.core_type = #tpu.core_type<tc>, window_params = [{}, {}, {pipeline_mode = #tpu.pipeline_mode<synchronous>, transform_indices = @transform_2, window_bounds = array<i64: 1, 64>}, {transform_indices = @transform_3, window_bounds = array<i64: 1, 64, 192>}, {transform_indices = @transform_4, window_bounds = array<i64: 1, 64, 64>}, {transform_indices = @transform_5, window_bounds = array<i64: 1, 1, 64>}, {transform_indices = @transform_6, window_bounds = array<i64: 1, 1, 64>}, {transform_indices = @transform_7, window_bounds = array<i64: 1, 64, 512>}, {transform_indices = @transform_8, window_bounds = array<i64: 1, 1, 512>}, {transform_indices = @transform_9, window_bounds = array<i64: 1, 512, 64>}, {transform_indices = @transform_10, window_bounds = array<i64: 1, 1, 64>}, {transform_indices = @transform_11, window_bounds = array<i64: 1, 1, 64>}, {transform_indices = @transform_12, window_bounds = array<i64: 1, 1, 64>}, {}, {pipeline_mode = #tpu.pipeline_mode<synchronous>, transform_indices = @transform_14, window_bounds = array<i64: 1, 32>}, {pipeline_mode = #tpu.pipeline_mode<synchronous>, transform_indices = @transform_15, window_bounds = array<i64: 1, 32>}, {pipeline_mode = #tpu.pipeline_mode<synchronous>, transform_indices = @transform_16, window_bounds = array<i64: 1, 1>}, {pipeline_mode = #tpu.pipeline_mode<synchronous>, transform_indices = @transform_17, window_bounds = array<i64: 2, 1>}]} {
    %c0_i32 = arith.constant 0 : i32
    %0 = arith.cmpi eq, %arg0, %c0_i32 : i32
    %1 = arith.extui %0 : i1 to i32
    %c0_i32_0 = arith.constant 0 : i32
    %2 = arith.cmpi ne, %1, %c0_i32_0 : i32
    scf.if %2 {
      "tpu.region"() ({
        %alloca = memref.alloca() : memref<16x8xf32, #tpu.memory_space<vmem>>
        %alloca_93 = memref.alloca() : memref<8x64xbf16, #tpu.memory_space<vmem>>
        %268 = tpu.sem_alloc : memref<2x!tpu.dma_semaphore, #tpu.memory_space<semaphore_mem>>
        %c0_i32_94 = arith.constant 0 : i32
        %269 = tpu.memref_slice %268[%c0_i32_94] : memref<2x!tpu.dma_semaphore, #tpu.memory_space<semaphore_mem>> -> memref<1x!tpu.dma_semaphore, #tpu.memory_space<semaphore_mem>>
        %270 = tpu.memref_squeeze %269 : memref<1x!tpu.dma_semaphore, #tpu.memory_space<semaphore_mem>> -> memref<!tpu.dma_semaphore, #tpu.memory_space<semaphore_mem>>
        tpu.enqueue_dma source(%arg1 : memref<16x8xf32, #tpu.memory_space<any>>) target(%alloca : memref<16x8xf32, #tpu.memory_space<vmem>>) target_semaphore(%270 : memref<!tpu.dma_semaphore, #tpu.memory_space<semaphore_mem>>)
        %c1_i32_95 = arith.constant 1 : i32
        %271 = tpu.memref_slice %268[%c1_i32_95] : memref<2x!tpu.dma_semaphore, #tpu.memory_space<semaphore_mem>> -> memref<1x!tpu.dma_semaphore, #tpu.memory_space<semaphore_mem>>
        %272 = tpu.memref_squeeze %271 : memref<1x!tpu.dma_semaphore, #tpu.memory_space<semaphore_mem>> -> memref<!tpu.dma_semaphore, #tpu.memory_space<semaphore_mem>>
        tpu.enqueue_dma source(%arg2 : memref<8x64xbf16, #tpu.memory_space<any>>) target(%alloca_93 : memref<8x64xbf16, #tpu.memory_space<vmem>>) target_semaphore(%272 : memref<!tpu.dma_semaphore, #tpu.memory_space<semaphore_mem>>)
        %c0_i32_96 = arith.constant 0 : i32
        %273 = tpu.memref_slice %268[%c0_i32_96] : memref<2x!tpu.dma_semaphore, #tpu.memory_space<semaphore_mem>> -> memref<1x!tpu.dma_semaphore, #tpu.memory_space<semaphore_mem>>
        %274 = tpu.memref_squeeze %273 : memref<1x!tpu.dma_semaphore, #tpu.memory_space<semaphore_mem>> -> memref<!tpu.dma_semaphore, #tpu.memory_space<semaphore_mem>>
        tpu.wait_dma2 semaphore(%274 : memref<!tpu.dma_semaphore, #tpu.memory_space<semaphore_mem>>) src(%arg1 : memref<16x8xf32, #tpu.memory_space<any>>) dst(%alloca : memref<16x8xf32, #tpu.memory_space<vmem>>)
        %c1_i32_97 = arith.constant 1 : i32
        %275 = tpu.memref_slice %268[%c1_i32_97] : memref<2x!tpu.dma_semaphore, #tpu.memory_space<semaphore_mem>> -> memref<1x!tpu.dma_semaphore, #tpu.memory_space<semaphore_mem>>
        %276 = tpu.memref_squeeze %275 : memref<1x!tpu.dma_semaphore, #tpu.memory_space<semaphore_mem>> -> memref<!tpu.dma_semaphore, #tpu.memory_space<semaphore_mem>>
        tpu.wait_dma2 semaphore(%276 : memref<!tpu.dma_semaphore, #tpu.memory_space<semaphore_mem>>) src(%arg2 : memref<8x64xbf16, #tpu.memory_space<any>>) dst(%alloca_93 : memref<8x64xbf16, #tpu.memory_space<vmem>>)
        %c0_98 = arith.constant 0 : index
        %c0_99 = arith.constant 0 : index
        %277 = vector.load %alloca[%c0_98, %c0_99] : memref<16x8xf32, #tpu.memory_space<vmem>>, vector<16x8xf32>
        %278 = arith.truncf %277 : vector<16x8xf32> to vector<16x8xbf16>
        %c0_100 = arith.constant 0 : index
        %c0_101 = arith.constant 0 : index
        %279 = vector.load %alloca_93[%c0_100, %c0_101] : memref<8x64xbf16, #tpu.memory_space<vmem>>, vector<8x64xbf16>
        %cst_102 = arith.constant dense<0.000000e+00> : vector<16x64xf32>
        %280 = tpu.matmul %278, %279, %cst_102 {dimension_numbers = #tpu.dot_dimension_numbers<[1], [0], [0], [1], [0, 0, 1, 1], [], []>} : vector<16x8xbf16>, vector<8x64xbf16>, vector<16x64xf32> -> vector<16x64xf32>
        %c0_103 = arith.constant 0 : index
        %c0_104 = arith.constant 0 : index
        %281 = vector.load %arg3[%c0_103, %c0_104] : memref<1x64xf32, #tpu.memory_space<vmem>>, vector<1x64xf32>
        %282 = vector.broadcast %281 : vector<1x64xf32> to vector<16x64xf32>
        %283 = arith.addf %280, %282 : vector<16x64xf32>
        %c0_105 = arith.constant 0 : index
        %c0_106 = arith.constant 0 : index
        %284 = vector.load %arg19[%c0_105, %c0_106] : memref<16x64xf32, #tpu.memory_space<vmem>>, vector<16x64xf32>
        tpu.vector_store %arg19[%c0_105, %c0_106], %283 {strides = array<i32>} : memref<16x64xf32, #tpu.memory_space<vmem>>, vector<16x64xf32>,
        tpu.yield
      }) : () -> ()
    } else {
    }
    %c0 = arith.constant 0 : index
    %c0_1 = arith.constant 0 : index
    %3 = vector.load %arg19[%c0, %c0_1] : memref<16x64xf32, #tpu.memory_space<vmem>>, vector<16x64xf32>
    %4 = arith.truncf %3 : vector<16x64xf32> to vector<16x64xbf16>
    %c0_2 = arith.constant 0 : index
    %c0_3 = arith.constant 0 : index
    %c0_4 = arith.constant 0 : index
    %5 = vector.load %arg4[%c0_2, %c0_3, %c0_4] : memref<1x64x192xbf16, #tpu.memory_space<vmem>>, vector<1x64x192xbf16>
    %6 = vector.shape_cast %5 : vector<1x64x192xbf16> to vector<64x192xbf16>
    %cst = arith.constant dense<0.000000e+00> : vector<16x192xf32>
    %7 = tpu.matmul %4, %6, %cst {dimension_numbers = #tpu.dot_dimension_numbers<[1], [0], [0], [1], [0, 0, 1, 1], [], []>} : vector<16x64xbf16>, vector<64x192xbf16>, vector<16x192xf32> -> vector<16x192xf32>
    %8 = vector.extract_strided_slice %7 {offsets = [0, 0], sizes = [16, 64], strides = [1, 1]} : vector<16x192xf32> to vector<16x64xf32>
    %cst_5 = arith.constant 0.353553385 : f32
    %9 = vector.broadcast %cst_5 : f32 to vector<16x64xf32>
    %10 = arith.mulf %8, %9 : vector<16x64xf32>
    %11 = arith.truncf %10 : vector<16x64xf32> to vector<16x64xbf16>
    %12 = vector.extract_strided_slice %7 {offsets = [0, 64], sizes = [16, 64], strides = [1, 1]} : vector<16x192xf32> to vector<16x64xf32>
    %13 = arith.truncf %12 : vector<16x64xf32> to vector<16x64xbf16>
    %14 = vector.extract_strided_slice %7 {offsets = [0, 128], sizes = [16, 64], strides = [1, 1]} : vector<16x192xf32> to vector<16x64xf32>
    %15 = arith.truncf %14 : vector<16x64xf32> to vector<16x64xbf16>
    %16 = vector.extract_strided_slice %11 {offsets = [0, 0], sizes = [16, 8], strides = [1, 1]} : vector<16x64xbf16> to vector<16x8xbf16>
    %17 = vector.shape_cast %16 : vector<16x8xbf16> to vector<2x8x8xbf16>
    %18 = vector.extract_strided_slice %13 {offsets = [0, 0], sizes = [16, 8], strides = [1, 1]} : vector<16x64xbf16> to vector<16x8xbf16>
    %19 = vector.shape_cast %18 : vector<16x8xbf16> to vector<2x8x8xbf16>
    %20 = vector.extract_strided_slice %15 {offsets = [0, 0], sizes = [16, 8], strides = [1, 1]} : vector<16x64xbf16> to vector<16x8xbf16>
    %21 = vector.shape_cast %20 : vector<16x8xbf16> to vector<2x8x8xbf16>
    "tpu.trace_start"() <{level = 10 : i32, message = "bqd,bkd->bqk"}> : () -> ()
    %cst_6 = arith.constant dense<0.000000e+00> : vector<2x8x8xf32>
    %22 = tpu.matmul %17, %19, %cst_6 {dimension_numbers = #tpu.dot_dimension_numbers<[2], [2], [1], [1], [0, 0, 0, 1, 1, 1], [0], [0]>} : vector<2x8x8xbf16>, vector<2x8x8xbf16>, vector<2x8x8xf32> -> vector<2x8x8xf32>
    "tpu.trace_stop"() : () -> ()
    %cst_7 = arith.constant dense<0xFF800000> : vector<2x8xf32>
    %23 = vector.multi_reduction <maximumf>, %22, %cst_7 [2] : vector<2x8x8xf32> to vector<2x8xf32>
    %24 = vector.shape_cast %23 : vector<2x8xf32> to vector<2x8x1xf32>
    %25 = vector.broadcast %24 : vector<2x8x1xf32> to vector<2x8x8xf32>
    %26 = arith.subf %22, %25 : vector<2x8x8xf32>
    %27 = math.exp %26 : vector<2x8x8xf32>
    %cst_8 = arith.constant dense<0.000000e+00> : vector<2x8xf32>
    %28 = vector.multi_reduction <add>, %27, %cst_8 [2] : vector<2x8x8xf32> to vector<2x8xf32>
    %29 = vector.shape_cast %28 : vector<2x8xf32> to vector<2x8x1xf32>
    %30 = tpu.reciprocal %29 {approx = true} : vector<2x8x1xf32> -> vector<2x8x1xf32>
    %31 = vector.broadcast %30 : vector<2x8x1xf32> to vector<2x8x8xf32>
    %32 = arith.mulf %27, %31 : vector<2x8x8xf32>
    %33 = arith.truncf %32 : vector<2x8x8xf32> to vector<2x8x8xbf16>
    "tpu.trace_start"() <{level = 10 : i32, message = "bqk,bkd->bqd"}> : () -> ()
    %cst_9 = arith.constant dense<0.000000e+00> : vector<2x8x8xf32>
    %34 = tpu.matmul %33, %21, %cst_9 {dimension_numbers = #tpu.dot_dimension_numbers<[2], [1], [1], [2], [0, 0, 0, 1, 1, 2], [0], [0]>} : vector<2x8x8xbf16>, vector<2x8x8xbf16>, vector<2x8x8xf32> -> vector<2x8x8xf32>
    "tpu.trace_stop"() : () -> ()
    %35 = vector.shape_cast %34 : vector<2x8x8xf32> to vector<16x8xf32>
    %36 = arith.truncf %35 : vector<16x8xf32> to vector<16x8xbf16>
    %c0_10 = arith.constant 0 : index
    %c0_11 = arith.constant 0 : index
    %37 = vector.load %arg20[%c0_10, %c0_11] : memref<16x64xbf16, #tpu.memory_space<vmem>>, vector<16x8xbf16>
    tpu.vector_store %arg20[%c0_10, %c0_11], %36 {strides = array<i32>} : memref<16x64xbf16, #tpu.memory_space<vmem>>, vector<16x8xbf16>,
    %38 = vector.extract_strided_slice %11 {offsets = [0, 8], sizes = [16, 8], strides = [1, 1]} : vector<16x64xbf16> to vector<16x8xbf16>
    %39 = vector.shape_cast %38 : vector<16x8xbf16> to vector<2x8x8xbf16>
    %40 = vector.extract_strided_slice %13 {offsets = [0, 8], sizes = [16, 8], strides = [1, 1]} : vector<16x64xbf16> to vector<16x8xbf16>
    %41 = vector.shape_cast %40 : vector<16x8xbf16> to vector<2x8x8xbf16>
    %42 = vector.extract_strided_slice %15 {offsets = [0, 8], sizes = [16, 8], strides = [1, 1]} : vector<16x64xbf16> to vector<16x8xbf16>
    %43 = vector.shape_cast %42 : vector<16x8xbf16> to vector<2x8x8xbf16>
    "tpu.trace_start"() <{level = 10 : i32, message = "bqd,bkd->bqk"}> : () -> ()
    %cst_12 = arith.constant dense<0.000000e+00> : vector<2x8x8xf32>
    %44 = tpu.matmul %39, %41, %cst_12 {dimension_numbers = #tpu.dot_dimension_numbers<[2], [2], [1], [1], [0, 0, 0, 1, 1, 1], [0], [0]>} : vector<2x8x8xbf16>, vector<2x8x8xbf16>, vector<2x8x8xf32> -> vector<2x8x8xf32>
    "tpu.trace_stop"() : () -> ()
    %cst_13 = arith.constant dense<0xFF800000> : vector<2x8xf32>
    %45 = vector.multi_reduction <maximumf>, %44, %cst_13 [2] : vector<2x8x8xf32> to vector<2x8xf32>
    %46 = vector.shape_cast %45 : vector<2x8xf32> to vector<2x8x1xf32>
    %47 = vector.broadcast %46 : vector<2x8x1xf32> to vector<2x8x8xf32>
    %48 = arith.subf %44, %47 : vector<2x8x8xf32>
    %49 = math.exp %48 : vector<2x8x8xf32>
    %cst_14 = arith.constant dense<0.000000e+00> : vector<2x8xf32>
    %50 = vector.multi_reduction <add>, %49, %cst_14 [2] : vector<2x8x8xf32> to vector<2x8xf32>
    %51 = vector.shape_cast %50 : vector<2x8xf32> to vector<2x8x1xf32>
    %52 = tpu.reciprocal %51 {approx = true} : vector<2x8x1xf32> -> vector<2x8x1xf32>
    %53 = vector.broadcast %52 : vector<2x8x1xf32> to vector<2x8x8xf32>
    %54 = arith.mulf %49, %53 : vector<2x8x8xf32>
    %55 = arith.truncf %54 : vector<2x8x8xf32> to vector<2x8x8xbf16>
    "tpu.trace_start"() <{level = 10 : i32, message = "bqk,bkd->bqd"}> : () -> ()
    %cst_15 = arith.constant dense<0.000000e+00> : vector<2x8x8xf32>
    %56 = tpu.matmul %55, %43, %cst_15 {dimension_numbers = #tpu.dot_dimension_numbers<[2], [1], [1], [2], [0, 0, 0, 1, 1, 2], [0], [0]>} : vector<2x8x8xbf16>, vector<2x8x8xbf16>, vector<2x8x8xf32> -> vector<2x8x8xf32>
    "tpu.trace_stop"() : () -> ()
    %57 = vector.shape_cast %56 : vector<2x8x8xf32> to vector<16x8xf32>
    %58 = arith.truncf %57 : vector<16x8xf32> to vector<16x8xbf16>
    %c0_16 = arith.constant 0 : index
    %c8 = arith.constant 8 : index
    %59 = vector.load %arg20[%c0_16, %c8] : memref<16x64xbf16, #tpu.memory_space<vmem>>, vector<16x8xbf16>
    tpu.vector_store %arg20[%c0_16, %c8], %58 {strides = array<i32>} : memref<16x64xbf16, #tpu.memory_space<vmem>>, vector<16x8xbf16>,
    %60 = vector.extract_strided_slice %11 {offsets = [0, 16], sizes = [16, 8], strides = [1, 1]} : vector<16x64xbf16> to vector<16x8xbf16>
    %61 = vector.shape_cast %60 : vector<16x8xbf16> to vector<2x8x8xbf16>
    %62 = vector.extract_strided_slice %13 {offsets = [0, 16], sizes = [16, 8], strides = [1, 1]} : vector<16x64xbf16> to vector<16x8xbf16>
    %63 = vector.shape_cast %62 : vector<16x8xbf16> to vector<2x8x8xbf16>
    %64 = vector.extract_strided_slice %15 {offsets = [0, 16], sizes = [16, 8], strides = [1, 1]} : vector<16x64xbf16> to vector<16x8xbf16>
    %65 = vector.shape_cast %64 : vector<16x8xbf16> to vector<2x8x8xbf16>
    "tpu.trace_start"() <{level = 10 : i32, message = "bqd,bkd->bqk"}> : () -> ()
    %cst_17 = arith.constant dense<0.000000e+00> : vector<2x8x8xf32>
    %66 = tpu.matmul %61, %63, %cst_17 {dimension_numbers = #tpu.dot_dimension_numbers<[2], [2], [1], [1], [0, 0, 0, 1, 1, 1], [0], [0]>} : vector<2x8x8xbf16>, vector<2x8x8xbf16>, vector<2x8x8xf32> -> vector<2x8x8xf32>
    "tpu.trace_stop"() : () -> ()
    %cst_18 = arith.constant dense<0xFF800000> : vector<2x8xf32>
    %67 = vector.multi_reduction <maximumf>, %66, %cst_18 [2] : vector<2x8x8xf32> to vector<2x8xf32>
    %68 = vector.shape_cast %67 : vector<2x8xf32> to vector<2x8x1xf32>
    %69 = vector.broadcast %68 : vector<2x8x1xf32> to vector<2x8x8xf32>
    %70 = arith.subf %66, %69 : vector<2x8x8xf32>
    %71 = math.exp %70 : vector<2x8x8xf32>
    %cst_19 = arith.constant dense<0.000000e+00> : vector<2x8xf32>
    %72 = vector.multi_reduction <add>, %71, %cst_19 [2] : vector<2x8x8xf32> to vector<2x8xf32>
    %73 = vector.shape_cast %72 : vector<2x8xf32> to vector<2x8x1xf32>
    %74 = tpu.reciprocal %73 {approx = true} : vector<2x8x1xf32> -> vector<2x8x1xf32>
    %75 = vector.broadcast %74 : vector<2x8x1xf32> to vector<2x8x8xf32>
    %76 = arith.mulf %71, %75 : vector<2x8x8xf32>
    %77 = arith.truncf %76 : vector<2x8x8xf32> to vector<2x8x8xbf16>
    "tpu.trace_start"() <{level = 10 : i32, message = "bqk,bkd->bqd"}> : () -> ()
    %cst_20 = arith.constant dense<0.000000e+00> : vector<2x8x8xf32>
    %78 = tpu.matmul %77, %65, %cst_20 {dimension_numbers = #tpu.dot_dimension_numbers<[2], [1], [1], [2], [0, 0, 0, 1, 1, 2], [0], [0]>} : vector<2x8x8xbf16>, vector<2x8x8xbf16>, vector<2x8x8xf32> -> vector<2x8x8xf32>
    "tpu.trace_stop"() : () -> ()
    %79 = vector.shape_cast %78 : vector<2x8x8xf32> to vector<16x8xf32>
    %80 = arith.truncf %79 : vector<16x8xf32> to vector<16x8xbf16>
    %c0_21 = arith.constant 0 : index
    %c16 = arith.constant 16 : index
    %81 = vector.load %arg20[%c0_21, %c16] : memref<16x64xbf16, #tpu.memory_space<vmem>>, vector<16x8xbf16>
    tpu.vector_store %arg20[%c0_21, %c16], %80 {strides = array<i32>} : memref<16x64xbf16, #tpu.memory_space<vmem>>, vector<16x8xbf16>,
    %82 = vector.extract_strided_slice %11 {offsets = [0, 24], sizes = [16, 8], strides = [1, 1]} : vector<16x64xbf16> to vector<16x8xbf16>
    %83 = vector.shape_cast %82 : vector<16x8xbf16> to vector<2x8x8xbf16>
    %84 = vector.extract_strided_slice %13 {offsets = [0, 24], sizes = [16, 8], strides = [1, 1]} : vector<16x64xbf16> to vector<16x8xbf16>
    %85 = vector.shape_cast %84 : vector<16x8xbf16> to vector<2x8x8xbf16>
    %86 = vector.extract_strided_slice %15 {offsets = [0, 24], sizes = [16, 8], strides = [1, 1]} : vector<16x64xbf16> to vector<16x8xbf16>
    %87 = vector.shape_cast %86 : vector<16x8xbf16> to vector<2x8x8xbf16>
    "tpu.trace_start"() <{level = 10 : i32, message = "bqd,bkd->bqk"}> : () -> ()
    %cst_22 = arith.constant dense<0.000000e+00> : vector<2x8x8xf32>
    %88 = tpu.matmul %83, %85, %cst_22 {dimension_numbers = #tpu.dot_dimension_numbers<[2], [2], [1], [1], [0, 0, 0, 1, 1, 1], [0], [0]>} : vector<2x8x8xbf16>, vector<2x8x8xbf16>, vector<2x8x8xf32> -> vector<2x8x8xf32>
    "tpu.trace_stop"() : () -> ()
    %cst_23 = arith.constant dense<0xFF800000> : vector<2x8xf32>
    %89 = vector.multi_reduction <maximumf>, %88, %cst_23 [2] : vector<2x8x8xf32> to vector<2x8xf32>
    %90 = vector.shape_cast %89 : vector<2x8xf32> to vector<2x8x1xf32>
    %91 = vector.broadcast %90 : vector<2x8x1xf32> to vector<2x8x8xf32>
    %92 = arith.subf %88, %91 : vector<2x8x8xf32>
    %93 = math.exp %92 : vector<2x8x8xf32>
    %cst_24 = arith.constant dense<0.000000e+00> : vector<2x8xf32>
    %94 = vector.multi_reduction <add>, %93, %cst_24 [2] : vector<2x8x8xf32> to vector<2x8xf32>
    %95 = vector.shape_cast %94 : vector<2x8xf32> to vector<2x8x1xf32>
    %96 = tpu.reciprocal %95 {approx = true} : vector<2x8x1xf32> -> vector<2x8x1xf32>
    %97 = vector.broadcast %96 : vector<2x8x1xf32> to vector<2x8x8xf32>
    %98 = arith.mulf %93, %97 : vector<2x8x8xf32>
    %99 = arith.truncf %98 : vector<2x8x8xf32> to vector<2x8x8xbf16>
    "tpu.trace_start"() <{level = 10 : i32, message = "bqk,bkd->bqd"}> : () -> ()
    %cst_25 = arith.constant dense<0.000000e+00> : vector<2x8x8xf32>
    %100 = tpu.matmul %99, %87, %cst_25 {dimension_numbers = #tpu.dot_dimension_numbers<[2], [1], [1], [2], [0, 0, 0, 1, 1, 2], [0], [0]>} : vector<2x8x8xbf16>, vector<2x8x8xbf16>, vector<2x8x8xf32> -> vector<2x8x8xf32>
    "tpu.trace_stop"() : () -> ()
    %101 = vector.shape_cast %100 : vector<2x8x8xf32> to vector<16x8xf32>
    %102 = arith.truncf %101 : vector<16x8xf32> to vector<16x8xbf16>
    %c0_26 = arith.constant 0 : index
    %c24 = arith.constant 24 : index
    %103 = vector.load %arg20[%c0_26, %c24] : memref<16x64xbf16, #tpu.memory_space<vmem>>, vector<16x8xbf16>
    tpu.vector_store %arg20[%c0_26, %c24], %102 {strides = array<i32>} : memref<16x64xbf16, #tpu.memory_space<vmem>>, vector<16x8xbf16>,
    %104 = vector.extract_strided_slice %11 {offsets = [0, 32], sizes = [16, 8], strides = [1, 1]} : vector<16x64xbf16> to vector<16x8xbf16>
    %105 = vector.shape_cast %104 : vector<16x8xbf16> to vector<2x8x8xbf16>
    %106 = vector.extract_strided_slice %13 {offsets = [0, 32], sizes = [16, 8], strides = [1, 1]} : vector<16x64xbf16> to vector<16x8xbf16>
    %107 = vector.shape_cast %106 : vector<16x8xbf16> to vector<2x8x8xbf16>
    %108 = vector.extract_strided_slice %15 {offsets = [0, 32], sizes = [16, 8], strides = [1, 1]} : vector<16x64xbf16> to vector<16x8xbf16>
    %109 = vector.shape_cast %108 : vector<16x8xbf16> to vector<2x8x8xbf16>
    "tpu.trace_start"() <{level = 10 : i32, message = "bqd,bkd->bqk"}> : () -> ()
    %cst_27 = arith.constant dense<0.000000e+00> : vector<2x8x8xf32>
    %110 = tpu.matmul %105, %107, %cst_27 {dimension_numbers = #tpu.dot_dimension_numbers<[2], [2], [1], [1], [0, 0, 0, 1, 1, 1], [0], [0]>} : vector<2x8x8xbf16>, vector<2x8x8xbf16>, vector<2x8x8xf32> -> vector<2x8x8xf32>
    "tpu.trace_stop"() : () -> ()
    %cst_28 = arith.constant dense<0xFF800000> : vector<2x8xf32>
    %111 = vector.multi_reduction <maximumf>, %110, %cst_28 [2] : vector<2x8x8xf32> to vector<2x8xf32>
    %112 = vector.shape_cast %111 : vector<2x8xf32> to vector<2x8x1xf32>
    %113 = vector.broadcast %112 : vector<2x8x1xf32> to vector<2x8x8xf32>
    %114 = arith.subf %110, %113 : vector<2x8x8xf32>
    %115 = math.exp %114 : vector<2x8x8xf32>
    %cst_29 = arith.constant dense<0.000000e+00> : vector<2x8xf32>
    %116 = vector.multi_reduction <add>, %115, %cst_29 [2] : vector<2x8x8xf32> to vector<2x8xf32>
    %117 = vector.shape_cast %116 : vector<2x8xf32> to vector<2x8x1xf32>
    %118 = tpu.reciprocal %117 {approx = true} : vector<2x8x1xf32> -> vector<2x8x1xf32>
    %119 = vector.broadcast %118 : vector<2x8x1xf32> to vector<2x8x8xf32>
    %120 = arith.mulf %115, %119 : vector<2x8x8xf32>
    %121 = arith.truncf %120 : vector<2x8x8xf32> to vector<2x8x8xbf16>
    "tpu.trace_start"() <{level = 10 : i32, message = "bqk,bkd->bqd"}> : () -> ()
    %cst_30 = arith.constant dense<0.000000e+00> : vector<2x8x8xf32>
    %122 = tpu.matmul %121, %109, %cst_30 {dimension_numbers = #tpu.dot_dimension_numbers<[2], [1], [1], [2], [0, 0, 0, 1, 1, 2], [0], [0]>} : vector<2x8x8xbf16>, vector<2x8x8xbf16>, vector<2x8x8xf32> -> vector<2x8x8xf32>
    "tpu.trace_stop"() : () -> ()
    %123 = vector.shape_cast %122 : vector<2x8x8xf32> to vector<16x8xf32>
    %124 = arith.truncf %123 : vector<16x8xf32> to vector<16x8xbf16>
    %c0_31 = arith.constant 0 : index
    %c32 = arith.constant 32 : index
    %125 = vector.load %arg20[%c0_31, %c32] : memref<16x64xbf16, #tpu.memory_space<vmem>>, vector<16x8xbf16>
    tpu.vector_store %arg20[%c0_31, %c32], %124 {strides = array<i32>} : memref<16x64xbf16, #tpu.memory_space<vmem>>, vector<16x8xbf16>,
    %126 = vector.extract_strided_slice %11 {offsets = [0, 40], sizes = [16, 8], strides = [1, 1]} : vector<16x64xbf16> to vector<16x8xbf16>
    %127 = vector.shape_cast %126 : vector<16x8xbf16> to vector<2x8x8xbf16>
    %128 = vector.extract_strided_slice %13 {offsets = [0, 40], sizes = [16, 8], strides = [1, 1]} : vector<16x64xbf16> to vector<16x8xbf16>
    %129 = vector.shape_cast %128 : vector<16x8xbf16> to vector<2x8x8xbf16>
    %130 = vector.extract_strided_slice %15 {offsets = [0, 40], sizes = [16, 8], strides = [1, 1]} : vector<16x64xbf16> to vector<16x8xbf16>
    %131 = vector.shape_cast %130 : vector<16x8xbf16> to vector<2x8x8xbf16>
    "tpu.trace_start"() <{level = 10 : i32, message = "bqd,bkd->bqk"}> : () -> ()
    %cst_32 = arith.constant dense<0.000000e+00> : vector<2x8x8xf32>
    %132 = tpu.matmul %127, %129, %cst_32 {dimension_numbers = #tpu.dot_dimension_numbers<[2], [2], [1], [1], [0, 0, 0, 1, 1, 1], [0], [0]>} : vector<2x8x8xbf16>, vector<2x8x8xbf16>, vector<2x8x8xf32> -> vector<2x8x8xf32>
    "tpu.trace_stop"() : () -> ()
    %cst_33 = arith.constant dense<0xFF800000> : vector<2x8xf32>
    %133 = vector.multi_reduction <maximumf>, %132, %cst_33 [2] : vector<2x8x8xf32> to vector<2x8xf32>
    %134 = vector.shape_cast %133 : vector<2x8xf32> to vector<2x8x1xf32>
    %135 = vector.broadcast %134 : vector<2x8x1xf32> to vector<2x8x8xf32>
    %136 = arith.subf %132, %135 : vector<2x8x8xf32>
    %137 = math.exp %136 : vector<2x8x8xf32>
    %cst_34 = arith.constant dense<0.000000e+00> : vector<2x8xf32>
    %138 = vector.multi_reduction <add>, %137, %cst_34 [2] : vector<2x8x8xf32> to vector<2x8xf32>
    %139 = vector.shape_cast %138 : vector<2x8xf32> to vector<2x8x1xf32>
    %140 = tpu.reciprocal %139 {approx = true} : vector<2x8x1xf32> -> vector<2x8x1xf32>
    %141 = vector.broadcast %140 : vector<2x8x1xf32> to vector<2x8x8xf32>
    %142 = arith.mulf %137, %141 : vector<2x8x8xf32>
    %143 = arith.truncf %142 : vector<2x8x8xf32> to vector<2x8x8xbf16>
    "tpu.trace_start"() <{level = 10 : i32, message = "bqk,bkd->bqd"}> : () -> ()
    %cst_35 = arith.constant dense<0.000000e+00> : vector<2x8x8xf32>
    %144 = tpu.matmul %143, %131, %cst_35 {dimension_numbers = #tpu.dot_dimension_numbers<[2], [1], [1], [2], [0, 0, 0, 1, 1, 2], [0], [0]>} : vector<2x8x8xbf16>, vector<2x8x8xbf16>, vector<2x8x8xf32> -> vector<2x8x8xf32>
    "tpu.trace_stop"() : () -> ()
    %145 = vector.shape_cast %144 : vector<2x8x8xf32> to vector<16x8xf32>
    %146 = arith.truncf %145 : vector<16x8xf32> to vector<16x8xbf16>
    %c0_36 = arith.constant 0 : index
    %c40 = arith.constant 40 : index
    %147 = vector.load %arg20[%c0_36, %c40] : memref<16x64xbf16, #tpu.memory_space<vmem>>, vector<16x8xbf16>
    tpu.vector_store %arg20[%c0_36, %c40], %146 {strides = array<i32>} : memref<16x64xbf16, #tpu.memory_space<vmem>>, vector<16x8xbf16>,
    %148 = vector.extract_strided_slice %11 {offsets = [0, 48], sizes = [16, 8], strides = [1, 1]} : vector<16x64xbf16> to vector<16x8xbf16>
    %149 = vector.shape_cast %148 : vector<16x8xbf16> to vector<2x8x8xbf16>
    %150 = vector.extract_strided_slice %13 {offsets = [0, 48], sizes = [16, 8], strides = [1, 1]} : vector<16x64xbf16> to vector<16x8xbf16>
    %151 = vector.shape_cast %150 : vector<16x8xbf16> to vector<2x8x8xbf16>
    %152 = vector.extract_strided_slice %15 {offsets = [0, 48], sizes = [16, 8], strides = [1, 1]} : vector<16x64xbf16> to vector<16x8xbf16>
    %153 = vector.shape_cast %152 : vector<16x8xbf16> to vector<2x8x8xbf16>
    "tpu.trace_start"() <{level = 10 : i32, message = "bqd,bkd->bqk"}> : () -> ()
    %cst_37 = arith.constant dense<0.000000e+00> : vector<2x8x8xf32>
    %154 = tpu.matmul %149, %151, %cst_37 {dimension_numbers = #tpu.dot_dimension_numbers<[2], [2], [1], [1], [0, 0, 0, 1, 1, 1], [0], [0]>} : vector<2x8x8xbf16>, vector<2x8x8xbf16>, vector<2x8x8xf32> -> vector<2x8x8xf32>
    "tpu.trace_stop"() : () -> ()
    %cst_38 = arith.constant dense<0xFF800000> : vector<2x8xf32>
    %155 = vector.multi_reduction <maximumf>, %154, %cst_38 [2] : vector<2x8x8xf32> to vector<2x8xf32>
    %156 = vector.shape_cast %155 : vector<2x8xf32> to vector<2x8x1xf32>
    %157 = vector.broadcast %156 : vector<2x8x1xf32> to vector<2x8x8xf32>
    %158 = arith.subf %154, %157 : vector<2x8x8xf32>
    %159 = math.exp %158 : vector<2x8x8xf32>
    %cst_39 = arith.constant dense<0.000000e+00> : vector<2x8xf32>
    %160 = vector.multi_reduction <add>, %159, %cst_39 [2] : vector<2x8x8xf32> to vector<2x8xf32>
    %161 = vector.shape_cast %160 : vector<2x8xf32> to vector<2x8x1xf32>
    %162 = tpu.reciprocal %161 {approx = true} : vector<2x8x1xf32> -> vector<2x8x1xf32>
    %163 = vector.broadcast %162 : vector<2x8x1xf32> to vector<2x8x8xf32>
    %164 = arith.mulf %159, %163 : vector<2x8x8xf32>
    %165 = arith.truncf %164 : vector<2x8x8xf32> to vector<2x8x8xbf16>
    "tpu.trace_start"() <{level = 10 : i32, message = "bqk,bkd->bqd"}> : () -> ()
    %cst_40 = arith.constant dense<0.000000e+00> : vector<2x8x8xf32>
    %166 = tpu.matmul %165, %153, %cst_40 {dimension_numbers = #tpu.dot_dimension_numbers<[2], [1], [1], [2], [0, 0, 0, 1, 1, 2], [0], [0]>} : vector<2x8x8xbf16>, vector<2x8x8xbf16>, vector<2x8x8xf32> -> vector<2x8x8xf32>
    "tpu.trace_stop"() : () -> ()
    %167 = vector.shape_cast %166 : vector<2x8x8xf32> to vector<16x8xf32>
    %168 = arith.truncf %167 : vector<16x8xf32> to vector<16x8xbf16>
    %c0_41 = arith.constant 0 : index
    %c48 = arith.constant 48 : index
    %169 = vector.load %arg20[%c0_41, %c48] : memref<16x64xbf16, #tpu.memory_space<vmem>>, vector<16x8xbf16>
    tpu.vector_store %arg20[%c0_41, %c48], %168 {strides = array<i32>} : memref<16x64xbf16, #tpu.memory_space<vmem>>, vector<16x8xbf16>,
    %170 = vector.extract_strided_slice %11 {offsets = [0, 56], sizes = [16, 8], strides = [1, 1]} : vector<16x64xbf16> to vector<16x8xbf16>
    %171 = vector.shape_cast %170 : vector<16x8xbf16> to vector<2x8x8xbf16>
    %172 = vector.extract_strided_slice %13 {offsets = [0, 56], sizes = [16, 8], strides = [1, 1]} : vector<16x64xbf16> to vector<16x8xbf16>
    %173 = vector.shape_cast %172 : vector<16x8xbf16> to vector<2x8x8xbf16>
    %174 = vector.extract_strided_slice %15 {offsets = [0, 56], sizes = [16, 8], strides = [1, 1]} : vector<16x64xbf16> to vector<16x8xbf16>
    %175 = vector.shape_cast %174 : vector<16x8xbf16> to vector<2x8x8xbf16>
    "tpu.trace_start"() <{level = 10 : i32, message = "bqd,bkd->bqk"}> : () -> ()
    %cst_42 = arith.constant dense<0.000000e+00> : vector<2x8x8xf32>
    %176 = tpu.matmul %171, %173, %cst_42 {dimension_numbers = #tpu.dot_dimension_numbers<[2], [2], [1], [1], [0, 0, 0, 1, 1, 1], [0], [0]>} : vector<2x8x8xbf16>, vector<2x8x8xbf16>, vector<2x8x8xf32> -> vector<2x8x8xf32>
    "tpu.trace_stop"() : () -> ()
    %cst_43 = arith.constant dense<0xFF800000> : vector<2x8xf32>
    %177 = vector.multi_reduction <maximumf>, %176, %cst_43 [2] : vector<2x8x8xf32> to vector<2x8xf32>
    %178 = vector.shape_cast %177 : vector<2x8xf32> to vector<2x8x1xf32>
    %179 = vector.broadcast %178 : vector<2x8x1xf32> to vector<2x8x8xf32>
    %180 = arith.subf %176, %179 : vector<2x8x8xf32>
    %181 = math.exp %180 : vector<2x8x8xf32>
    %cst_44 = arith.constant dense<0.000000e+00> : vector<2x8xf32>
    %182 = vector.multi_reduction <add>, %181, %cst_44 [2] : vector<2x8x8xf32> to vector<2x8xf32>
    %183 = vector.shape_cast %182 : vector<2x8xf32> to vector<2x8x1xf32>
    %184 = tpu.reciprocal %183 {approx = true} : vector<2x8x1xf32> -> vector<2x8x1xf32>
    %185 = vector.broadcast %184 : vector<2x8x1xf32> to vector<2x8x8xf32>
    %186 = arith.mulf %181, %185 : vector<2x8x8xf32>
    %187 = arith.truncf %186 : vector<2x8x8xf32> to vector<2x8x8xbf16>
    "tpu.trace_start"() <{level = 10 : i32, message = "bqk,bkd->bqd"}> : () -> ()
    %cst_45 = arith.constant dense<0.000000e+00> : vector<2x8x8xf32>
    %188 = tpu.matmul %187, %175, %cst_45 {dimension_numbers = #tpu.dot_dimension_numbers<[2], [1], [1], [2], [0, 0, 0, 1, 1, 2], [0], [0]>} : vector<2x8x8xbf16>, vector<2x8x8xbf16>, vector<2x8x8xf32> -> vector<2x8x8xf32>
    "tpu.trace_stop"() : () -> ()
    %189 = vector.shape_cast %188 : vector<2x8x8xf32> to vector<16x8xf32>
    %190 = arith.truncf %189 : vector<16x8xf32> to vector<16x8xbf16>
    %c0_46 = arith.constant 0 : index
    %c56 = arith.constant 56 : index
    %191 = vector.load %arg20[%c0_46, %c56] : memref<16x64xbf16, #tpu.memory_space<vmem>>, vector<16x8xbf16>
    tpu.vector_store %arg20[%c0_46, %c56], %190 {strides = array<i32>} : memref<16x64xbf16, #tpu.memory_space<vmem>>, vector<16x8xbf16>,
    %c0_47 = arith.constant 0 : index
    %c0_48 = arith.constant 0 : index
    %192 = vector.load %arg20[%c0_47, %c0_48] : memref<16x64xbf16, #tpu.memory_space<vmem>>, vector<16x64xbf16>
    %c0_49 = arith.constant 0 : index
    %c0_50 = arith.constant 0 : index
    %c0_51 = arith.constant 0 : index
    %193 = vector.load %arg5[%c0_49, %c0_50, %c0_51] : memref<1x64x64xbf16, #tpu.memory_space<vmem>>, vector<1x64x64xbf16>
    %194 = vector.shape_cast %193 : vector<1x64x64xbf16> to vector<64x64xbf16>
    %cst_52 = arith.constant dense<0.000000e+00> : vector<16x64xf32>
    %195 = tpu.matmul %192, %194, %cst_52 {dimension_numbers = #tpu.dot_dimension_numbers<[1], [0], [0], [1], [0, 0, 1, 1], [], []>} : vector<16x64xbf16>, vector<64x64xbf16>, vector<16x64xf32> -> vector<16x64xf32>
    %196 = arith.addf %3, %195 : vector<16x64xf32>
    %c0_53 = arith.constant 0 : index
    %c0_54 = arith.constant 0 : index
    %c0_55 = arith.constant 0 : index
    %197 = vector.load %arg6[%c0_53, %c0_54, %c0_55] : memref<1x1x64xf32, #tpu.memory_space<vmem>>, vector<1x1x64xf32>
    %198 = vector.shape_cast %197 : vector<1x1x64xf32> to vector<1x64xf32>
    %c0_56 = arith.constant 0 : index
    %c0_57 = arith.constant 0 : index
    %c0_58 = arith.constant 0 : index
    %199 = vector.load %arg7[%c0_56, %c0_57, %c0_58] : memref<1x1x64xf32, #tpu.memory_space<vmem>>, vector<1x1x64xf32>
    %200 = vector.shape_cast %199 : vector<1x1x64xf32> to vector<1x64xf32>
    %cst_59 = arith.constant dense<0.000000e+00> : vector<64xf32>
    %201 = vector.multi_reduction <add>, %196, %cst_59 [0] : vector<16x64xf32> to vector<64xf32>
    %202 = vector.shape_cast %201 : vector<64xf32> to vector<1x64xf32>
    %cst_60 = arith.constant 6.250000e-02 : f32
    %203 = vector.broadcast %cst_60 : f32 to vector<1x64xf32>
    %204 = arith.mulf %202, %203 : vector<1x64xf32>
    %205 = vector.broadcast %204 : vector<1x64xf32> to vector<16x64xf32>
    %206 = arith.subf %196, %205 : vector<16x64xf32>
    %207 = arith.mulf %206, %206 : vector<16x64xf32>
    %cst_61 = arith.constant dense<0.000000e+00> : vector<64xf32>
    %208 = vector.multi_reduction <add>, %207, %cst_61 [0] : vector<16x64xf32> to vector<64xf32>
    %209 = vector.shape_cast %208 : vector<64xf32> to vector<1x64xf32>
    %cst_62 = arith.constant 6.250000e-02 : f32
    %210 = vector.broadcast %cst_62 : f32 to vector<1x64xf32>
    %211 = arith.mulf %209, %210 : vector<1x64xf32>
    %cst_63 = arith.constant 9.99999974E-6 : f32
    %212 = vector.broadcast %cst_63 : f32 to vector<1x64xf32>
    %213 = arith.addf %211, %212 : vector<1x64xf32>
    %214 = math.rsqrt %213 : vector<1x64xf32>
    %215 = vector.broadcast %214 : vector<1x64xf32> to vector<16x64xf32>
    %216 = arith.mulf %206, %215 : vector<16x64xf32>
    %217 = vector.broadcast %198 : vector<1x64xf32> to vector<16x64xf32>
    %218 = arith.mulf %216, %217 : vector<16x64xf32>
    %219 = vector.broadcast %200 : vector<1x64xf32> to vector<16x64xf32>
    %220 = arith.addf %218, %219 : vector<16x64xf32>
    %221 = arith.truncf %220 : vector<16x64xf32> to vector<16x64xbf16>
    %c0_64 = arith.constant 0 : index
    %c0_65 = arith.constant 0 : index
    %c0_66 = arith.constant 0 : index
    %222 = vector.load %arg8[%c0_64, %c0_65, %c0_66] : memref<1x64x512xbf16, #tpu.memory_space<vmem>>, vector<1x64x512xbf16>
    %223 = vector.shape_cast %222 : vector<1x64x512xbf16> to vector<64x512xbf16>
    %cst_67 = arith.constant dense<0.000000e+00> : vector<16x512xf32>
    %224 = tpu.matmul %221, %223, %cst_67 {dimension_numbers = #tpu.dot_dimension_numbers<[1], [0], [0], [1], [0, 0, 1, 1], [], []>} : vector<16x64xbf16>, vector<64x512xbf16>, vector<16x512xf32> -> vector<16x512xf32>
    %c0_68 = arith.constant 0 : index
    %c0_69 = arith.constant 0 : index
    %c0_70 = arith.constant 0 : index
    %225 = vector.load %arg9[%c0_68, %c0_69, %c0_70] : memref<1x1x512xf32, #tpu.memory_space<vmem>>, vector<1x1x512xf32>
    %226 = vector.shape_cast %225 : vector<1x1x512xf32> to vector<1x512xf32>
    %227 = vector.broadcast %226 : vector<1x512xf32> to vector<16x512xf32>
    %228 = arith.addf %224, %227 : vector<16x512xf32>
    %cst_71 = arith.constant 0.000000e+00 : f32
    %229 = vector.broadcast %cst_71 : f32 to vector<16x512xf32>
    %230 = arith.maximumf %228, %229 : vector<16x512xf32>
    %231 = arith.truncf %230 : vector<16x512xf32> to vector<16x512xbf16>
    %c0_72 = arith.constant 0 : index
    %c0_73 = arith.constant 0 : index
    %c0_74 = arith.constant 0 : index
    %232 = vector.load %arg10[%c0_72, %c0_73, %c0_74] : memref<1x512x64xbf16, #tpu.memory_space<vmem>>, vector<1x512x64xbf16>
    %233 = vector.shape_cast %232 : vector<1x512x64xbf16> to vector<512x64xbf16>
    %cst_75 = arith.constant dense<0.000000e+00> : vector<16x64xf32>
    %234 = tpu.matmul %231, %233, %cst_75 {dimension_numbers = #tpu.dot_dimension_numbers<[1], [0], [0], [1], [0, 0, 1, 1], [], []>} : vector<16x512xbf16>, vector<512x64xbf16>, vector<16x64xf32> -> vector<16x64xf32>
    %c0_76 = arith.constant 0 : index
    %c0_77 = arith.constant 0 : index
    %c0_78 = arith.constant 0 : index
    %235 = vector.load %arg11[%c0_76, %c0_77, %c0_78] : memref<1x1x64xf32, #tpu.memory_space<vmem>>, vector<1x1x64xf32>
    %236 = vector.shape_cast %235 : vector<1x1x64xf32> to vector<1x64xf32>
    %237 = vector.broadcast %236 : vector<1x64xf32> to vector<16x64xf32>
    %238 = arith.addf %234, %237 : vector<16x64xf32>
    %239 = arith.addf %220, %238 : vector<16x64xf32>
    %c0_79 = arith.constant 0 : index
    %c0_80 = arith.constant 0 : index
    %c0_81 = arith.constant 0 : index
    %240 = vector.load %arg12[%c0_79, %c0_80, %c0_81] : memref<1x1x64xf32, #tpu.memory_space<vmem>>, vector<1x1x64xf32>
    %241 = vector.shape_cast %240 : vector<1x1x64xf32> to vector<1x64xf32>
    %c0_82 = arith.constant 0 : index
    %c0_83 = arith.constant 0 : index
    %c0_84 = arith.constant 0 : index
    %242 = vector.load %arg13[%c0_82, %c0_83, %c0_84] : memref<1x1x64xf32, #tpu.memory_space<vmem>>, vector<1x1x64xf32>
    %243 = vector.shape_cast %242 : vector<1x1x64xf32> to vector<1x64xf32>
    %cst_85 = arith.constant dense<0.000000e+00> : vector<64xf32>
    %244 = vector.multi_reduction <add>, %239, %cst_85 [0] : vector<16x64xf32> to vector<64xf32>
    %245 = vector.shape_cast %244 : vector<64xf32> to vector<1x64xf32>
    %cst_86 = arith.constant 6.250000e-02 : f32
    %246 = vector.broadcast %cst_86 : f32 to vector<1x64xf32>
    %247 = arith.mulf %245, %246 : vector<1x64xf32>
    %248 = vector.broadcast %247 : vector<1x64xf32> to vector<16x64xf32>
    %249 = arith.subf %239, %248 : vector<16x64xf32>
    %250 = arith.mulf %249, %249 : vector<16x64xf32>
    %cst_87 = arith.constant dense<0.000000e+00> : vector<64xf32>
    %251 = vector.multi_reduction <add>, %250, %cst_87 [0] : vector<16x64xf32> to vector<64xf32>
    %252 = vector.shape_cast %251 : vector<64xf32> to vector<1x64xf32>
    %cst_88 = arith.constant 6.250000e-02 : f32
    %253 = vector.broadcast %cst_88 : f32 to vector<1x64xf32>
    %254 = arith.mulf %252, %253 : vector<1x64xf32>
    %cst_89 = arith.constant 9.99999974E-6 : f32
    %255 = vector.broadcast %cst_89 : f32 to vector<1x64xf32>
    %256 = arith.addf %254, %255 : vector<1x64xf32>
    %257 = math.rsqrt %256 : vector<1x64xf32>
    %258 = vector.broadcast %257 : vector<1x64xf32> to vector<16x64xf32>
    %259 = arith.mulf %249, %258 : vector<16x64xf32>
    %260 = vector.broadcast %241 : vector<1x64xf32> to vector<16x64xf32>
    %261 = arith.mulf %259, %260 : vector<16x64xf32>
    %262 = vector.broadcast %243 : vector<1x64xf32> to vector<16x64xf32>
    %263 = arith.addf %261, %262 : vector<16x64xf32>
    %c0_90 = arith.constant 0 : index
    %c0_91 = arith.constant 0 : index
    %264 = vector.load %arg19[%c0_90, %c0_91] : memref<16x64xf32, #tpu.memory_space<vmem>>, vector<16x64xf32>
    tpu.vector_store %arg19[%c0_90, %c0_91], %263 {strides = array<i32>} : memref<16x64xf32, #tpu.memory_space<vmem>>, vector<16x64xf32>,
    %c1_i32 = arith.constant 1 : i32
    %265 = arith.cmpi eq, %arg0, %c1_i32 : i32
    %266 = arith.extui %265 : i1 to i32
    %c0_i32_92 = arith.constant 0 : i32
    %267 = arith.cmpi ne, %266, %c0_i32_92 : i32
    scf.if %267 {
      "tpu.region"() ({
        %alloca = memref.alloca() : memref<64x32xbf16, #tpu.memory_space<vmem>>
        %268 = tpu.sem_alloc : memref<1x!tpu.dma_semaphore, #tpu.memory_space<semaphore_mem>>
        %c0_i32_93 = arith.constant 0 : i32
        %269 = tpu.memref_slice %268[%c0_i32_93] : memref<1x!tpu.dma_semaphore, #tpu.memory_space<semaphore_mem>> -> memref<1x!tpu.dma_semaphore, #tpu.memory_space<semaphore_mem>>
        %270 = tpu.memref_squeeze %269 : memref<1x!tpu.dma_semaphore, #tpu.memory_space<semaphore_mem>> -> memref<!tpu.dma_semaphore, #tpu.memory_space<semaphore_mem>>
        tpu.enqueue_dma source(%arg14 : memref<64x32xbf16, #tpu.memory_space<any>>) target(%alloca : memref<64x32xbf16, #tpu.memory_space<vmem>>) target_semaphore(%270 : memref<!tpu.dma_semaphore, #tpu.memory_space<semaphore_mem>>)
        %c0_i32_94 = arith.constant 0 : i32
        %271 = tpu.memref_slice %268[%c0_i32_94] : memref<1x!tpu.dma_semaphore, #tpu.memory_space<semaphore_mem>> -> memref<1x!tpu.dma_semaphore, #tpu.memory_space<semaphore_mem>>
        %272 = tpu.memref_squeeze %271 : memref<1x!tpu.dma_semaphore, #tpu.memory_space<semaphore_mem>> -> memref<!tpu.dma_semaphore, #tpu.memory_space<semaphore_mem>>
        tpu.wait_dma2 semaphore(%272 : memref<!tpu.dma_semaphore, #tpu.memory_space<semaphore_mem>>) src(%arg14 : memref<64x32xbf16, #tpu.memory_space<any>>) dst(%alloca : memref<64x32xbf16, #tpu.memory_space<vmem>>)
        %273 = vector.shape_cast %263 : vector<16x64xf32> to vector<2x8x64xf32>
        %cst_95 = arith.constant dense<0.000000e+00> : vector<2x64xf32>
        %274 = vector.multi_reduction <add>, %273, %cst_95 [1] : vector<2x8x64xf32> to vector<2x64xf32>
        %cst_96 = arith.constant 8.000000e+00 : f32
        %275 = vector.broadcast %cst_96 : f32 to vector<2x64xf32>
        %276 = arith.divf %274, %275 : vector<2x64xf32>
        %277 = arith.truncf %276 : vector<2x64xf32> to vector<2x64xbf16>
        %c0_97 = arith.constant 0 : index
        %c0_98 = arith.constant 0 : index
        %278 = vector.load %alloca[%c0_97, %c0_98] : memref<64x32xbf16, #tpu.memory_space<vmem>>, vector<64x32xbf16>
        %cst_99 = arith.constant dense<0.000000e+00> : vector<2x32xf32>
        %279 = tpu.matmul %277, %278, %cst_99 {dimension_numbers = #tpu.dot_dimension_numbers<[1], [0], [0], [1], [0, 0, 1, 1], [], []>} : vector<2x64xbf16>, vector<64x32xbf16>, vector<2x32xf32> -> vector<2x32xf32>
        %c0_100 = arith.constant 0 : index
        %c0_101 = arith.constant 0 : index
        %280 = vector.load %arg15[%c0_100, %c0_101] : memref<1x32xf32, #tpu.memory_space<vmem>>, vector<1x32xf32>
        %281 = vector.broadcast %280 : vector<1x32xf32> to vector<2x32xf32>
        %282 = arith.addf %279, %281 : vector<2x32xf32>
        %cst_102 = arith.constant 0.000000e+00 : f32
        %283 = vector.broadcast %cst_102 : f32 to vector<2x32xf32>
        %284 = arith.maximumf %282, %283 : vector<2x32xf32>
        %c0_103 = arith.constant 0 : index
        %c0_104 = arith.constant 0 : index
        %285 = vector.load %arg16[%c0_103, %c0_104] : memref<1x32xf32, #tpu.memory_space<vmem>>, vector<1x32xf32>
        %286 = vector.broadcast %285 : vector<1x32xf32> to vector<2x32xf32>
        %287 = arith.mulf %284, %286 : vector<2x32xf32>
        %cst_105 = arith.constant dense<0.000000e+00> : vector<2xf32>
        %288 = vector.multi_reduction <add>, %287, %cst_105 [1] : vector<2x32xf32> to vector<2xf32>
        %289 = vector.shape_cast %288 : vector<2xf32> to vector<2x1xf32>
        %c0_106 = arith.constant 0 : index
        %c0_107 = arith.constant 0 : index
        %290 = vector.load %arg17[%c0_106, %c0_107] : memref<1x1xf32, #tpu.memory_space<vmem>>, vector<1x1xf32>
        %291 = vector.broadcast %290 : vector<1x1xf32> to vector<2x1xf32>
        %292 = arith.addf %289, %291 : vector<2x1xf32>
        %c0_108 = arith.constant 0 : index
        %c0_109 = arith.constant 0 : index
        %293 = vector.load %arg18[%c0_108, %c0_109] : memref<2x1xf32, #tpu.memory_space<vmem>>, vector<2x1xf32>
        tpu.vector_store %arg18[%c0_108, %c0_109], %292 {strides = array<i32>} : memref<2x1xf32, #tpu.memory_space<vmem>>, vector<2x1xf32>,
        tpu.yield
      }) : () -> ()
    } else {
    }
    return
  }
  func.func @transform_2(%arg0: i32) -> (i32, i32) {
    %c0_i32 = arith.constant 0 : i32
    %c0_i32_0 = arith.constant 0 : i32
    %c0_i32_1 = arith.constant 0 : i32
    return %c0_i32, %c0_i32_0 : i32, i32
  }
  func.func @transform_3(%arg0: i32) -> (i32, i32, i32) {
    %c0_i32 = arith.constant 0 : i32
    %c0_i32_0 = arith.constant 0 : i32
    %c0_i32_1 = arith.constant 0 : i32
    return %arg0, %c0_i32, %c0_i32_0 : i32, i32, i32
  }
  func.func @transform_4(%arg0: i32) -> (i32, i32, i32) {
    %c0_i32 = arith.constant 0 : i32
    %c0_i32_0 = arith.constant 0 : i32
    %c0_i32_1 = arith.constant 0 : i32
    return %arg0, %c0_i32, %c0_i32_0 : i32, i32, i32
  }
  func.func @transform_5(%arg0: i32) -> (i32, i32, i32) {
    %c0_i32 = arith.constant 0 : i32
    %c0_i32_0 = arith.constant 0 : i32
    %c0_i32_1 = arith.constant 0 : i32
    return %arg0, %c0_i32, %c0_i32_0 : i32, i32, i32
  }
  func.func @transform_6(%arg0: i32) -> (i32, i32, i32) {
    %c0_i32 = arith.constant 0 : i32
    %c0_i32_0 = arith.constant 0 : i32
    %c0_i32_1 = arith.constant 0 : i32
    return %arg0, %c0_i32, %c0_i32_0 : i32, i32, i32
  }
  func.func @transform_7(%arg0: i32) -> (i32, i32, i32) {
    %c0_i32 = arith.constant 0 : i32
    %c0_i32_0 = arith.constant 0 : i32
    %c0_i32_1 = arith.constant 0 : i32
    return %arg0, %c0_i32, %c0_i32_0 : i32, i32, i32
  }
  func.func @transform_8(%arg0: i32) -> (i32, i32, i32) {
    %c0_i32 = arith.constant 0 : i32
    %c0_i32_0 = arith.constant 0 : i32
    %c0_i32_1 = arith.constant 0 : i32
    return %arg0, %c0_i32, %c0_i32_0 : i32, i32, i32
  }
  func.func @transform_9(%arg0: i32) -> (i32, i32, i32) {
    %c0_i32 = arith.constant 0 : i32
    %c0_i32_0 = arith.constant 0 : i32
    %c0_i32_1 = arith.constant 0 : i32
    return %arg0, %c0_i32, %c0_i32_0 : i32, i32, i32
  }
  func.func @transform_10(%arg0: i32) -> (i32, i32, i32) {
    %c0_i32 = arith.constant 0 : i32
    %c0_i32_0 = arith.constant 0 : i32
    %c0_i32_1 = arith.constant 0 : i32
    return %arg0, %c0_i32, %c0_i32_0 : i32, i32, i32
  }
  func.func @transform_11(%arg0: i32) -> (i32, i32, i32) {
    %c0_i32 = arith.constant 0 : i32
    %c0_i32_0 = arith.constant 0 : i32
    %c0_i32_1 = arith.constant 0 : i32
    return %arg0, %c0_i32, %c0_i32_0 : i32, i32, i32
  }
  func.func @transform_12(%arg0: i32) -> (i32, i32, i32) {
    %c0_i32 = arith.constant 0 : i32
    %c0_i32_0 = arith.constant 0 : i32
    %c0_i32_1 = arith.constant 0 : i32
    return %arg0, %c0_i32, %c0_i32_0 : i32, i32, i32
  }
  func.func @transform_14(%arg0: i32) -> (i32, i32) {
    %c0_i32 = arith.constant 0 : i32
    %c0_i32_0 = arith.constant 0 : i32
    %c0_i32_1 = arith.constant 0 : i32
    return %c0_i32, %c0_i32_0 : i32, i32
  }
  func.func @transform_15(%arg0: i32) -> (i32, i32) {
    %c0_i32 = arith.constant 0 : i32
    %c0_i32_0 = arith.constant 0 : i32
    %c0_i32_1 = arith.constant 0 : i32
    return %c0_i32, %c0_i32_0 : i32, i32
  }
  func.func @transform_16(%arg0: i32) -> (i32, i32) {
    %c0_i32 = arith.constant 0 : i32
    %c0_i32_0 = arith.constant 0 : i32
    %c0_i32_1 = arith.constant 0 : i32
    return %c0_i32, %c0_i32_0 : i32, i32
  }
  func.func @transform_17(%arg0: i32) -> (i32, i32) {
    %c0_i32 = arith.constant 0 : i32
    %c0_i32_0 = arith.constant 0 : i32
    %c0_i32_1 = arith.constant 0 : i32
    return %c0_i32, %c0_i32_0 : i32, i32
  }
}

</mosaic_0001>

<bundles_post_ra>
// kernel: tpu_custom_call.1
= control target key start
LH: loop header
LB: loop body
LE: loop exit
PB: predicated region body
PF: predicated region fallthrough
CT: control target
= control target key end

     0   :  { %s6495_s0 = inlined_call_operand.hbm [shape: f32[16,8], index: 0, kind: input, shape index: {}]   ;;  %s6496_s1 = inlined_call_operand.hbm [shape: bf16[8,64], index: 1, kind: input, shape index: {}]   ;;  %s6497_s2 = inlined_call_operand.hbm [shape: f32[1,64], index: 2, kind: input, shape index: {}]   ;;  %s6498_s3 = inlined_call_operand.hbm [shape: bf16[2,64,192], index: 3, kind: input, shape index: {}]   ;;  %s6499_s4 = inlined_call_operand.hbm [shape: bf16[2,64,64], index: 4, kind: input, shape index: {}]   ;;  %s6500_s5 = inlined_call_operand.hbm [shape: f32[2,1,64], index: 5, kind: input, shape index: {}]   ;;  %s6501_s6 = inlined_call_operand.hbm [shape: f32[2,1,64], index: 6, kind: input, shape index: {}]   ;;  %s6502_s7 = inlined_call_operand.hbm [shape: bf16[2,64,512], index: 7, kind: input, shape index: {}]   ;;  %s6503_s8 = inlined_call_operand.hbm [shape: f32[2,1,512], index: 8, kind: input, shape index: {}]   ;;  %s6504_s9 = inlined_call_operand.hbm [shape: bf16[2,512,64], index: 9, kind: input, shape index: {}]   ;;  %s6505_s10 = inlined_call_operand.hbm [shape: f32[2,1,64], index: 10, kind: input, shape index: {}]   ;;  %s6506_s11 = inlined_call_operand.hbm [shape: f32[2,1,64], index: 11, kind: input, shape index: {}]   ;;  %s6507_s12 = inlined_call_operand.hbm [shape: f32[2,1,64], index: 12, kind: input, shape index: {}]   ;;  %s6508_s13 = inlined_call_operand.hbm [shape: bf16[64,32], index: 13, kind: input, shape index: {}]   ;;  %s6509_s14 = inlined_call_operand.hbm [shape: f32[1,32], index: 14, kind: input, shape index: {}]   ;;  %s6510_s15 = inlined_call_operand.hbm [shape: f32[1,32], index: 15, kind: input, shape index: {}]   ;;  %s6511_s16 = inlined_call_operand.<no memory space> [shape: f32[1,1], index: 16, kind: input, shape index: {}]   ;;  %s6512_s17 = inlined_call_operand.hbm [shape: f32[2,1], index: 17, kind: output, shape index: {}]  }
   0x1   :  { %6545 = sst [smem:[#allocation58_spill]] %s6495_s0  ;;  %v22_v0 = vstv %s6511_s16 }
   0x2   :  { %6546 = sst [smem:[#allocation59_spill]] %s6496_s1  ;;  %23 = vst [vmem:[#allocation4] sm:$0x1] %v22_v0 }
   0x3   :  { %6547 = sst [smem:[#allocation60_spill]] %s6498_s3 }
   0x4   :  { %6548 = sst [smem:[#allocation61_spill]] %s6500_s5 }
   0x5   :  { %6549 = sst [smem:[#allocation62_spill]] %s6502_s7 }
   0x6   :  { %6550 = sst [smem:[#allocation63_spill]] %s6508_s13 }
   0x7   :  { %6551 = sst [smem:[#allocation64_spill]] %s6509_s14 }
   0x8   :  { %6552 = sst [smem:[#allocation65_spill]] %s6512_s17 }
   0x9   :  { %24 = vsyncpa [#allocation6], 0 }
   0xa   :  { %25 = vsyncpa [#allocation9], 0 }
   0xb   :  { %27 = vsyncpa [#allocation9 + $0x1], 0 }
   0xc   :  { %28 = vsyncpa [#allocation12], 0 }
   0xd   :  { %30 = vsyncpa [#allocation12 + $0x1], 0 }
   0xe   :  { %31 = vsyncpa [#allocation15], 0 }
   0xf   :  { %33 = vsyncpa [#allocation15 + $0x1], 0 }
  0x10   :  { %34 = vsyncpa [#allocation18], 0 }
  0x11   :  { %36 = vsyncpa [#allocation18 + $0x1], 0 }
  0x12   :  { %37 = vsyncpa [#allocation21], 0 }
  0x13   :  { %39 = vsyncpa [#allocation21 + $0x1], 0 }
  0x14   :  { %40 = vsyncpa [#allocation24], 0 }
  0x15   :  { %41 = vsyncpa [#allocation7], 0  ;;  %s5464_s26 = smov 0   ;;  %s5466_s27 = smov 0  }
  0x16   :  { %s5468_s28 = smov 0   ;;  %s5470_s16 = smov 0  }
  0x17 LB: > { %6553 = sst [smem:[#allocation51_spill]] %s5316_s27  ;;  %s5483_s29 = sadd.s32 4294967295, %s5324_s16   ;;  %s5324_s16 = sphi %s5470_s16, %s6608_s16   ;;  %s5320_s28 = sphi %s5468_s28, %s6611_s28   ;;  %s5316_s27 = sphi %s5466_s27, %s6610_s27   ;;  %s5312_s26 = sphi %s5464_s26, %s6609_s26  }
  0x18   : > { %6554 = sst [smem:[#allocation52_spill]] %s5320_s28  ;;  %s5486_s0 = sadd.s32 1, %s5324_s16  }
  0x19   : > { %6555 = sst [smem:[#allocation53_spill]] %s5483_s29  ;;  %s72_s30 = ssub.s32 %s5324_s16, %s5486_s0 }
  0x1a   : > { %6556 = sst [smem:[#allocation54_spill]] %s5486_s0  ;;  %s75_s18 = sadd.s32 1, %s5320_s28 }
  0x1b   : > { %p73_p0 = scmp.eq.s32.totalorder %s72_s30, 0  ;;  %p82_p1 = scmp.ne.s32.totalorder %s5320_s28, %s5316_s27 }
  0x1c   : > { %p83_p2 = scmp.eq.s32.totalorder %s5324_s16, 0  ;;  %p88_p3 = scmp.ne.s32.totalorder %s5316_s27, %s5312_s26 }
  0x1d   : > { %s5496_s19 = scalar_select %p73_p0, %s5320_s28, %s75_s18  }
  0x1e   : > { %p5498_p4 = por %p83_p2, %p82_p1  ;;  %p6522_p5 = scmp.eq.s32.totalorder %s5483_s29, 0 }
  0x1f   : > { %6557 = sst [smem:[#allocation55_spill]] %s5496_s19  ;;  %p3979_p6 = scmp.ge.s32.totalorder %s5324_s16, 1 }
  0x20   : > { %p417_p7 = scmp.lt.s32.totalorder %s5324_s16, 3  ;;  %p5507_p8 = por %p6522_p5, %p88_p3 }
  0x21   : > { %s5326_s22 = smov [#allocation23]   ;;  %p4565_p12 = scmp.lt.s32.totalorder %s5324_s16, 2 }
  0x22   : > { %s6559_s20 = scalar_select %p5507_p8, 1, 0 }
  0x23   : > { %p5512_p10 = pnand %p3979_p6, %p417_p7  ;;  %s441_s23 = sshll.u32 %s5326_s22, 4  ;;  %s442_s23 = int_to_ptr.vmem [resolvable:$true] %s441_s23 }
  0x24   : > { %6560 = sst [smem:[#allocation56_spill]] %s6559_s20  ;;  %s5520_s24 = sand.u32 1, %s5320_s28  }
  0x25   : > { %s6561_s21 = scalar_select %p5512_p10, 1, 0 }
  0x26   : > { %p4521_p11 = pneg %p5512_p10  ;;  %s5529_s26 = sand.u32 1, %s5324_s16  }
  0x27   : > { %6562 = sst [smem:[#allocation57_spill]] %s6561_s21  ;;  %p5533_p0 = pnand %p4565_p12, %p5498_p4 }
  0x28   : > { %p5524_p13 = pnand %p4521_p11, %p6522_p5  ;;  %s3984_s18 = sshll.u32 %s5520_s24, 6 }
  0x29   : > { %s6564_s30 = scalar_select %p5533_p0, 1, 0 }
  0x2a   : > { %s6563_s25 = scalar_select %p5524_p13, 1, 0 }
  0x2b   : > { %s6565_s14 = sld [smem:[#allocation64_spill]]  ;;  %p5546_p2 = pneg %p5524_p13 }
  0x2d   : > { %s6566_s13 = scalar_select %p5546_p2, 1, 0 }
  0x31   : > { %s4780_s28 = scalar_lea.hbm %s6565_s14, 16 }
  0x32   : > { %p4781_p1 = scmp.ne.s32.totalorder %s6565_s14, %s4780_s28  ;;  %p4787_p6 = scmp.lt.u32.totalorder %s4780_s28, %s6565_s14 }
  0x34   : > { %p4783_p3 = pnand %p5546_p2, %p4781_p1 }
  0x36   : > { %p4784_p4 = pneg %p4783_p3 }
  0x38   : > { %p4789_p7 = pnand %p4787_p6, %p4784_p4 }
  0x3a   : > { %4792 = shalt.err (!%p4789_p7)
}
  0x3b   : > { %s4793_s19 = scalar_lea.vmem %s442_s23, 16  ;;  %s4800_s17 = scalar_lea.vmem %s442_s23, 32 }
  0x3c   : > { %p4794_p11 = scmp.ne.s32.totalorder %s442_s23, %s4793_s19  ;;  %p4801_p5 = scmp.lt.s32.totalorder %s442_s23, %s442_s23 }
  0x3d   : > { %p4802_p8 = scmp.lt.s32.totalorder %s4800_s17, %s4793_s19 }
  0x3e   : > { %p4796_p12 = pnand %p4794_p11, %p5546_p2 }
  0x3f   : > { %p4803_p10 = por %p4802_p8, %p4801_p5 }
  0x40   : > { %p4797_p9 = pneg %p4796_p12 }
  0x42   : > { %p4804_p0 = pnand %p4803_p10, %p4797_p9 }
  0x44   : > { %4807 = shalt.err (!%p4804_p0)
}
  0x45   : > { %4527 = dma.hbm_to_vmem [thread:$0]  (!%p5524_p13), %s6565_s14, 16, %s442_s23, [#allocation24]  }
  0x46   : > { %s4132_s28 = sshll.u32 %s5324_s16, 10  ;;  %s470_s20 = scalar_lea.vmem [#allocation8], %s3984_s18 }
  0x47   : > { %s477_s1 = sshll.u32 %s470_s20, 4  ;;  %s6567_s3 = sld [smem:[#allocation60_spill]]  ;;  %s5568_s1 = int_to_ptr.vmem [resolvable:$true] %s477_s1 }
  0x48   : > { %s6535_s19 = scalar_lea.sflag [#allocation9], %s5529_s26  ;;  %p6568_p8 = scmp.ne.s32.totalorder %s6564_s30, 0 }
  0x4a   : > { %p5575_p9 = pneg %p6568_p8 }
  0x4c   : > { %s6569_s23 = scalar_select %p5575_p9, 1, 0 }
  0x4d   : > { %s5566_s21 = scalar_lea.hbm %s6567_s3, %s4132_s28  ;;  %s4813_s18 = scalar_lea.hbm %s6567_s3, 2048 }
  0x4e   : > { %s4808_s17 = scalar_lea.hbm %s5566_s21, 1024  ;;  %p4814_p1 = scmp.lt.u32.totalorder %s5566_s21, %s6567_s3 }
  0x4f   : > { %p4809_p5 = scmp.ne.s32.totalorder %s5566_s21, %s4808_s17  ;;  %p4815_p3 = scmp.lt.u32.totalorder %s4813_s18, %s4808_s17 }
  0x50   : > { %p4817_p6 = scmp.lt.u32.totalorder %s4808_s17, %s5566_s21 }
  0x51   : > { %p4811_p10 = pnand %p5575_p9, %p4809_p5  ;;  %p4816_p4 = por %p4815_p3, %p4814_p1 }
  0x53   : > { %p4812_p0 = pneg %p4811_p10  ;;  %p4818_p7 = por %p4817_p6, %p4816_p4 }
  0x55   : > { %p4819_p11 = pnand %p4818_p7, %p4812_p0 }
  0x57   : > { %4822 = shalt.err (!%p4819_p11)
}
  0x58   : > { %s4823_s28 = scalar_lea.vmem %s5568_s1, 1024  ;;  %s5327_s20 = smov [#allocation8]  }
  0x59   : > { %p4824_p12 = scmp.ne.s32.totalorder %s5568_s1, %s4823_s28  ;;  %s4828_s27 = sshll.u32 %s5327_s20, 4  ;;  %s4829_s27 = int_to_ptr.vmem [resolvable:$false] %s4828_s27 }
  0x5a   : > { %s4830_s29 = scalar_lea.vmem %s4829_s27, 2048  ;;  %p4831_p13 = scmp.lt.s32.totalorder %s5568_s1, %s4829_s27 }
  0x5b   : > { %p4826_p5 = pnand %p4824_p12, %p5575_p9  ;;  %p4832_p2 = scmp.lt.s32.totalorder %s4830_s29, %s4823_s28 }
  0x5d   : > { %p4827_p10 = pneg %p4826_p5  ;;  %p4833_p1 = por %p4832_p2, %p4831_p13 }
  0x5f   : > { %p4834_p3 = pnand %p4833_p1, %p4827_p10 }
  0x61   : > { %4837 = shalt.err (!%p4834_p3)
}
  0x62   : > { %s5328_s17 = smov 128   ;;  %s5329_s18 = smov 8  }
  0x63   : > { %4534 = dma.hbm_to_vmem [thread:$0]  (!%p6568_p8), %s5566_s21, 1024, %s5568_s1, %s6535_s19, %s5328_s17, %s5328_s17, %s5329_s18  }
  0x64   : > { %s5601_s0 = sshll.u32 %s5324_s16, 4  ;;  %s511_s22 = scalar_lea.vmem [#allocation11], %s5520_s24 }
  0x65   : > { %s518_s28 = sshll.u32 %s511_s22, 4  ;;  %s6570_s5 = sld [smem:[#allocation61_spill]]  ;;  %s519_s28 = int_to_ptr.vmem [resolvable:$true] %s518_s28 }
  0x66   : > { %s6537_s3 = scalar_lea.sflag [#allocation12], %s5529_s26 }
  0x6b   : > { %s5608_s29 = scalar_lea.hbm %s6570_s5, %s5601_s0  ;;  %s4843_s17 = scalar_lea.hbm %s6570_s5, 32 }
  0x6c   : > { %s4838_s14 = scalar_lea.hbm %s5608_s29, 16  ;;  %p4844_p4 = scmp.lt.u32.totalorder %s5608_s29, %s6570_s5 }
  0x6d   : > { %p4839_p13 = scmp.ne.s32.totalorder %s5608_s29, %s4838_s14  ;;  %p4845_p6 = scmp.lt.u32.totalorder %s4843_s17, %s4838_s14 }
  0x6e   : > { %p4847_p11 = scmp.lt.u32.totalorder %s4838_s14, %s5608_s29 }
  0x6f   : > { %p4841_p2 = pnand %p4839_p13, %p5575_p9  ;;  %p4846_p7 = por %p4845_p6, %p4844_p4 }
  0x71   : > { %p4842_p0 = pneg %p4841_p2  ;;  %p4848_p12 = por %p4847_p11, %p4846_p7 }
  0x73   : > { %p4849_p5 = pnand %p4848_p12, %p4842_p0 }
  0x75   : > { %4852 = shalt.err (!%p4849_p5)
}
  0x76   : > { %s4853_s20 = scalar_lea.vmem %s519_s28, 16  ;;  %s5330_s27 = smov [#allocation11]  }
  0x77   : > { %p4854_p10 = scmp.ne.s32.totalorder %s519_s28, %s4853_s20  ;;  %s4858_s19 = sshll.u32 %s5330_s27, 4  ;;  %s4859_s19 = int_to_ptr.vmem [resolvable:$false] %s4858_s19 }
  0x78   : > { %s4860_s21 = scalar_lea.vmem %s4859_s19, 32  ;;  %p4861_p13 = scmp.lt.s32.totalorder %s519_s28, %s4859_s19 }
  0x79   : > { %p4856_p1 = pnand %p4854_p10, %p5575_p9  ;;  %p4862_p2 = scmp.lt.s32.totalorder %s4860_s21, %s4853_s20 }
  0x7b   : > { %p4857_p3 = pneg %p4856_p1  ;;  %p4863_p8 = por %p4862_p2, %p4861_p13 }
  0x7d   : > { %p4864_p4 = pnand %p4863_p8, %p4857_p3 }
  0x7f   : > { %4867 = shalt.err (!%p4864_p4)
}
  0x80   : > { %p6571_p6 = scmp.ne.s32.totalorder %s6564_s30, 0  ;;  %s3992_s14 = sshll.u32 %s5520_s24, 7 }
  0x81   : > { %s4134_s1 = sshll.u32 %s5324_s16, 11  ;;  %s6572_s7 = sld [smem:[#allocation62_spill]] }
  0x82   : > { %4540 = dma.hbm_to_vmem [thread:$0]  (!%p6571_p6), %s5608_s29, 16, %s519_s28, %s6537_s3  }
  0x83   : > { %s546_s22 = scalar_lea.vmem [#allocation14], %s3992_s14  ;;  %s6539_s27 = scalar_lea.sflag [#allocation15], %s5529_s26 }
  0x84   : > { %s553_s20 = sshll.u32 %s546_s22, 4  ;;  %s5637_s20 = int_to_ptr.vmem [resolvable:$true] %s553_s20 }
  0x87   : > { %s5635_s19 = scalar_lea.hbm %s6572_s7, %s4134_s1  ;;  %s4873_s17 = scalar_lea.hbm %s6572_s7, 4096 }
  0x88   : > { %s4868_s21 = scalar_lea.hbm %s5635_s19, 2048  ;;  %p4874_p11 = scmp.lt.u32.totalorder %s5635_s19, %s6572_s7 }
  0x89   : > { %p4869_p8 = scmp.ne.s32.totalorder %s5635_s19, %s4868_s21  ;;  %p4875_p12 = scmp.lt.u32.totalorder %s4873_s17, %s4868_s21 }
  0x8a   : > { %p4877_p10 = scmp.lt.u32.totalorder %s4868_s21, %s5635_s19 }
  0x8b   : > { %p4871_p0 = pnand %p4869_p8, %p5575_p9  ;;  %p4876_p5 = por %p4875_p12, %p4874_p11 }
  0x8d   : > { %p4872_p7 = pneg %p4871_p0  ;;  %p4878_p1 = por %p4877_p10, %p4876_p5 }
  0x8f   : > { %p4879_p3 = pnand %p4878_p1, %p4872_p7 }
  0x91   : > { %4882 = shalt.err (!%p4879_p3)
}
  0x92   : > { %s4883_s14 = scalar_lea.vmem %s5637_s20, 2048  ;;  %s5331_s22 = smov [#allocation14]  }
  0x93   : > { %p4884_p13 = scmp.ne.s32.totalorder %s5637_s20, %s4883_s14  ;;  %s4888_s28 = sshll.u32 %s5331_s22, 4  ;;  %s4889_s28 = int_to_ptr.vmem [resolvable:$false] %s4888_s28 }
  0x94   : > { %s4890_s29 = scalar_lea.vmem %s4889_s28, 4096  ;;  %p4891_p8 = scmp.lt.s32.totalorder %s5637_s20, %s4889_s28 }
  0x95   : > { %p4886_p2 = pnand %p4884_p13, %p5575_p9  ;;  %p4892_p0 = scmp.lt.s32.totalorder %s4890_s29, %s4883_s14 }
  0x97   : > { %p4887_p4 = pneg %p4886_p2  ;;  %p4893_p11 = por %p4892_p0, %p4891_p8 }
  0x99   : > { %p4894_p12 = pnand %p4893_p11, %p4887_p4 }
  0x9b   : > { %4897 = shalt.err (!%p4894_p12)
}
  0x9c   : > { %s5332_s21 = smov 256   ;;  %s5333_s17 = smov 16  }
  0x9d   : > { %4546 = dma.hbm_to_vmem [thread:$0]  (!%p6571_p6), %s5635_s19, 2048, %s5637_s20, %s6539_s27, %s5332_s21, %s5332_s21, %s5333_s17  }
  0x9e   : > { %s3998_s1 = sshll.u32 %s5520_s24, 8  ;;  %s4136_s18 = sshll.u32 %s5324_s16, 12 }
  0x9f   : > { %s5668_s28 = scalar_lea.hbm %s6504_s9, %s4136_s18  ;;  %s586_s29 = scalar_lea.vmem [#allocation17], %s3998_s1 }
  0xa0   : > { %s593_s3 = sshll.u32 %s586_s29, 4  ;;  %s6538_s5 = scalar_lea.sflag [#allocation18], %s5529_s26  ;;  %s5670_s3 = int_to_ptr.vmem [resolvable:$true] %s593_s3 }
  0xa1   : > { %s4898_s7 = scalar_lea.hbm %s5668_s28, 4096  ;;  %s4903_s21 = scalar_lea.hbm %s6504_s9, 8192 }
  0xa2   : > { %p4899_p7 = scmp.ne.s32.totalorder %s5668_s28, %s4898_s7  ;;  %p4904_p1 = scmp.lt.u32.totalorder %s5668_s28, %s6504_s9 }
  0xa3   : > { %p4905_p3 = scmp.lt.u32.totalorder %s4903_s21, %s4898_s7  ;;  %p4907_p2 = scmp.lt.u32.totalorder %s4898_s7, %s5668_s28 }
  0xa4   : > { %p4901_p5 = pnand %p4899_p7, %p5575_p9 }
  0xa5   : > { %p4906_p13 = por %p4905_p3, %p4904_p1 }
  0xa6   : > { %p4902_p10 = pneg %p4901_p5 }
  0xa7   : > { %p4908_p4 = por %p4907_p2, %p4906_p13 }
  0xa9   : > { %p4909_p8 = pnand %p4908_p4, %p4902_p10 }
  0xab   : > { %4912 = shalt.err (!%p4909_p8)
}
  0xac   : > { %s4913_s1 = scalar_lea.vmem %s5670_s3, 4096  ;;  %s5334_s22 = smov [#allocation17]  }
  0xad   : > { %p4914_p0 = scmp.ne.s32.totalorder %s5670_s3, %s4913_s1  ;;  %s4918_s14 = sshll.u32 %s5334_s22, 4  ;;  %s4919_s14 = int_to_ptr.vmem [resolvable:$false] %s4918_s14 }
  0xae   : > { %s4920_s29 = scalar_lea.vmem %s4919_s14, 8192  ;;  %p4921_p7 = scmp.lt.s32.totalorder %s5670_s3, %s4919_s14 }
  0xaf   : > { %p4916_p11 = pnand %p4914_p0, %p5575_p9  ;;  %p4922_p5 = scmp.lt.s32.totalorder %s4920_s29, %s4913_s1 }
  0xb1   : > { %p4917_p12 = pneg %p4916_p11  ;;  %p4923_p1 = por %p4922_p5, %p4921_p7 }
  0xb3   : > { %p4924_p3 = pnand %p4923_p1, %p4917_p12 }
  0xb5   : > { %4927 = shalt.err (!%p4924_p3)
}
  0xb6   : > { %s6541_s7 = smov 64   ;;  %s6542_s19 = smov 4  }
  0xb7   : > { %4552 = dma.hbm_to_vmem [thread:$0]  (!%p6571_p6), %s5668_s28, 4096, %s5670_s3, %s6538_s5, %s6541_s7, %s6541_s7, %s6542_s19  }
  0xb8   : > { %s5703_s17 = scalar_lea.hbm %s6506_s11, %s5601_s0  ;;  %s623_s18 = scalar_lea.vmem [#allocation20], %s5520_s24 }
  0xb9   : > { %s630_s1 = sshll.u32 %s623_s18, 4  ;;  %s621_s22 = scalar_lea.sflag [#allocation21], %s5529_s26  ;;  %s631_s1 = int_to_ptr.vmem [resolvable:$true] %s630_s1 }
  0xba   : > { %s4928_s14 = scalar_lea.hbm %s5703_s17, 16  ;;  %s4933_s28 = scalar_lea.hbm %s6506_s11, 32 }
  0xbb   : > { %p4929_p10 = scmp.ne.s32.totalorder %s5703_s17, %s4928_s14  ;;  %p4934_p4 = scmp.lt.u32.totalorder %s5703_s17, %s6506_s11 }
  0xbc   : > { %p4935_p8 = scmp.lt.u32.totalorder %s4933_s28, %s4928_s14  ;;  %p4937_p11 = scmp.lt.u32.totalorder %s4928_s14, %s5703_s17 }
  0xbd   : > { %p4931_p13 = pnand %p4929_p10, %p5575_p9 }
  0xbe   : > { %p4936_p0 = por %p4935_p8, %p4934_p4 }
  0xbf   : > { %p4932_p2 = pneg %p4931_p13 }
  0xc0   : > { %p4938_p12 = por %p4937_p11, %p4936_p0 }
  0xc2   : > { %p4939_p7 = pnand %p4938_p12, %p4932_p2 }
  0xc4   : > { %4942 = shalt.err (!%p4939_p7)
}
  0xc5   : > { %s4943_s18 = scalar_lea.vmem %s631_s1, 16  ;;  %s5337_s5 = smov [#allocation20]  }
  0xc6   : > { %p4944_p5 = scmp.ne.s32.totalorder %s631_s1, %s4943_s18  ;;  %s4948_s27 = sshll.u32 %s5337_s5, 4  ;;  %s4949_s27 = int_to_ptr.vmem [resolvable:$false] %s4948_s27 }
  0xc7   : > { %s4950_s29 = scalar_lea.vmem %s4949_s27, 32  ;;  %p4951_p10 = scmp.lt.s32.totalorder %s631_s1, %s4949_s27 }
  0xc8   : > { %p4946_p1 = pnand %p4944_p5, %p5575_p9  ;;  %p4952_p13 = scmp.lt.s32.totalorder %s4950_s29, %s4943_s18 }
  0xca   : > { %p4947_p3 = pneg %p4946_p1  ;;  %p4953_p6 = por %p4952_p13, %p4951_p10 }
  0xcc   : > { %p4954_p4 = pnand %p4953_p6, %p4947_p3 }
  0xce   : > { %4957 = shalt.err (!%p4954_p4)
}
  0xcf   : > { %p6573_p8 = scmp.ne.s32.totalorder %s6564_s30, 0  ;;  %s5338_s14 = smov [#allocation5]  }
  0xd0   : > { %s430_s3 = sshll.u32 %s5338_s14, 4  ;;  %s5339_s28 = smov [#allocation25]   ;;  %s431_s3 = int_to_ptr.vmem [resolvable:$true] %s430_s3 }
  0xd1   : > { %4558 = dma.hbm_to_vmem [thread:$0]  (!%p6573_p8), %s5703_s17, 16, %s631_s1, %s621_s22  }
  0xd2   : > { %s452_s20 = sshll.u32 %s5339_s28, 4  ;;  %s4958_s27 = scalar_lea.hbm %s6497_s2, 16  ;;  %s453_s20 = int_to_ptr.vmem [resolvable:$true] %s452_s20 }
  0xd3   : > { %p4959_p6 = scmp.ne.s32.totalorder %s6497_s2, %s4958_s27  ;;  %p6574_p2 = scmp.ne.s32.totalorder %s6566_s13, 0 }
  0xd4   : > { %p4965_p12 = scmp.lt.u32.totalorder %s4958_s27, %s6497_s2 }
  0xd5   : > { %p4961_p0 = pnand %p4959_p6, %p6574_p2 }
  0xd7   : > { %p4962_p11 = pneg %p4961_p0 }
  0xd9   : > { %p4967_p7 = pnand %p4965_p12, %p4962_p11 }
  0xdb   : > { %4970 = shalt.err (!%p4967_p7)
}
  0xdc   : > { %s4971_s17 = scalar_lea.vmem %s431_s3, 16  ;;  %s4978_s1 = scalar_lea.vmem %s431_s3, 32 }
  0xdd   : > { %p4972_p5 = scmp.ne.s32.totalorder %s431_s3, %s4971_s17  ;;  %p4979_p10 = scmp.lt.s32.totalorder %s431_s3, %s431_s3 }
  0xde   : > { %p4980_p13 = scmp.lt.s32.totalorder %s4978_s1, %s4971_s17 }
  0xdf   : > { %p4974_p1 = pnand %p4972_p5, %p6574_p2 }
  0xe0   : > { %p4981_p4 = por %p4980_p13, %p4979_p10 }
  0xe1   : > { %p4975_p3 = pneg %p4974_p1 }
  0xe3   : > { %p4982_p8 = pnand %p4981_p4, %p4975_p3 }
  0xe5   : > { %4985 = shalt.err (!%p4982_p8)
}
  0xe6   : > { %p6575_p6 = scmp.ne.s32.totalorder %s6563_s25, 0  ;;  %s3987_s7 = sshll.u32 %s5520_s24, 5 }
  0xe7   : > { %s4986_s21 = scalar_lea.hbm %s6510_s15, 16 }
  0xe8   : > { %4524 = dma.hbm_to_vmem [thread:$0]  (!%p6575_p6), %s6497_s2, 16, %s431_s3, [#allocation6]  }
  0xe9   : > { %p4987_p0 = scmp.ne.s32.totalorder %s6510_s15, %s4986_s21  ;;  %p4993_p12 = scmp.lt.u32.totalorder %s4986_s21, %s6510_s15 }
  0xeb   : > { %p4989_p8 = pnand %p4987_p0, %p6574_p2 }
  0xed   : > { %p4990_p11 = pneg %p4989_p8 }
  0xef   : > { %p4995_p7 = pnand %p4993_p12, %p4990_p11 }
  0xf1   : > { %4998 = shalt.err (!%p4995_p7)
}
  0xf2   : > { %s4999_s3 = scalar_lea.vmem %s453_s20, 16  ;;  %s5006_s1 = scalar_lea.vmem %s453_s20, 32 }
  0xf3   : > { %p5000_p5 = scmp.ne.s32.totalorder %s453_s20, %s4999_s3  ;;  %p5007_p10 = scmp.lt.s32.totalorder %s453_s20, %s453_s20 }
  0xf4   : > { %p5008_p13 = scmp.lt.s32.totalorder %s5006_s1, %s4999_s3 }
  0xf5   : > { %p5002_p1 = pnand %p5000_p5, %p6574_p2 }
  0xf6   : > { %p5009_p4 = por %p5008_p13, %p5007_p10 }
  0xf7   : > { %p5003_p3 = pneg %p5002_p1 }
  0xf9   : > { %p5010_p9 = pnand %p5009_p4, %p5003_p3 }
  0xfb   : > { %5013 = shalt.err (!%p5010_p9)
}
  0xfc   : > { %4530 = dma.hbm_to_vmem [thread:$0]  (!%p6575_p6), %s6510_s15, 16, %s453_s20, [#allocation24]  }
  0xfd   : > { %s4133_s19 = sshll.u32 %s5324_s16, 9  ;;  %s491_s27 = scalar_lea.vmem [#allocation10], %s3987_s7 }
  0xfe   : > { %s5767_s13 = scalar_lea.hbm %s6499_s4, %s4133_s19  ;;  %s498_s18 = sshll.u32 %s491_s27, 4  ;;  %s5769_s18 = int_to_ptr.vmem [resolvable:$true] %s498_s18 }
  0xff   : > { %s5014_s25 = scalar_lea.hbm %s5767_s13, 512  ;;  %p6576_p2 = scmp.ne.s32.totalorder %s6569_s23, 0 }
 0x100   : > { %p5015_p9 = scmp.ne.s32.totalorder %s5767_s13, %s5014_s25  ;;  %s5019_s17 = scalar_lea.hbm %s6499_s4, 1024 }
 0x101   : > { %p5020_p6 = scmp.lt.u32.totalorder %s5767_s13, %s6499_s4  ;;  %p5021_p11 = scmp.lt.u32.totalorder %s5019_s17, %s5014_s25 }
 0x102   : > { %p5017_p0 = pnand %p5015_p9, %p6576_p2  ;;  %p5023_p7 = scmp.lt.u32.totalorder %s5014_s25, %s5767_s13 }
 0x103   : > { %p5022_p12 = por %p5021_p11, %p5020_p6 }
 0x104   : > { %p5018_p8 = pneg %p5017_p0 }
 0x105   : > { %p5024_p5 = por %p5023_p7, %p5022_p12 }
 0x107   : > { %p5025_p1 = pnand %p5024_p5, %p5018_p8 }
 0x109   : > { %5028 = shalt.err (!%p5025_p1)
}
 0x10a   : > { %s5029_s7 = scalar_lea.vmem %s5769_s18, 512  ;;  %s5340_s14 = smov [#allocation10]  }
 0x10b   : > { %p5030_p3 = scmp.ne.s32.totalorder %s5769_s18, %s5029_s7  ;;  %s5034_s28 = sshll.u32 %s5340_s14, 4  ;;  %s5035_s28 = int_to_ptr.vmem [resolvable:$false] %s5034_s28 }
 0x10c   : > { %s5036_s19 = scalar_lea.vmem %s5035_s28, 1024  ;;  %p5037_p4 = scmp.lt.s32.totalorder %s5769_s18, %s5035_s28 }
 0x10d   : > { %p5032_p10 = pnand %p5030_p3, %p6576_p2  ;;  %p5038_p9 = scmp.lt.s32.totalorder %s5036_s19, %s5029_s7 }
 0x10f   : > { %p5033_p13 = pneg %p5032_p10  ;;  %p5039_p0 = por %p5038_p9, %p5037_p4 }
 0x111   : > { %p5040_p6 = pnand %p5039_p0, %p5033_p13 }
 0x113   : > { %5043 = shalt.err (!%p5040_p6)
}
 0x114   : > { %p6577_p8 = scmp.ne.s32.totalorder %s6564_s30, 0  ;;  %s6578_s5 = smov 4  }
 0x115   : > { %s6579_s21 = smov 64   ;;  %s6580_s27 = scalar_lea.sflag [#allocation9], %s5529_s26 }
 0x116   : > { %4537 = dma.hbm_to_vmem [thread:$0]  (!%p6577_p8), %s5767_s13, 512, %s5769_s18, %s6580_s27, %s6579_s21, %s6579_s21, %s6578_s5  }
 0x117   : > { %s5801_s29 = scalar_lea.hbm %s6501_s6, %s5601_s0  ;;  %s528_s17 = scalar_lea.vmem [#allocation13], %s5520_s24 }
 0x118   : > { %s535_s3 = sshll.u32 %s528_s17, 4  ;;  %s3995_s1 = sshll.u32 %s5520_s24, 2  ;;  %s536_s3 = int_to_ptr.vmem [resolvable:$true] %s535_s3 }
 0x119   : > { %s5044_s7 = scalar_lea.hbm %s5801_s29, 16  ;;  %s5049_s18 = scalar_lea.hbm %s6501_s6, 32 }
 0x11a   : > { %p5045_p11 = scmp.ne.s32.totalorder %s5801_s29, %s5044_s7  ;;  %p5050_p5 = scmp.lt.u32.totalorder %s5801_s29, %s6501_s6 }
 0x11b   : > { %p5051_p1 = scmp.lt.u32.totalorder %s5049_s18, %s5044_s7  ;;  %p5053_p10 = scmp.lt.u32.totalorder %s5044_s7, %s5801_s29 }
 0x11c   : > { %p5047_p12 = pnand %p5045_p11, %p6576_p2 }
 0x11d   : > { %p5052_p3 = por %p5051_p1, %p5050_p5 }
 0x11e   : > { %p5048_p7 = pneg %p5047_p12 }
 0x11f   : > { %p5054_p13 = por %p5053_p10, %p5052_p3 }
 0x121   : > { %p5055_p4 = pnand %p5054_p13, %p5048_p7 }
 0x123   : > { %5058 = shalt.err (!%p5055_p4)
}
 0x124   : > { %s5059_s5 = scalar_lea.vmem %s536_s3, 16  ;;  %s5341_s21 = smov [#allocation13]  }
 0x125   : > { %p5060_p9 = scmp.ne.s32.totalorder %s536_s3, %s5059_s5  ;;  %s5064_s27 = sshll.u32 %s5341_s21, 4  ;;  %s5065_s27 = int_to_ptr.vmem [resolvable:$false] %s5064_s27 }
 0x126   : > { %s5066_s25 = scalar_lea.vmem %s5065_s27, 32  ;;  %p5067_p11 = scmp.lt.s32.totalorder %s536_s3, %s5065_s27 }
 0x127   : > { %p5062_p0 = pnand %p5060_p9, %p6576_p2  ;;  %p5068_p12 = scmp.lt.s32.totalorder %s5066_s25, %s5059_s5 }
 0x129   : > { %p5063_p6 = pneg %p5062_p0  ;;  %p5069_p8 = por %p5068_p12, %p5067_p11 }
 0x12b   : > { %p5070_p1 = pnand %p5069_p8, %p5063_p6 }
 0x12d   : > { %5073 = shalt.err (!%p5070_p1)
}
 0x12e   : > { %p6581_p5 = scmp.ne.s32.totalorder %s6564_s30, 0  ;;  %s6582_s20 = scalar_lea.sflag [#allocation12], %s5529_s26 }
 0x12f   : > { %s4135_s17 = sshll.u32 %s5324_s16, 6  ;;  %s567_s18 = scalar_lea.vmem [#allocation16], %s3995_s1 }
 0x130   : > { %4543 = dma.hbm_to_vmem [thread:$0]  (!%p6581_p5), %s5801_s29, 16, %s536_s3, %s6582_s20  }
 0x131   : > { %s5828_s13 = scalar_lea.hbm %s6503_s8, %s4135_s17  ;;  %s575_s28 = sshll.u32 %s567_s18, 4  ;;  %s576_s28 = int_to_ptr.vmem [resolvable:$true] %s575_s28 }
 0x132   : > { %s5074_s19 = scalar_lea.hbm %s5828_s13, 64  ;;  %s5079_s3 = scalar_lea.hbm %s6503_s8, 128 }
 0x133   : > { %p5075_p8 = scmp.ne.s32.totalorder %s5828_s13, %s5074_s19  ;;  %p5080_p10 = scmp.lt.u32.totalorder %s5828_s13, %s6503_s8 }
 0x134   : > { %p5081_p13 = scmp.lt.u32.totalorder %s5079_s3, %s5074_s19  ;;  %p5083_p9 = scmp.lt.u32.totalorder %s5074_s19, %s5828_s13 }
 0x135   : > { %p5077_p7 = pnand %p5075_p8, %p6576_p2 }
 0x136   : > { %p5082_p4 = por %p5081_p13, %p5080_p10 }
 0x137   : > { %p5078_p3 = pneg %p5077_p7 }
 0x138   : > { %p5084_p0 = por %p5083_p9, %p5082_p4 }
 0x13a   : > { %p5085_p6 = pnand %p5084_p0, %p5078_p3 }
 0x13c   : > { %5088 = shalt.err (!%p5085_p6)
}
 0x13d   : > { %s5089_s1 = scalar_lea.vmem %s576_s28, 64  ;;  %s5342_s27 = smov [#allocation16]  }
 0x13e   : > { %p5090_p11 = scmp.ne.s32.totalorder %s576_s28, %s5089_s1  ;;  %s5094_s25 = sshll.u32 %s5342_s27, 4  ;;  %s5095_s25 = int_to_ptr.vmem [resolvable:$false] %s5094_s25 }
 0x13f   : > { %s5096_s20 = scalar_lea.vmem %s5095_s25, 128  ;;  %p5097_p8 = scmp.lt.s32.totalorder %s576_s28, %s5095_s25 }
 0x140   : > { %p5092_p12 = pnand %p5090_p11, %p6576_p2  ;;  %p5098_p7 = scmp.lt.s32.totalorder %s5096_s20, %s5089_s1 }
 0x142   : > { %p5093_p1 = pneg %p5092_p12  ;;  %p5099_p5 = por %p5098_p7, %p5097_p8 }
 0x144   : > { %p5100_p10 = pnand %p5099_p5, %p5093_p1 }
 0x146   : > { %5103 = shalt.err (!%p5100_p10)
}
 0x147   : > { %p6583_p13 = scmp.ne.s32.totalorder %s6564_s30, 0  ;;  %s6584_s17 = scalar_lea.sflag [#allocation15], %s5529_s26 }
 0x148   : > { %s5855_s18 = scalar_lea.hbm %s6505_s10, %s5601_s0  ;;  %s606_s19 = scalar_lea.vmem [#allocation19], %s5520_s24 }
 0x149   : > { %4549 = dma.hbm_to_vmem [thread:$0]  (!%p6583_p13), %s5828_s13, 64, %s576_s28, %s6584_s17  }
 0x14a   : > { %s613_s29 = sshll.u32 %s606_s19, 4  ;;  %s5104_s16 = scalar_lea.hbm %s5855_s18, 16  ;;  %s614_s29 = int_to_ptr.vmem [resolvable:$true] %s613_s29 }
 0x14b   : > { %p5105_p5 = scmp.ne.s32.totalorder %s5855_s18, %s5104_s16  ;;  %s5109_s13 = scalar_lea.hbm %s6505_s10, 32 }
 0x14c   : > { %p5110_p9 = scmp.lt.u32.totalorder %s5855_s18, %s6505_s10  ;;  %p5111_p0 = scmp.lt.u32.totalorder %s5109_s13, %s5104_s16 }
 0x14d   : > { %p5107_p3 = pnand %p5105_p5, %p6576_p2  ;;  %p5113_p11 = scmp.lt.u32.totalorder %s5104_s16, %s5855_s18 }
 0x14e   : > { %p5112_p6 = por %p5111_p0, %p5110_p9 }
 0x14f   : > { %p5108_p4 = pneg %p5107_p3 }
 0x150   : > { %p5114_p12 = por %p5113_p11, %p5112_p6 }
 0x152   : > { %p5115_p1 = pnand %p5114_p12, %p5108_p4 }
 0x154   : > { %5118 = shalt.err (!%p5115_p1)
}
 0x155   : > { %s5119_s1 = scalar_lea.vmem %s614_s29, 16  ;;  %s5343_s27 = smov [#allocation19]  }
 0x156   : > { %p5120_p8 = scmp.ne.s32.totalorder %s614_s29, %s5119_s1  ;;  %s5124_s25 = sshll.u32 %s5343_s27, 4  ;;  %s5125_s25 = int_to_ptr.vmem [resolvable:$false] %s5124_s25 }
 0x157   : > { %s5126_s20 = scalar_lea.vmem %s5125_s25, 32  ;;  %p5127_p5 = scmp.lt.s32.totalorder %s614_s29, %s5125_s25 }
 0x158   : > { %p5122_p7 = pnand %p5120_p8, %p6576_p2  ;;  %p5128_p3 = scmp.lt.s32.totalorder %s5126_s20, %s5119_s1 }
 0x15a   : > { %p5123_p10 = pneg %p5122_p7  ;;  %p5129_p13 = por %p5128_p3, %p5127_p5 }
 0x15c   : > { %p5130_p0 = pnand %p5129_p13, %p5123_p10 }
 0x15e   : > { %5133 = shalt.err (!%p5130_p0)
}
 0x15f   : > { %p6585_p9 = scmp.ne.s32.totalorder %s6564_s30, 0  ;;  %s6586_s17 = scalar_lea.sflag [#allocation18], %s5529_s26 }
 0x160   : > { %s5881_s19 = scalar_lea.hbm %s6507_s12, %s5601_s0  ;;  %s640_s16 = scalar_lea.vmem [#allocation22], %s5520_s24 }
 0x161   : > { %4555 = dma.hbm_to_vmem [thread:$0]  (!%p6585_p9), %s5855_s18, 16, %s614_s29, %s6586_s17  }
 0x162   : > { %s647_s3 = sshll.u32 %s640_s16, 4  ;;  %s5134_s5 = scalar_lea.hbm %s5881_s19, 16  ;;  %s648_s3 = int_to_ptr.vmem [resolvable:$true] %s647_s3 }
 0x163   : > { %p5135_p13 = scmp.ne.s32.totalorder %s5881_s19, %s5134_s5  ;;  %s5139_s18 = scalar_lea.hbm %s6507_s12, 32 }
 0x164   : > { %p5140_p11 = scmp.lt.u32.totalorder %s5881_s19, %s6507_s12  ;;  %p5141_p12 = scmp.lt.u32.totalorder %s5139_s18, %s5134_s5 }
 0x165   : > { %p5137_p4 = pnand %p5135_p13, %p6576_p2  ;;  %p5143_p8 = scmp.lt.u32.totalorder %s5134_s5, %s5881_s19 }
 0x166   : > { %p5142_p1 = por %p5141_p12, %p5140_p11 }
 0x167   : > { %p5138_p6 = pneg %p5137_p4 }
 0x168   : > { %p5144_p7 = por %p5143_p8, %p5142_p1 }
 0x16a   : > { %p5145_p10 = pnand %p5144_p7, %p5138_p6 }
 0x16c   : > { %5148 = shalt.err (!%p5145_p10)
}
 0x16d   : > { %s5149_s24 = scalar_lea.vmem %s648_s3, 16  ;;  %s5344_s0 = smov [#allocation22]  }
 0x16e   : > { %p5150_p5 = scmp.ne.s32.totalorder %s648_s3, %s5149_s24  ;;  %s5154_s1 = sshll.u32 %s5344_s0, 4  ;;  %s5155_s1 = int_to_ptr.vmem [resolvable:$false] %s5154_s1 }
 0x16f   : > { %s5156_s27 = scalar_lea.vmem %s5155_s1, 32  ;;  %p5157_p13 = scmp.lt.s32.totalorder %s648_s3, %s5155_s1 }
 0x170   : > { %p5152_p3 = pnand %p5150_p5, %p6576_p2  ;;  %p5158_p4 = scmp.lt.s32.totalorder %s5156_s27, %s5149_s24 }
 0x172   : > { %p5153_p0 = pneg %p5152_p3  ;;  %p5159_p9 = por %p5158_p4, %p5157_p13 }
 0x174   : > { %p5160_p11 = pnand %p5159_p9, %p5153_p0 }
 0x176   : > { %5163 = shalt.err (!%p5160_p11)
}
 0x177   : > { %p6587_p12 = scmp.ne.s32.totalorder %s6564_s30, 0  ;;  %s6588_s25 = sld [smem:[#allocation57_spill]] }
 0x179   : > { %4561 = dma.hbm_to_vmem [thread:$0]  (!%p6587_p12), %s5881_s19, 16, %s648_s3, %s621_s22  }
 0x17d   : > { %p6589_p6 = scmp.ne.s32.totalorder %s6588_s25, 0 }
 0x17e   : > { %s6590_s23 = sld [smem:[#allocation53_spill]] (!%p6589_p6) }
 0x17f   : > { %656 = sbr.rel (%p6589_p6) target bundleno = 6974 (0x1b3e), region = 76 }
 0x184   : > { %p6591_p2 = scmp.eq.s32.totalorder (!%p6589_p6), %s6590_s23, 0 }
 0x186   : > { %5273 = dma.done.wait (%p6591_p2), [#allocation6], 16   ;;  %p6592_p1 = pmov %p6591_p2 }
 0x187   : > { %s6593_s20 = sld [smem:[#allocation51_spill]]  ;;  %s6594_s17 = sld [smem:[#allocation56_spill]] }
 0x188   : > { %5275 = vsyncadd (%p6592_p1), [#allocation6], 4294967280  ;;  %s5910_s7 = sand.u32 1, %s6590_s23  }
 0x189   : > { %s663_s22 = scalar_lea.sflag [#allocation9], %s5910_s7 }
 0x18d   : > { %s5913_s30 = sand.u32 1, %s6593_s20   ;;  %p6595_p9 = scmp.ne.s32.totalorder %s6594_s17, 0 }
 0x18e   : > { %s4006_s26 = sshll.u32 %s5913_s30, 6 }
 0x18f   : > { %s5917_s14 = scalar_lea.vmem [#allocation8], %s4006_s26 }
 0x190   : > { %5277 = dma.done.wait (%p6595_p9), %s663_s22, 1536  }
 0x191   : > { %5279 = vsyncadd (%p6595_p9), %s663_s22, 4294965760  ;;  %s4007_s19 = sshll.u32 %s5913_s30, 5  ;;  %s681_s3 = scalar_lea.sflag [#allocation12], %s5910_s7 }
 0x192   : > { %s5924_s16 = scalar_lea.vmem [#allocation10], %s4007_s19  ;;  %s683_s5 = scalar_lea.vmem [#allocation11], %s5913_s30 }
 0x193   : > { %5281 = dma.done.wait (%p6595_p9), %s681_s3, 32  }
 0x194   : > { %5283 = vsyncadd (%p6595_p9), %s681_s3, 4294967264  ;;  %s4008_s13 = sshll.u32 %s5913_s30, 7  ;;  %s691_s28 = scalar_lea.vmem [#allocation13], %s5913_s30 }
 0x195   : > { %s697_s18 = scalar_lea.sflag [#allocation15], %s5910_s7  ;;  %s5935_s29 = scalar_lea.vmem [#allocation14], %s4008_s13 }
 0x196   : > { %5285 = dma.done.wait (%p6595_p9), %s697_s18, 2112  }
 0x197   : > { %5287 = vsyncadd (%p6595_p9), %s697_s18, 4294965184  ;;  %s4009_s21 = sshll.u32 %s5913_s30, 2  ;;  %s4010_s24 = sshll.u32 %s5913_s30, 8 }
 0x198   : > { %s5943_s0 = scalar_lea.vmem [#allocation16], %s4009_s21  ;;  %s715_s1 = scalar_lea.sflag [#allocation18], %s5910_s7 }
 0x199   : > { %s5946_s27 = scalar_lea.vmem [#allocation17], %s4010_s24 }
 0x19a   : > { %5289 = dma.done.wait (%p6595_p9), %s715_s1, 4112  }
 0x19b   : > { %5291 = vsyncadd (%p6595_p9), %s715_s1, 4294963184  ;;  %s732_s20 = scalar_lea.sflag [#allocation21], %s5910_s7 }
 0x19c   : > { %5293 = dma.done.wait (%p6595_p9), %s732_s20, 32  }
 0x19d   : > { %5295 = vsyncadd (%p6595_p9), %s732_s20, 4294967264  ;;  %p6596_p8 = pmov %p6592_p1 }
 0x19e   : > { %p6597_p7 = pmov %p6592_p1 }
 0x19f   : > { %5297 = dma.done.wait (%p6596_p8), [#allocation24], 32  }
 0x1a0   : > { %5299 = vsyncadd (%p6597_p7), [#allocation24], 4294967264  ;;  %p6598_p10 = scmp.ne.s32.totalorder %s6590_s23, 0 }
 0x1a2   : > { %834 = sbr.rel (%p6598_p10) target bundleno = 695 (0x2b7), region = 132 }
 0x1a9   : > { %s5345_s19 = smov [#allocation27]   ;;  %s5346_s7 = smov [#allocation28]  }
 0x1aa   : > { %s842_s3 = sshll.u32 %s5345_s19, 4  ;;  %s854_s13 = sshll.u32 %s5346_s7, 4  ;;  %s843_s3 = int_to_ptr.vmem [resolvable:$true] %s842_s3  ;;  %s855_s13 = int_to_ptr.vmem [resolvable:$true] %s854_s13 }
 0x1ab   : > { %s6599_s21 = sld [smem:[#allocation58_spill]] }
 0x1b1   : > { %s5164_s24 = scalar_lea.hbm %s6599_s21, 256 }
 0x1b2   : > { %p5165_p5 = scmp.ne.s32.totalorder %s6599_s21, %s5164_s24  ;;  %p5168_p3 = scmp.lt.u32.totalorder %s5164_s24, %s6599_s21 }
 0x1b4   : > { %p5170_p0 = pnand %p5168_p3, %p5165_p5 }
 0x1b6   : > { %5173 = shalt.err (!%p5170_p0)  }
 0x1b7   : > { %s5174_s23 = scalar_lea.vmem %s843_s3, 256  ;;  %p5179_p4 = scmp.lt.s32.totalorder %s843_s3, %s843_s3 }
 0x1b8   : > { %p5175_p13 = scmp.ne.s32.totalorder %s843_s3, %s5174_s23  ;;  %p5180_p11 = scmp.lt.s32.totalorder %s5174_s23, %s5174_s23 }
 0x1ba   : > { %p5181_p12 = por %p5180_p11, %p5179_p4 }
 0x1bc   : > { %p5182_p6 = pnand %p5181_p12, %p5175_p13 }
 0x1be   : > { %5185 = shalt.err (!%p5182_p6)  }
 0x1bf   : > { %845 = dma.hbm_to_vmem [thread:$0]  %s6599_s21, 256, %s843_s3, [#allocation29] }
 0x1c0   : > { %s6600_s1 = sld [smem:[#allocation59_spill]] }
 0x1c6   : > { %s5186_s20 = scalar_lea.hbm %s6600_s1, 64 }
 0x1c7   : > { %p5187_p2 = scmp.ne.s32.totalorder %s6600_s1, %s5186_s20  ;;  %p5190_p1 = scmp.lt.u32.totalorder %s5186_s20, %s6600_s1 }
 0x1c9   : > { %p5192_p9 = pnand %p5190_p1, %p5187_p2 }
 0x1cb   : > { %5195 = shalt.err (!%p5192_p9)  }
 0x1cc   : > { %s5196_s23 = scalar_lea.vmem %s855_s13, 64  ;;  %p5201_p7 = scmp.lt.s32.totalorder %s855_s13, %s855_s13 }
 0x1cd   : > { %p5197_p8 = scmp.ne.s32.totalorder %s855_s13, %s5196_s23  ;;  %p5202_p10 = scmp.lt.s32.totalorder %s5196_s23, %s5196_s23 }
 0x1cf   : > { %p5203_p5 = por %p5202_p10, %p5201_p7 }
 0x1d1   : > { %p5204_p3 = pnand %p5203_p5, %p5197_p8 }
 0x1d3   : > { %5207 = shalt.err (!%p5204_p3)  }
 0x1d4   : > { %857 = dma.hbm_to_vmem [thread:$0]  %s6600_s1, 64, %s855_s13, [#allocation29 + $0x1] }
 0x1d5   : > { %5300 = dma.done.wait [#allocation29], 256 }
 0x1d6   : > { %5301 = vsyncadd [#allocation29], 4294967040 }
 0x1d7   : > { %5302 = dma.done.wait [#allocation29 + $0x1], 64 }
 0x1d8   : > { %5303 = vsyncadd [#allocation29 + $0x1], 4294967232  ;;  %v5347_v1 = vmov 0.0   ;;  %vm5348_vm0 = vmmov 0   ;;  %vm880_vm1 = vcmask 1043456   ;;  %v865_v3 = vld [vmem:[#allocation27] sm:$0xff] }
 0x1d9   : > { %4263 = vmatprep.subr.bf16.mxu0 %v5347_v1  ;;  %4265 = vmatprep.mubr.msk.bf16.mxu0 %vm5348_vm0, %v5347_v1  ;;  %v868_v2 = vld [vmem:[#allocation28] sm:$0xf]  ;;  %v866_v4 = vld [vmem:[#allocation27 + $0x8] sm:$0xff]  ;;  %vm876_vm2 = vcmask 64512   ;;  %v4014_v7 = vld [vmem:[#allocation5] ss:$0 sm:$0xff] }
 0x1da   : > { %v882_v5 = vsel %vm880_vm1, %v868_v2, 0  ;;  %v867_v6 = vpack.c.bf16 %v866_v4, %v865_v3  ;;  %vm925_vm3 = vcmask 523264  }
 0x1db   : > { %4264 = vmatpush3.bf16.msra.mxu0 %v882_v5 }
 0x1de   : > { %4266 = vmatmul.mubr.msk.bf16.vlgmr.msra.gmra.mrb[0].mxu0 %vm876_vm2, %v867_v6 }
 0x2b1   : > { %v918_v8 = vpop.f32.mrb[0].mxu0 }
 0x2b2   : > { %v919_v9 = vadd.f32 %v4014_v7, %v918_v8  ;;  %v4267_v10 = vpop.f32.mrb[1].mxu0 }
 0x2b3   : > { %v921_v11 = vpop.f32.mrb[2].mxu0 }
 0x2b4   : > { %926 = vst.msk [vmem:[#allocation2] sm:$0xff] %vm925_vm3, %v919_v9  ;;  %v922_v12 = vadd.f32 %v4014_v7, %v921_v11  ;;  %v4268_v13 = vpop.f32.mrb[3].mxu0 }
 0x2b6   : > { %927 = vst.msk [vmem:[#allocation2 + $0x8] sm:$0xff] %vm925_vm3, %v922_v12 }
 0x2b7 PF: > { %v4638_v14 = vld [vmem:[%s5917_s14 + $0x4] ss:$8 sps:$4 sm:$0xff]   ;;  %v4640_v15 = vld [vmem:[%s5917_s14] ss:$8 sps:$4 sm:$0xff]   ;;  %v5349_v16 = vmov 0   ;;  %vm979_vm4 = vcmask 523264  }
 0x2b8   : > { %1015 = vmatprep.mubr.bf16.mxu0 %v5349_v16  ;;  %983 = vmatprep.subr.bf16.mxu0 %v4638_v14  ;;  %v4641_v17 = vld [vmem:[%s5917_s14 + $0x14] ss:$8 sps:$4 sm:$0xff]   ;;  %v4643_v18 = vld [vmem:[%s5917_s14 + $0x10] ss:$8 sps:$4 sm:$0xff]   ;;  %v4644_v19 = vld [vmem:[%s5917_s14 + $0x24] ss:$8 sps:$4 sm:$0xff]  }
 0x2b9   : > { %984 = vmatpush1.bf16.msra.mxu0 %v4640_v15  ;;  %v4646_v20 = vld [vmem:[%s5917_s14 + $0x20] ss:$8 sps:$4 sm:$0xff]   ;;  %v4647_v21 = vld [vmem:[%s5917_s14 + $0x34] ss:$8 sps:$4 sm:$0xff]   ;;  %v4649_v22 = vld [vmem:[%s5917_s14 + $0x30] ss:$8 sps:$4 sm:$0xff]  }
 0x2ba   : > { %985 = vmatprep.subr.bf16.mxu0 %v4641_v17  ;;  %v5350_v26 = vmov 0.0   ;;  %vm5351_vm5 = vmmov 0   ;;  %s5352_s14 = smov 64   ;;  %vm1047_vm6 = vcmask 64512   ;;  %vm1170_vm7 = vcmask 1043456   ;;  %s5353_s25 = smov 56  }
 0x2bb   : > { %v928_v23 = vld [vmem:[#allocation2] sm:$0xff]  ;;  %4269 = vmatprep.subr.bf16.mxu1 %v5350_v26  ;;  %4271 = vmatprep.mubr.msk.bf16.mxu1 %vm5351_vm5, %v5350_v26  ;;  %s5354_s13 = smov 120   ;;  %s5355_s7 = smov 48   ;;  %vm1487_vm8 = vcmask 130112   ;;  %vm1714_vm9 = vcmask 195712   ;;  %vm1941_vm10 = vcmask 261312  }
 0x2bc   : > { %s5356_s18 = smov 112   ;;  %s5357_s17 = smov 40   ;;  %vm2168_vm11 = vcmask 326912   ;;  %vm2395_vm12 = vcmask 392512   ;;  %vm2622_vm13 = vcmask 458112   ;;  %vm2849_vm14 = vcmask 523712  }
 0x2bd   : > { %986 = vmatpush1.bf16.msra.mxu0 %v4643_v18  ;;  %v929_v24 = vld [vmem:[#allocation2 + $0x8] sm:$0xff]  ;;  %s5358_s20 = smov 104   ;;  %s5359_s26 = smov 32  }
 0x2be   : > { %987 = vmatprep.subr.bf16.mxu0 %v4644_v19  ;;  %v930_v25 = vpack.c.bf16 %v929_v24, %v928_v23  ;;  %s5360_s22 = smov 96   ;;  %s5361_s24 = smov 24  }
 0x2bf   : > { %s5362_s23 = smov 88   ;;  %s5363_s3 = smov 16  }
 0x2c0   : > { %s5364_s19 = smov 80  }
 0x2c1   : > { %988 = vmatpush1.bf16.msra.mxu0 %v4646_v20 }
 0x2c2   : > { %989 = vmatprep.subr.bf16.mxu0 %v4647_v21 }
 0x2c5   : > { %990 = vmatpush1.bf16.msra.mxu0 %v4649_v22 }
 0x2c6   : > { %4293 = vmatprep.subr.bf16.mxu0 %v5350_v26 }
 0x2c8   : > { %4024 = vmatmul.mubr.msk.bf16.vlgmr.msra.gmra.mrb[0].mxu0 %vm979_vm4, %v930_v25 }
 0x2c9   : > { %4295 = vmatprep.mubr.msk.bf16.mxu0 %vm5351_vm5, %v5350_v26 }
 0x39b   : > { %v1017_v27 = vpop.f32.mrb[0].mxu0 }
 0x39c   : > { %v6006_v28 = vpack.c.bf16 %v1017_v27, %v1017_v27  ;;  %v1019_v29 = vpop.f32.mrb[1].mxu0  ;;  %v1026_v35 = vmul.f32 0.35355338, %v1017_v27 }
 0x39d   : > { %v1021_v30 = vpop.f32.mrb[2].mxu0  ;;  %v6024_v40 = vpack.c.bf16 %v1019_v29, %v1019_v29 }
 0x39e   : > { %1045 = vrot.lane.b32.xlu0 %v6006_v28, %s5352_s14  ;;  %v6009_v31 = vpop.f32.mrb[3].mxu0  ;;  %v6011_v32 = vpack.c.bf16 %v1021_v30, %v1021_v30  ;;  %v6016_v37 = vpack.c.bf16 %v1026_v35, %v1026_v35  ;;  %v1027_v39 = vmul.f32 0.35355338, %v1021_v30 }
 0x39f   : > { %v1172_v42 = vsel %vm1170_vm7, %v6024_v40, 0  ;;  %v6051_v5 = vpack.c.bf16 %v6009_v31, %v6009_v31 }
 0x3a0   : > { %v6026_v41 = vpack.c.bf16 %v1027_v39, %v1027_v39 }
 0x3a1   : > { %v1218_v9 = vsel %vm1170_vm7, %v6051_v5, 0 }
 0x3a2   : > { %1095 = vrot.lane.b32.xlu0 %v6011_v32, %s5352_s14  ;;  %s5365_s14 = smov 8  }
 0x410   : > { %v1046_v33 = vpop.permute.xlu0 %1045 }
 0x411   : > { %v1052_v34 = vsel %vm1047_vm6, %v1046_v33, 0 }
 0x412   : > { %4270 = vmatpush3.bf16.xpose.msra.mxu1 %v1052_v34 }
 0x413   : > { %4275 = vmatprep.subr.bf16.mxu1 %v5350_v26 }
 0x414   : > { %v1096_v36 = vpop.permute.xlu0 %1095 }
 0x415   : > { %v1101_v38 = vsel %vm1047_vm6, %v1096_v36, 0 }
 0x419   : > { %4272 = vmatmul.mubr.msk.bf16.vlgmr.msra.gmra.mrb[0].mxu1 %vm1047_vm6, %v6016_v37 }
 0x41a   : > { %4276 = vmatpush3.bf16.xpose.msra.mxu1 %v1101_v38  ;;  %4277 = vmatprep.mubr.msk.bf16.mxu1 %vm5351_vm5, %v5350_v26 }
 0x41b   : > { %4281 = vmatprep.subr.bf16.mxu1 %v5350_v26 }
 0x421   : > { %4278 = vmatmul.mubr.msk.bf16.vlgmr.msra.gmra.mrb[4].mxu1 %vm1047_vm6, %v6026_v41 }
 0x422   : > { %4282 = vmatpush3.bf16.msra.mxu1 %v1172_v42  ;;  %4283 = vmatprep.mubr.msk.bf16.mxu1 %vm5351_vm5, %v5350_v26 }
 0x423   : > { %4287 = vmatprep.subr.bf16.mxu1 %v5350_v26 }
 0x4ec   : > { %v1088_v43 = vpop.f32.mrb[0].mxu1 }
 0x4ed   : > { %v4273_v44 = vpop.f32.mrb[1].mxu1  ;;  %v1143_v45 = vsel %vm1047_vm6, %v1088_v43, -inf }
 0x4ee   : > { %1144 = vmax.xlane.f32.xlu1 %v1143_v45  ;;  %v1091_v46 = vpop.f32.mrb[2].mxu1 }
 0x4ef   : > { %v4274_v47 = vpop.f32.mrb[3].mxu1 }
 0x4f4   : > { %v1137_v48 = vpop.f32.mrb[4].mxu1 }
 0x4f5   : > { %v4279_v49 = vpop.f32.mrb[5].mxu1  ;;  %v1146_v50 = vsel %vm1047_vm6, %v1137_v48, -inf }
 0x4f6   : > { %1147 = vmax.xlane.f32.xlu1 %v1146_v50  ;;  %v1140_v51 = vpop.f32.mrb[6].mxu1 }
 0x4f7   : > { %v4280_v52 = vpop.f32.mrb[7].mxu1 }
 0x507   : > { %1264 = vrot.lane.b32.xlu1 %v6006_v28, %s5353_s25 }
 0x50b   : > { %1314 = vrot.lane.b32.xlu1 %v6011_v32, %s5353_s25 }
 0x57b   : > { %v1145_v53 = vpop.xlane.xlu1 %1144 }
 0x57c   : > { %v1149_v54 = vsub.f32 %v1088_v43, %v1145_v53 }
 0x57e   : > { %v1151_v55 = vmul.f32 1.442695, %v1149_v54 }
 0x580   : > { %4710 = vpow2.f32 %v1151_v55 }
 0x583   : > { %v1148_v56 = vpop.xlane.xlu1 %1147 }
 0x584   : > { %v1150_v57 = vsub.f32 %v1137_v48, %v1148_v56 }
 0x586   : > { %v1153_v58 = vmul.f32 1.442695, %v1150_v57 }
 0x587   : > { %v1265_v59 = vpop.permute.xlu1 %1264 }
 0x588   : > { %4712 = vpow2.f32 %v1153_v58  ;;  %v1270_v60 = vsel %vm1047_vm6, %v1265_v59, 0 }
 0x589   : > { %4294 = vmatpush3.bf16.xpose.msra.mxu0 %v1270_v60 }
 0x58a   : > { %v4711_v61 = vpop.eup %4710  ;;  %4305 = vmatprep.subr.bf16.mxu0 %v5350_v26 }
 0x58b   : > { %v1155_v62 = vsel %vm1047_vm6, %v4711_v61, 0.0  ;;  %v1315_v2 = vpop.permute.xlu1 %1314 }
 0x58c   : > { %1156 = vadd.xlane.f32.xlu0 %v1155_v62  ;;  %v1320_v13 = vsel %vm1047_vm6, %v1315_v2, 0 }
 0x592   : > { %v4713_v63 = vpop.eup %4712 }
 0x593   : > { %v1158_v0 = vsel %vm1047_vm6, %v4713_v63, 0.0 }
 0x594   : > { %1159 = vadd.xlane.f32.xlu1 %v1158_v0 }
 0x5a5   : > { %1262 = vrot.lane.b32.xlu1 %v6016_v37, %s5354_s13 }
 0x5a9   : > { %1312 = vrot.lane.b32.xlu1 %v6026_v41, %s5354_s13 }
 0x619   : > { %v1157_v1 = vpop.xlane.xlu0 %1156 }
 0x61a   : > { %4714 = vrcp.f32 %v1157_v1 }
 0x621   : > { %v1160_v3 = vpop.xlane.xlu1 %1159 }
 0x622   : > { %4716 = vrcp.f32 %v1160_v3 }
 0x624   : > { %v4715_v4 = vpop.eup %4714 }
 0x625   : > { %v1163_v6 = vmul.f32 %v4715_v4, %v4711_v61  ;;  %v1263_v7 = vpop.permute.xlu1 %1262 }
 0x626   : > { %4296 = vmatmul.mubr.msk.bf16.vlgmr.msra.gmra.mrb[4].mxu0 %vm1047_vm6, %v1263_v7 }
 0x627   : > { %v1165_v8 = vpack.c.bf16 %v1163_v6, %v1163_v6  ;;  %4307 = vmatprep.mubr.msk.bf16.mxu0 %vm5351_vm5, %v5350_v26 }
 0x629   : > { %4284 = vmatmul.mubr.msk.bf16.vlgmr.msra.gmra.mrb[8].mxu1 %vm1047_vm6, %v1165_v8  ;;  %v1313_v14 = vpop.permute.xlu1 %1312 }
 0x62a   : > { %4288 = vmatpush3.bf16.msra.mxu1 %v1218_v9  ;;  %4289 = vmatprep.mubr.msk.bf16.mxu1 %vm5351_vm5, %v5350_v26 }
 0x62b   : > { %4299 = vmatprep.subr.bf16.mxu1 %v5350_v26 }
 0x62c   : > { %v4717_v10 = vpop.eup %4716 }
 0x62d   : > { %v1164_v11 = vmul.f32 %v4717_v10, %v4713_v63 }
 0x62f   : > { %v1166_v12 = vpack.c.bf16 %v1164_v11, %v1164_v11 }
 0x631   : > { %4290 = vmatmul.mubr.msk.bf16.vlgmr.msra.gmra.mrb[12].mxu1 %vm1047_vm6, %v1166_v12 }
 0x632   : > { %4301 = vmatprep.mubr.msk.bf16.mxu1 %vm5351_vm5, %v5350_v26 }
 0x633   : > { %4300 = vmatpush3.bf16.xpose.msra.mxu1 %v1320_v13 }
 0x634   : > { %4311 = vmatprep.subr.bf16.mxu1 %v5350_v26 }
 0x63a   : > { %4302 = vmatmul.mubr.msk.bf16.vlgmr.msra.gmra.mrb[16].mxu1 %vm1047_vm6, %v1313_v14 }
 0x63b   : > { %4313 = vmatprep.mubr.msk.bf16.mxu1 %vm5351_vm5, %v5350_v26 }
 0x6f9   : > { %v1306_v15 = vpop.f32.mrb[4].mxu0 }
 0x6fa   : > { %v4297_v17 = vpop.f32.mrb[5].mxu0  ;;  %v1362_v18 = vsel %vm1047_vm6, %v1306_v15, -inf }
 0x6fb   : > { %1363 = vmax.xlane.f32.xlu0 %v1362_v18  ;;  %v1309_v19 = vpop.f32.mrb[6].mxu0 }
 0x6fc   : > { %v1208_v20 = vpop.f32.mrb[8].mxu1  ;;  %v4298_v21 = vpop.f32.mrb[7].mxu0 }
 0x6fd   : > { %v4285_v22 = vpop.f32.mrb[9].mxu1 }
 0x6fe   : > { %v1211_v23 = vpop.f32.mrb[10].mxu1 }
 0x6ff   : > { %v4286_v24 = vpop.f32.mrb[11].mxu1 }
 0x704   : > { %v1254_v25 = vpop.f32.mrb[12].mxu1 }
 0x705   : > { %v1260_v27 = vpack.c.bf16 %v1254_v25, %v1208_v20  ;;  %v4291_v29 = vpop.f32.mrb[13].mxu1 }
 0x706   : > { %v1257_v30 = vpop.f32.mrb[14].mxu1 }
 0x707   : > { %1261 = vst.msk [vmem:[#allocation3] sm:$0xff] %vm1047_vm6, %v1260_v27  ;;  %v4292_v31 = vpop.f32.mrb[15].mxu1 }
 0x70d   : > { %v1356_v33 = vpop.f32.mrb[16].mxu1 }
 0x70e   : > { %v4303_v34 = vpop.f32.mrb[17].mxu1  ;;  %v1365_v35 = vsel %vm1047_vm6, %v1356_v33, -inf }
 0x70f   : > { %1366 = vmax.xlane.f32.xlu1 %v1365_v35  ;;  %v1359_v36 = vpop.f32.mrb[18].mxu1 }
 0x710   : > { %v4304_v38 = vpop.f32.mrb[19].mxu1 }
 0x720   : > { %1541 = vrot.lane.b32.xlu1 %v6011_v32, %s5355_s7 }
 0x788   : > { %v1364_v39 = vpop.xlane.xlu0 %1363 }
 0x789   : > { %v1368_v42 = vsub.f32 %v1306_v15, %v1364_v39 }
 0x78b   : > { %v1370_v43 = vmul.f32 1.442695, %v1368_v42 }
 0x78d   : > { %4718 = vpow2.f32 %v1370_v43 }
 0x797   : > { %v4719_v44 = vpop.eup %4718 }
 0x798   : > { %v1374_v45 = vsel %vm1047_vm6, %v4719_v44, 0.0 }
 0x799   : > { %1375 = vadd.xlane.f32.xlu0 %v1374_v45 }
 0x79c   : > { %v1367_v46 = vpop.xlane.xlu1 %1366 }
 0x79d   : > { %v1369_v47 = vsub.f32 %v1356_v33, %v1367_v46 }
 0x79f   : > { %v1372_v48 = vmul.f32 1.442695, %v1369_v47 }
 0x7a0   : > { %v1542_v1 = vpop.permute.xlu1 %1541 }
 0x7a1   : > { %4720 = vpow2.f32 %v1372_v48  ;;  %v1547_v3 = vsel %vm1047_vm6, %v1542_v1, 0 }
 0x7ab   : > { %v4721_v49 = vpop.eup %4720 }
 0x7ac   : > { %v1377_v50 = vsel %vm1047_vm6, %v4721_v49, 0.0 }
 0x7af   : > { %1386 = vrot.lane.b32.xlu0 %v6024_v40, %s5354_s13 }
 0x7b3   : > { %1434 = vrot.lane.b32.xlu0 %v6051_v5, %s5354_s13  ;;  %s5366_s13 = smov 72  }
 0x7d2   : > { %1378 = vadd.xlane.f32.xlu0 %v1377_v50 }
 0x7e8   : > { %1491 = vrot.lane.b32.xlu0 %v6006_v28, %s5355_s7 }
 0x7ec   : > { %1489 = vrot.lane.b32.xlu0 %v6016_v37, %s5356_s18 }
 0x7f0   : > { %1539 = vrot.lane.b32.xlu0 %v6026_v41, %s5356_s18 }
 0x826   : > { %v1376_v51 = vpop.xlane.xlu0 %1375 }
 0x827   : > { %4722 = vrcp.f32 %v1376_v51 }
 0x82a   : > { %v1387_v52 = vpop.permute.xlu0 %1386 }
 0x82b   : > { %v1392_v53 = vsel %vm1170_vm7, %v1387_v52, 0 }
 0x82c   : > { %4306 = vmatpush3.bf16.msra.mxu0 %v1392_v53 }
 0x82d   : > { %4317 = vmatprep.subr.bf16.mxu0 %v5350_v26 }
 0x82e   : > { %v1435_v54 = vpop.permute.xlu0 %1434 }
 0x82f   : > { %v1440_v55 = vsel %vm1170_vm7, %v1435_v54, 0 }
 0x830   : > { %4312 = vmatpush3.bf16.msra.mxu1 %v1440_v55 }
 0x831   : > { %v4723_v56 = vpop.eup %4722  ;;  %4323 = vmatprep.subr.bf16.mxu1 %v5350_v26 }
 0x832   : > { %v1382_v57 = vmul.f32 %v4723_v56, %v4719_v44 }
 0x834   : > { %v1384_v58 = vpack.c.bf16 %v1382_v57, %v1382_v57 }
 0x836   : > { %4308 = vmatmul.mubr.msk.bf16.vlgmr.msra.gmra.mrb[8].mxu0 %vm1047_vm6, %v1384_v58 }
 0x837   : > { %4319 = vmatprep.mubr.msk.bf16.mxu0 %vm5351_vm5, %v5350_v26 }
 0x85f   : > { %v1379_v59 = vpop.xlane.xlu0 %1378 }
 0x860   : > { %4724 = vrcp.f32 %v1379_v59 }
 0x863   : > { %v1492_v60 = vpop.permute.xlu0 %1491 }
 0x864   : > { %v1497_v61 = vsel %vm1047_vm6, %v1492_v60, 0 }
 0x865   : > { %4318 = vmatpush3.bf16.xpose.msra.mxu0 %v1497_v61 }
 0x866   : > { %4329 = vmatprep.subr.bf16.mxu0 %v5350_v26 }
 0x867   : > { %v1490_v0 = vpop.permute.xlu0 %1489 }
 0x86a   : > { %v4725_v62 = vpop.eup %4724 }
 0x86b   : > { %v1383_v63 = vmul.f32 %v4725_v62, %v4721_v49  ;;  %v1540_v4 = vpop.permute.xlu0 %1539 }
 0x86c   : > { %4320 = vmatmul.mubr.msk.bf16.vlgmr.msra.gmra.mrb[12].mxu0 %vm1047_vm6, %v1490_v0 }
 0x86d   : > { %v1385_v2 = vpack.c.bf16 %v1383_v63, %v1383_v63  ;;  %4331 = vmatprep.mubr.msk.bf16.mxu0 %vm5351_vm5, %v5350_v26 }
 0x86f   : > { %4314 = vmatmul.mubr.msk.bf16.vlgmr.msra.gmra.mrb[20].mxu1 %vm1047_vm6, %v1385_v2 }
 0x870   : > { %4324 = vmatpush3.bf16.xpose.msra.mxu1 %v1547_v3  ;;  %4325 = vmatprep.mubr.msk.bf16.mxu1 %vm5351_vm5, %v5350_v26 }
 0x871   : > { %4335 = vmatprep.subr.bf16.mxu1 %v5350_v26 }
 0x877   : > { %4326 = vmatmul.mubr.msk.bf16.vlgmr.msra.gmra.mrb[24].mxu1 %vm1047_vm6, %v1540_v4 }
 0x878   : > { %4337 = vmatprep.mubr.msk.bf16.mxu1 %vm5351_vm5, %v5350_v26 }
 0x909   : > { %v6107_v6 = vpop.f32.mrb[8].mxu0 }
 0x90a   : > { %v4309_v7 = vpop.f32.mrb[9].mxu0 }
 0x90b   : > { %v1431_v8 = vpop.f32.mrb[10].mxu0 }
 0x90c   : > { %v4310_v9 = vpop.f32.mrb[11].mxu0 }
 0x93f   : > { %v1533_v10 = vpop.f32.mrb[12].mxu0 }
 0x940   : > { %v4321_v11 = vpop.f32.mrb[13].mxu0  ;;  %v1589_v12 = vsel %vm1047_vm6, %v1533_v10, -inf }
 0x941   : > { %1590 = vmax.xlane.f32.xlu0 %v1589_v12  ;;  %v1536_v13 = vpop.f32.mrb[14].mxu0 }
 0x942   : > { %v6110_v14 = vpop.f32.mrb[20].mxu1  ;;  %v4322_v15 = vpop.f32.mrb[15].mxu0 }
 0x943   : > { %v1482_v17 = vpack.c.bf16 %v6110_v14, %v6107_v6  ;;  %v4315_v18 = vpop.f32.mrb[21].mxu1 }
 0x944   : > { %v1479_v19 = vpop.f32.mrb[22].mxu1 }
 0x945   : > { %v4316_v20 = vpop.f32.mrb[23].mxu1 }
 0x94a   : > { %v1583_v21 = vpop.f32.mrb[24].mxu1 }
 0x94b   : > { %v4327_v22 = vpop.f32.mrb[25].mxu1  ;;  %v1592_v23 = vsel %vm1047_vm6, %v1583_v21, -inf }
 0x94c   : > { %1593 = vmax.xlane.f32.xlu1 %v1592_v23  ;;  %v1586_v24 = vpop.f32.mrb[26].mxu1 }
 0x94d   : > { %v4328_v25 = vpop.f32.mrb[27].mxu1 }
 0x95d   : > { %1661 = vrot.lane.b32.xlu1 %v6051_v5, %s5356_s18 }
 0x961   : > { %1718 = vrot.lane.b32.xlu1 %v6006_v28, %s5357_s17 }
 0x965   : > { %1716 = vrot.lane.b32.xlu1 %v6016_v37, %s5358_s20 }
 0x9ce   : > { %v1591_v27 = vpop.xlane.xlu0 %1590 }
 0x9cf   : > { %v1595_v29 = vsub.f32 %v1533_v10, %v1591_v27 }
 0x9d1   : > { %v1597_v30 = vmul.f32 1.442695, %v1595_v29 }
 0x9d3   : > { %4726 = vpow2.f32 %v1597_v30 }
 0x9d9   : > { %v1594_v31 = vpop.xlane.xlu1 %1593 }
 0x9da   : > { %v1596_v38 = vsub.f32 %v1583_v21, %v1594_v31 }
 0x9dc   : > { %v1599_v39 = vmul.f32 1.442695, %v1596_v38 }
 0x9dd   : > { %v4727_v33 = vpop.eup %4726  ;;  %v1662_v34 = vpop.permute.xlu1 %1661 }
 0x9de   : > { %v1667_v35 = vsel %vm1170_vm7, %v1662_v34, 0  ;;  %v1601_v36 = vsel %vm1047_vm6, %v4727_v33, 0.0  ;;  %4728 = vpow2.f32 %v1599_v39 }
 0x9df   : > { %1602 = vadd.xlane.f32.xlu0 %v1601_v36  ;;  %4336 = vmatpush3.bf16.msra.mxu1 %v1667_v35 }
 0x9e0   : > { %4347 = vmatprep.subr.bf16.mxu1 %v5350_v26 }
 0x9e1   : > { %v1719_v49 = vpop.permute.xlu1 %1718 }
 0x9e2   : > { %v1724_v51 = vsel %vm1047_vm6, %v1719_v49, 0 }
 0x9e5   : > { %v1717_v52 = vpop.permute.xlu1 %1716 }
 0x9e8   : > { %v4729_v42 = vpop.eup %4728 }
 0x9e9   : > { %v1604_v43 = vsel %vm1047_vm6, %v4729_v42, 0.0 }
 0x9f5   : > { %1613 = vrot.lane.b32.xlu0 %v6024_v40, %s5356_s18 }
 0xa14   : > { %1605 = vadd.xlane.f32.xlu0 %v1604_v43 }
 0xa2a   : > { %1768 = vrot.lane.b32.xlu0 %v6011_v32, %s5357_s17 }
 0xa2e   : > { %1766 = vrot.lane.b32.xlu0 %v6026_v41, %s5358_s20 }
 0xa6c   : > { %v1603_v44 = vpop.xlane.xlu0 %1602 }
 0xa6d   : > { %4730 = vrcp.f32 %v1603_v44 }
 0xa70   : > { %v1614_v45 = vpop.permute.xlu0 %1613 }
 0xa71   : > { %v1619_v46 = vsel %vm1170_vm7, %v1614_v45, 0 }
 0xa72   : > { %4330 = vmatpush3.bf16.msra.mxu0 %v1619_v46 }
 0xa73   : > { %4341 = vmatprep.subr.bf16.mxu0 %v5350_v26 }
 0xa77   : > { %v4731_v47 = vpop.eup %4730 }
 0xa78   : > { %v1609_v48 = vmul.f32 %v4731_v47, %v4727_v33 }
 0xa7a   : > { %v1611_v50 = vpack.c.bf16 %v1609_v48, %v1609_v48 }
 0xa7c   : > { %4332 = vmatmul.mubr.msk.bf16.vlgmr.msra.gmra.mrb[16].mxu0 %vm1047_vm6, %v1611_v50 }
 0xa7d   : > { %4342 = vmatpush3.bf16.xpose.msra.mxu0 %v1724_v51  ;;  %4343 = vmatprep.mubr.msk.bf16.mxu0 %vm5351_vm5, %v5350_v26 }
 0xa7e   : > { %4353 = vmatprep.subr.bf16.mxu0 %v5350_v26 }
 0xa84   : > { %4344 = vmatmul.mubr.msk.bf16.vlgmr.msra.gmra.mrb[20].mxu0 %vm1047_vm6, %v1717_v52 }
 0xa85   : > { %4355 = vmatprep.mubr.msk.bf16.mxu0 %vm5351_vm5, %v5350_v26 }
 0xaa1   : > { %v1606_v53 = vpop.xlane.xlu0 %1605 }
 0xaa2   : > { %4732 = vrcp.f32 %v1606_v53 }
 0xaa5   : > { %v1769_v56 = vpop.permute.xlu0 %1768 }
 0xaa6   : > { %v1774_v58 = vsel %vm1047_vm6, %v1769_v56, 0 }
 0xaa9   : > { %v1767_v59 = vpop.permute.xlu0 %1766 }
 0xaac   : > { %v4733_v54 = vpop.eup %4732 }
 0xaad   : > { %v1610_v55 = vmul.f32 %v4733_v54, %v4729_v42 }
 0xaaf   : > { %v1612_v57 = vpack.c.bf16 %v1610_v55, %v1610_v55 }
 0xab1   : > { %4338 = vmatmul.mubr.msk.bf16.vlgmr.msra.gmra.mrb[28].mxu1 %vm1047_vm6, %v1612_v57 }
 0xab2   : > { %4348 = vmatpush3.bf16.xpose.msra.mxu1 %v1774_v58  ;;  %4349 = vmatprep.mubr.msk.bf16.mxu1 %vm5351_vm5, %v5350_v26 }
 0xab3   : > { %4359 = vmatprep.subr.bf16.mxu1 %v5350_v26 }
 0xab9   : > { %4350 = vmatmul.mubr.msk.bf16.vlgmr.msra.gmra.mrb[32].mxu1 %vm1047_vm6, %v1767_v59 }
 0xaba   : > { %4361 = vmatprep.mubr.msk.bf16.mxu1 %vm5351_vm5, %v5350_v26 }
 0xb4f   : > { %v6149_v60 = vpop.f32.mrb[16].mxu0 }
 0xb50   : > { %v4333_v61 = vpop.f32.mrb[17].mxu0 }
 0xb51   : > { %v1658_v62 = vpop.f32.mrb[18].mxu0 }
 0xb52   : > { %v4334_v63 = vpop.f32.mrb[19].mxu0 }
 0xb57   : > { %v1760_v0 = vpop.f32.mrb[20].mxu0 }
 0xb58   : > { %v4345_v1 = vpop.f32.mrb[21].mxu0  ;;  %v1816_v2 = vsel %vm1047_vm6, %v1760_v0, -inf }
 0xb59   : > { %1817 = vmax.xlane.f32.xlu1 %v1816_v2  ;;  %v1763_v3 = vpop.f32.mrb[22].mxu0 }
 0xb5a   : > { %v4346_v4 = vpop.f32.mrb[23].mxu0 }
 0xb6a   : > { %1888 = vrot.lane.b32.xlu1 %v6051_v5, %s5358_s20 }
 0xb84   : > { %v6154_v7 = vpop.f32.mrb[28].mxu1 }
 0xb85   : > { %v1709_v8 = vpack.c.bf16 %v6154_v7, %v6149_v60  ;;  %v4339_v9 = vpop.f32.mrb[29].mxu1 }
 0xb86   : > { %v1706_v10 = vpop.f32.mrb[30].mxu1 }
 0xb87   : > { %v4340_v11 = vpop.f32.mrb[31].mxu1 }
 0xb8c   : > { %v1810_v12 = vpop.f32.mrb[32].mxu1 }
 0xb8d   : > { %v4351_v13 = vpop.f32.mrb[33].mxu1  ;;  %v1819_v15 = vsel %vm1047_vm6, %v1810_v12, -inf }
 0xb8e   : > { %1820 = vmax.xlane.f32.xlu0 %v1819_v15  ;;  %v1813_v18 = vpop.f32.mrb[34].mxu1 }
 0xb8f   : > { %v4352_v19 = vpop.f32.mrb[35].mxu1 }
 0xbe6   : > { %v1818_v20 = vpop.xlane.xlu1 %1817 }
 0xbe7   : > { %v1822_v21 = vsub.f32 %v1760_v0, %v1818_v20 }
 0xbe9   : > { %v1824_v22 = vmul.f32 1.442695, %v1822_v21 }
 0xbea   : > { %v1889_v23 = vpop.permute.xlu1 %1888 }
 0xbeb   : > { %4734 = vpow2.f32 %v1824_v22  ;;  %v1894_v24 = vsel %vm1170_vm7, %v1889_v23, 0 }
 0xbec   : > { %4360 = vmatpush3.bf16.msra.mxu1 %v1894_v24 }
 0xbed   : > { %4371 = vmatprep.subr.bf16.mxu1 %v5350_v26 }
 0xbf5   : > { %v4735_v25 = vpop.eup %4734 }
 0xbf6   : > { %v1828_v27 = vsel %vm1047_vm6, %v4735_v25, 0.0 }
 0xbf7   : > { %1829 = vadd.xlane.f32.xlu0 %v1828_v27 }
 0xc0d   : > { %1840 = vrot.lane.b32.xlu0 %v6024_v40, %s5358_s20 }
 0xc11   : > { %1995 = vrot.lane.b32.xlu0 %v6011_v32, %s5359_s26 }
 0xc15   : > { %1993 = vrot.lane.b32.xlu0 %v6026_v41, %s5360_s22 }
 0xc1b   : > { %v1821_v29 = vpop.xlane.xlu0 %1820 }
 0xc1c   : > { %v1823_v30 = vsub.f32 %v1810_v12, %v1821_v29 }
 0xc1e   : > { %v1826_v31 = vmul.f32 1.442695, %v1823_v30 }
 0xc20   : > { %4736 = vpow2.f32 %v1826_v31 }
 0xc2a   : > { %v4737_v33 = vpop.eup %4736 }
 0xc2b   : > { %v1831_v34 = vsel %vm1047_vm6, %v4737_v33, 0.0 }
 0xc2c   : > { %1832 = vadd.xlane.f32.xlu1 %v1831_v34 }
 0xc3d   : > { %1945 = vrot.lane.b32.xlu1 %v6006_v28, %s5359_s26 }
 0xc41   : > { %1943 = vrot.lane.b32.xlu1 %v6016_v37, %s5360_s22 }
 0xc84   : > { %v1830_v35 = vpop.xlane.xlu0 %1829 }
 0xc85   : > { %4738 = vrcp.f32 %v1830_v35 }
 0xc88   : > { %v1841_v36 = vpop.permute.xlu0 %1840 }
 0xc89   : > { %v1846_v38 = vsel %vm1170_vm7, %v1841_v36, 0 }
 0xc8a   : > { %4354 = vmatpush3.bf16.msra.mxu0 %v1846_v38 }
 0xc8b   : > { %4365 = vmatprep.subr.bf16.mxu0 %v5350_v26 }
 0xc8c   : > { %v1996_v50 = vpop.permute.xlu0 %1995 }
 0xc8d   : > { %v2001_v52 = vsel %vm1047_vm6, %v1996_v50, 0 }
 0xc8f   : > { %v4739_v39 = vpop.eup %4738 }
 0xc90   : > { %v1836_v42 = vmul.f32 %v4739_v39, %v4735_v25  ;;  %v1994_v53 = vpop.permute.xlu0 %1993 }
 0xc92   : > { %v1838_v43 = vpack.c.bf16 %v1836_v42, %v1836_v42 }
 0xc94   : > { %4356 = vmatmul.mubr.msk.bf16.vlgmr.msra.gmra.mrb[24].mxu0 %vm1047_vm6, %v1838_v43 }
 0xc95   : > { %4367 = vmatprep.mubr.msk.bf16.mxu0 %vm5351_vm5, %v5350_v26 }
 0xcb9   : > { %v1833_v44 = vpop.xlane.xlu1 %1832 }
 0xcba   : > { %4740 = vrcp.f32 %v1833_v44 }
 0xcbd   : > { %v1946_v45 = vpop.permute.xlu1 %1945 }
 0xcbe   : > { %v1951_v46 = vsel %vm1047_vm6, %v1946_v45, 0 }
 0xcbf   : > { %4366 = vmatpush3.bf16.xpose.msra.mxu0 %v1951_v46 }
 0xcc0   : > { %4377 = vmatprep.subr.bf16.mxu0 %v5350_v26 }
 0xcc1   : > { %v1944_v49 = vpop.permute.xlu1 %1943 }
 0xcc4   : > { %v4741_v47 = vpop.eup %4740 }
 0xcc5   : > { %v1837_v48 = vmul.f32 %v4741_v47, %v4737_v33 }
 0xcc6   : > { %4368 = vmatmul.mubr.msk.bf16.vlgmr.msra.gmra.mrb[28].mxu0 %vm1047_vm6, %v1944_v49 }
 0xcc7   : > { %v1839_v51 = vpack.c.bf16 %v1837_v48, %v1837_v48  ;;  %4379 = vmatprep.mubr.msk.bf16.mxu0 %vm5351_vm5, %v5350_v26 }
 0xcc9   : > { %4362 = vmatmul.mubr.msk.bf16.vlgmr.msra.gmra.mrb[36].mxu1 %vm1047_vm6, %v1839_v51 }
 0xcca   : > { %4372 = vmatpush3.bf16.xpose.msra.mxu1 %v2001_v52  ;;  %4373 = vmatprep.mubr.msk.bf16.mxu1 %vm5351_vm5, %v5350_v26 }
 0xccb   : > { %4383 = vmatprep.subr.bf16.mxu1 %v5350_v26 }
 0xcd1   : > { %4374 = vmatmul.mubr.msk.bf16.vlgmr.msra.gmra.mrb[40].mxu1 %vm1047_vm6, %v1994_v53 }
 0xcd2   : > { %4385 = vmatprep.mubr.msk.bf16.mxu1 %vm5351_vm5, %v5350_v26 }
 0xd67   : > { %v6191_v54 = vpop.f32.mrb[24].mxu0 }
 0xd68   : > { %v4357_v55 = vpop.f32.mrb[25].mxu0 }
 0xd69   : > { %v1885_v56 = vpop.f32.mrb[26].mxu0 }
 0xd6a   : > { %v4358_v57 = vpop.f32.mrb[27].mxu0 }
 0xd99   : > { %v1987_v58 = vpop.f32.mrb[28].mxu0 }
 0xd9a   : > { %v4369_v59 = vpop.f32.mrb[29].mxu0  ;;  %v2043_v61 = vsel %vm1047_vm6, %v1987_v58, -inf }
 0xd9b   : > { %2044 = vmax.xlane.f32.xlu1 %v2043_v61  ;;  %v1990_v62 = vpop.f32.mrb[30].mxu0 }
 0xd9c   : > { %v6194_v63 = vpop.f32.mrb[36].mxu1  ;;  %v4370_v0 = vpop.f32.mrb[31].mxu0 }
 0xd9d   : > { %v1936_v1 = vpack.c.bf16 %v6194_v63, %v6191_v54  ;;  %v4363_v2 = vpop.f32.mrb[37].mxu1 }
 0xd9e   : > { %v1933_v3 = vpop.f32.mrb[38].mxu1 }
 0xd9f   : > { %v4364_v4 = vpop.f32.mrb[39].mxu1 }
 0xda4   : > { %v2037_v9 = vpop.f32.mrb[40].mxu1 }
 0xda5   : > { %v4375_v10 = vpop.f32.mrb[41].mxu1  ;;  %v2046_v11 = vsel %vm1047_vm6, %v2037_v9, -inf }
 0xda6   : > { %2047 = vmax.xlane.f32.xlu0 %v2046_v11  ;;  %v2040_v12 = vpop.f32.mrb[42].mxu1 }
 0xda7   : > { %v4376_v13 = vpop.f32.mrb[43].mxu1 }
 0xdac   : > { %2115 = vrot.lane.b32.xlu1 %v6051_v5, %s5360_s22 }
 0xe28   : > { %v2045_v15 = vpop.xlane.xlu1 %2044 }
 0xe29   : > { %v2049_v18 = vsub.f32 %v1987_v58, %v2045_v15 }
 0xe2b   : > { %v2051_v19 = vmul.f32 1.442695, %v2049_v18 }
 0xe2c   : > { %v2116_v20 = vpop.permute.xlu1 %2115 }
 0xe2d   : > { %4742 = vpow2.f32 %v2051_v19  ;;  %v2121_v21 = vsel %vm1170_vm7, %v2116_v20, 0 }
 0xe2e   : > { %4384 = vmatpush3.bf16.msra.mxu1 %v2121_v21 }
 0xe2f   : > { %4395 = vmatprep.subr.bf16.mxu1 %v5350_v26 }
 0xe33   : > { %v2048_v22 = vpop.xlane.xlu0 %2047 }
 0xe34   : > { %v2050_v23 = vsub.f32 %v2037_v9, %v2048_v22 }
 0xe36   : > { %v2053_v24 = vmul.f32 1.442695, %v2050_v23 }
 0xe37   : > { %v4743_v25 = vpop.eup %4742 }
 0xe38   : > { %4744 = vpow2.f32 %v2053_v24  ;;  %v2055_v27 = vsel %vm1047_vm6, %v4743_v25, 0.0 }
 0xe39   : > { %2056 = vadd.xlane.f32.xlu0 %v2055_v27 }
 0xe42   : > { %v4745_v29 = vpop.eup %4744 }
 0xe43   : > { %v2058_v30 = vsel %vm1047_vm6, %v4745_v29, 0.0 }
 0xe44   : > { %2059 = vadd.xlane.f32.xlu1 %v2058_v30 }
 0xe4f   : > { %2067 = vrot.lane.b32.xlu0 %v6024_v40, %s5360_s22 }
 0xe53   : > { %2222 = vrot.lane.b32.xlu0 %v6011_v32, %s5361_s24 }
 0xe55   : > { %2172 = vrot.lane.b32.xlu1 %v6006_v28, %s5361_s24 }
 0xe57   : > { %2220 = vrot.lane.b32.xlu0 %v6026_v41, %s5362_s23 }
 0xe59   : > { %2170 = vrot.lane.b32.xlu1 %v6016_v37, %s5362_s23 }
 0xec6   : > { %v2057_v31 = vpop.xlane.xlu0 %2056 }
 0xec7   : > { %4746 = vrcp.f32 %v2057_v31 }
 0xeca   : > { %v2068_v33 = vpop.permute.xlu0 %2067 }
 0xecb   : > { %v2073_v34 = vsel %vm1170_vm7, %v2068_v33, 0 }
 0xecc   : > { %4378 = vmatpush3.bf16.msra.mxu0 %v2073_v34 }
 0xecd   : > { %4389 = vmatprep.subr.bf16.mxu0 %v5350_v26 }
 0xece   : > { %v2223_v47 = vpop.permute.xlu0 %2222 }
 0xecf   : > { %v2228_v49 = vsel %vm1047_vm6, %v2223_v47, 0 }
 0xed1   : > { %v4747_v35 = vpop.eup %4746  ;;  %v2060_v36 = vpop.xlane.xlu1 %2059 }
 0xed2   : > { %v2063_v38 = vmul.f32 %v4747_v35, %v4743_v25  ;;  %4748 = vrcp.f32 %v2060_v36  ;;  %v2221_v50 = vpop.permute.xlu0 %2220 }
 0xed4   : > { %v2065_v39 = vpack.c.bf16 %v2063_v38, %v2063_v38 }
 0xed5   : > { %v2173_v42 = vpop.permute.xlu1 %2172 }
 0xed6   : > { %v2178_v43 = vsel %vm1047_vm6, %v2173_v42, 0  ;;  %4380 = vmatmul.mubr.msk.bf16.vlgmr.msra.gmra.mrb[32].mxu0 %vm1047_vm6, %v2065_v39 }
 0xed7   : > { %4390 = vmatpush3.bf16.xpose.msra.mxu0 %v2178_v43  ;;  %4391 = vmatprep.mubr.msk.bf16.mxu0 %vm5351_vm5, %v5350_v26 }
 0xed8   : > { %4401 = vmatprep.subr.bf16.mxu0 %v5350_v26 }
 0xed9   : > { %v2171_v46 = vpop.permute.xlu1 %2170 }
 0xedc   : > { %v4749_v44 = vpop.eup %4748 }
 0xedd   : > { %v2064_v45 = vmul.f32 %v4749_v44, %v4745_v29 }
 0xede   : > { %4392 = vmatmul.mubr.msk.bf16.vlgmr.msra.gmra.mrb[36].mxu0 %vm1047_vm6, %v2171_v46 }
 0xedf   : > { %v2066_v48 = vpack.c.bf16 %v2064_v45, %v2064_v45  ;;  %4403 = vmatprep.mubr.msk.bf16.mxu0 %vm5351_vm5, %v5350_v26 }
 0xee1   : > { %4386 = vmatmul.mubr.msk.bf16.vlgmr.msra.gmra.mrb[44].mxu1 %vm1047_vm6, %v2066_v48 }
 0xee2   : > { %4396 = vmatpush3.bf16.xpose.msra.mxu1 %v2228_v49  ;;  %4397 = vmatprep.mubr.msk.bf16.mxu1 %vm5351_vm5, %v5350_v26 }
 0xee3   : > { %4407 = vmatprep.subr.bf16.mxu1 %v5350_v26 }
 0xee9   : > { %4398 = vmatmul.mubr.msk.bf16.vlgmr.msra.gmra.mrb[48].mxu1 %vm1047_vm6, %v2221_v50 }
 0xeea   : > { %4409 = vmatprep.mubr.msk.bf16.mxu1 %vm5351_vm5, %v5350_v26 }
 0xfa9   : > { %v6233_v51 = vpop.f32.mrb[32].mxu0 }
 0xfaa   : > { %v4381_v52 = vpop.f32.mrb[33].mxu0 }
 0xfab   : > { %v2112_v53 = vpop.f32.mrb[34].mxu0 }
 0xfac   : > { %v4382_v55 = vpop.f32.mrb[35].mxu0 }
 0xfb1   : > { %v2214_v56 = vpop.f32.mrb[36].mxu0 }
 0xfb2   : > { %v4393_v57 = vpop.f32.mrb[37].mxu0  ;;  %v2270_v58 = vsel %vm1047_vm6, %v2214_v56, -inf }
 0xfb3   : > { %2271 = vmax.xlane.f32.xlu1 %v2270_v58  ;;  %v2217_v59 = vpop.f32.mrb[38].mxu0 }
 0xfb4   : > { %v6236_v61 = vpop.f32.mrb[44].mxu1  ;;  %v4394_v62 = vpop.f32.mrb[39].mxu0 }
 0xfb5   : > { %v2163_v0 = vpack.c.bf16 %v6236_v61, %v6233_v51  ;;  %v4387_v2 = vpop.f32.mrb[45].mxu1 }
 0xfb6   : > { %v2160_v3 = vpop.f32.mrb[46].mxu1 }
 0xfb7   : > { %v4388_v4 = vpop.f32.mrb[47].mxu1 }
 0xfbc   : > { %v2264_v9 = vpop.f32.mrb[48].mxu1 }
 0xfbd   : > { %v4399_v10 = vpop.f32.mrb[49].mxu1  ;;  %v2273_v11 = vsel %vm1047_vm6, %v2264_v9, -inf }
 0xfbe   : > { %2274 = vmax.xlane.f32.xlu0 %v2273_v11  ;;  %v2267_v12 = vpop.f32.mrb[50].mxu1 }
 0xfbf   : > { %v4400_v13 = vpop.f32.mrb[51].mxu1 }
 0xfc4   : > { %2342 = vrot.lane.b32.xlu1 %v6051_v5, %s5362_s23 }
0x1040   : > { %v2272_v15 = vpop.xlane.xlu1 %2271 }
0x1041   : > { %v2276_v18 = vsub.f32 %v2214_v56, %v2272_v15 }
0x1043   : > { %v2278_v19 = vmul.f32 1.442695, %v2276_v18 }
0x1044   : > { %v2343_v20 = vpop.permute.xlu1 %2342 }
0x1045   : > { %4750 = vpow2.f32 %v2278_v19  ;;  %v2348_v21 = vsel %vm1170_vm7, %v2343_v20, 0 }
0x1046   : > { %4408 = vmatpush3.bf16.msra.mxu1 %v2348_v21 }
0x1047   : > { %4419 = vmatprep.subr.bf16.mxu1 %v5350_v26 }
0x104b   : > { %v2275_v22 = vpop.xlane.xlu0 %2274 }
0x104c   : > { %v2277_v23 = vsub.f32 %v2264_v9, %v2275_v22 }
0x104e   : > { %v2280_v24 = vmul.f32 1.442695, %v2277_v23 }
0x104f   : > { %v4751_v25 = vpop.eup %4750 }
0x1050   : > { %4752 = vpow2.f32 %v2280_v24  ;;  %v2282_v27 = vsel %vm1047_vm6, %v4751_v25, 0.0 }
0x1051   : > { %2283 = vadd.xlane.f32.xlu0 %v2282_v27 }
0x105a   : > { %v4753_v29 = vpop.eup %4752 }
0x105b   : > { %v2285_v30 = vsel %vm1047_vm6, %v4753_v29, 0.0 }
0x105c   : > { %2286 = vadd.xlane.f32.xlu1 %v2285_v30 }
0x1067   : > { %2294 = vrot.lane.b32.xlu0 %v6024_v40, %s5362_s23 }
0x106b   : > { %2449 = vrot.lane.b32.xlu0 %v6011_v32, %s5363_s3 }
0x106d   : > { %2399 = vrot.lane.b32.xlu1 %v6006_v28, %s5363_s3 }
0x106f   : > { %2447 = vrot.lane.b32.xlu0 %v6026_v41, %s5364_s19 }
0x1071   : > { %2397 = vrot.lane.b32.xlu1 %v6016_v37, %s5364_s19 }
0x10de   : > { %v2284_v31 = vpop.xlane.xlu0 %2283 }
0x10df   : > { %4754 = vrcp.f32 %v2284_v31 }
0x10e2   : > { %v2295_v33 = vpop.permute.xlu0 %2294 }
0x10e3   : > { %v2300_v34 = vsel %vm1170_vm7, %v2295_v33, 0 }
0x10e4   : > { %4402 = vmatpush3.bf16.msra.mxu0 %v2300_v34 }
0x10e5   : > { %4413 = vmatprep.subr.bf16.mxu0 %v5350_v26 }
0x10e6   : > { %v2450_v47 = vpop.permute.xlu0 %2449 }
0x10e7   : > { %v2455_v49 = vsel %vm1047_vm6, %v2450_v47, 0 }
0x10e9   : > { %v4755_v35 = vpop.eup %4754  ;;  %v2287_v36 = vpop.xlane.xlu1 %2286 }
0x10ea   : > { %v2290_v38 = vmul.f32 %v4755_v35, %v4751_v25  ;;  %4756 = vrcp.f32 %v2287_v36  ;;  %v2448_v50 = vpop.permute.xlu0 %2447 }
0x10ec   : > { %v2292_v39 = vpack.c.bf16 %v2290_v38, %v2290_v38 }
0x10ed   : > { %v2400_v42 = vpop.permute.xlu1 %2399 }
0x10ee   : > { %v2405_v43 = vsel %vm1047_vm6, %v2400_v42, 0  ;;  %4404 = vmatmul.mubr.msk.bf16.vlgmr.msra.gmra.mrb[40].mxu0 %vm1047_vm6, %v2292_v39 }
0x10ef   : > { %4414 = vmatpush3.bf16.xpose.msra.mxu0 %v2405_v43  ;;  %4415 = vmatprep.mubr.msk.bf16.mxu0 %vm5351_vm5, %v5350_v26 }
0x10f0   : > { %4425 = vmatprep.subr.bf16.mxu0 %v5350_v26 }
0x10f1   : > { %v2398_v46 = vpop.permute.xlu1 %2397 }
0x10f4   : > { %v4757_v44 = vpop.eup %4756 }
0x10f5   : > { %v2291_v45 = vmul.f32 %v4757_v44, %v4753_v29 }
0x10f6   : > { %4416 = vmatmul.mubr.msk.bf16.vlgmr.msra.gmra.mrb[44].mxu0 %vm1047_vm6, %v2398_v46 }
0x10f7   : > { %v2293_v48 = vpack.c.bf16 %v2291_v45, %v2291_v45  ;;  %4427 = vmatprep.mubr.msk.bf16.mxu0 %vm5351_vm5, %v5350_v26 }
0x10f9   : > { %4410 = vmatmul.mubr.msk.bf16.vlgmr.msra.gmra.mrb[52].mxu1 %vm1047_vm6, %v2293_v48 }
0x10fa   : > { %4420 = vmatpush3.bf16.xpose.msra.mxu1 %v2455_v49  ;;  %4421 = vmatprep.mubr.msk.bf16.mxu1 %vm5351_vm5, %v5350_v26 }
0x10fb   : > { %4431 = vmatprep.subr.bf16.mxu1 %v5350_v26 }
0x1101   : > { %4422 = vmatmul.mubr.msk.bf16.vlgmr.msra.gmra.mrb[56].mxu1 %vm1047_vm6, %v2448_v50 }
0x1102   : > { %4433 = vmatprep.mubr.msk.bf16.mxu1 %vm5351_vm5, %v5350_v26 }
0x11c1   : > { %v6275_v52 = vpop.f32.mrb[40].mxu0 }
0x11c2   : > { %v4405_v53 = vpop.f32.mrb[41].mxu0 }
0x11c3   : > { %v2339_v55 = vpop.f32.mrb[42].mxu0 }
0x11c4   : > { %v4406_v56 = vpop.f32.mrb[43].mxu0 }
0x11c9   : > { %v2441_v57 = vpop.f32.mrb[44].mxu0 }
0x11ca   : > { %v4417_v58 = vpop.f32.mrb[45].mxu0  ;;  %v2497_v59 = vsel %vm1047_vm6, %v2441_v57, -inf }
0x11cb   : > { %2498 = vmax.xlane.f32.xlu1 %v2497_v59  ;;  %v2444_v62 = vpop.f32.mrb[46].mxu0 }
0x11cc   : > { %v6278_v2 = vpop.f32.mrb[52].mxu1  ;;  %v4418_v3 = vpop.f32.mrb[47].mxu0 }
0x11cd   : > { %v2390_v4 = vpack.c.bf16 %v6278_v2, %v6275_v52  ;;  %v4411_v9 = vpop.f32.mrb[53].mxu1 }
0x11ce   : > { %v2387_v10 = vpop.f32.mrb[54].mxu1 }
0x11cf   : > { %v4412_v11 = vpop.f32.mrb[55].mxu1 }
0x11d4   : > { %v2491_v12 = vpop.f32.mrb[56].mxu1 }
0x11d5   : > { %v4423_v13 = vpop.f32.mrb[57].mxu1  ;;  %v2500_v15 = vsel %vm1047_vm6, %v2491_v12, -inf }
0x11d6   : > { %2501 = vmax.xlane.f32.xlu0 %v2500_v15  ;;  %v2494_v18 = vpop.f32.mrb[58].mxu1 }
0x11d7   : > { %v4424_v19 = vpop.f32.mrb[59].mxu1 }
0x11dc   : > { %2569 = vrot.lane.b32.xlu1 %v6051_v5, %s5364_s19 }
0x1258   : > { %v2499_v20 = vpop.xlane.xlu1 %2498 }
0x1259   : > { %v2503_v21 = vsub.f32 %v2441_v57, %v2499_v20 }
0x125b   : > { %v2505_v22 = vmul.f32 1.442695, %v2503_v21 }
0x125c   : > { %v2570_v23 = vpop.permute.xlu1 %2569 }
0x125d   : > { %4758 = vpow2.f32 %v2505_v22  ;;  %v2575_v24 = vsel %vm1170_vm7, %v2570_v23, 0 }
0x125e   : > { %4432 = vmatpush3.bf16.msra.mxu1 %v2575_v24 }
0x125f   : > { %4443 = vmatprep.subr.bf16.mxu1 %v5350_v26 }
0x1263   : > { %v2502_v25 = vpop.xlane.xlu0 %2501 }
0x1264   : > { %v2504_v27 = vsub.f32 %v2491_v12, %v2502_v25 }
0x1266   : > { %v2507_v29 = vmul.f32 1.442695, %v2504_v27 }
0x1267   : > { %v4759_v30 = vpop.eup %4758 }
0x1268   : > { %4760 = vpow2.f32 %v2507_v29  ;;  %v2509_v31 = vsel %vm1047_vm6, %v4759_v30, 0.0 }
0x1269   : > { %2510 = vadd.xlane.f32.xlu0 %v2509_v31 }
0x1272   : > { %v4761_v33 = vpop.eup %4760 }
0x1273   : > { %v2512_v34 = vsel %vm1047_vm6, %v4761_v33, 0.0 }
0x1274   : > { %2513 = vadd.xlane.f32.xlu1 %v2512_v34 }
0x127f   : > { %2521 = vrot.lane.b32.xlu0 %v6024_v40, %s5364_s19 }
0x1283   : > { %2676 = vrot.lane.b32.xlu0 %v6011_v32, %s5365_s14 }
0x1285   : > { %2626 = vrot.lane.b32.xlu1 %v6006_v28, %s5365_s14 }
0x1287   : > { %2674 = vrot.lane.b32.xlu0 %v6026_v41, %s5366_s13 }
0x1289   : > { %2624 = vrot.lane.b32.xlu1 %v6016_v37, %s5366_s13 }
0x12f6   : > { %v2511_v35 = vpop.xlane.xlu0 %2510 }
0x12f7   : > { %4762 = vrcp.f32 %v2511_v35 }
0x12fa   : > { %v2522_v36 = vpop.permute.xlu0 %2521 }
0x12fb   : > { %v2527_v38 = vsel %vm1170_vm7, %v2522_v36, 0  ;;  %v4650_v36 = vld [vmem:[%s5924_s16] sm:$0xff]  }
0x12fc   : > { %4426 = vmatpush3.bf16.msra.mxu0 %v2527_v38  ;;  %v4651_v38 = vld [vmem:[%s5924_s16 + $0x8] sm:$0xff]  }
0x12fd   : > { %4437 = vmatprep.subr.bf16.mxu0 %v5350_v26 }
0x12fe   : > { %v2677_v46 = vpop.permute.xlu0 %2676 }
0x12ff   : > { %v2682_v48 = vsel %vm1047_vm6, %v2677_v46, 0 }
0x1301   : > { %v4763_v39 = vpop.eup %4762  ;;  %v2514_v32 = vpop.xlane.xlu1 %2513 }
0x1302   : > { %v2517_v42 = vmul.f32 %v4763_v39, %v4759_v30  ;;  %4764 = vrcp.f32 %v2514_v32  ;;  %v2675_v49 = vpop.permute.xlu0 %2674 }
0x1304   : > { %v2519_v28 = vpack.c.bf16 %v2517_v42, %v2517_v42  ;;  %v4652_v42 = vld [vmem:[%s5924_s16 + $0x10] sm:$0xff]  }
0x1305   : > { %v2627_v43 = vpop.permute.xlu1 %2626 }
0x1306   : > { %v2632_v44 = vsel %vm1047_vm6, %v2627_v43, 0  ;;  %4428 = vmatmul.mubr.msk.bf16.vlgmr.msra.gmra.mrb[48].mxu0 %vm1047_vm6, %v2519_v28 }
0x1307   : > { %4438 = vmatpush3.bf16.xpose.msra.mxu0 %v2632_v44  ;;  %4439 = vmatprep.mubr.msk.bf16.mxu0 %vm5351_vm5, %v5350_v26  ;;  %v4653_v44 = vld [vmem:[%s5924_s16 + $0x18] sm:$0xff]   ;;  %s6601_s16 = scalar_lea.vmem [#allocation19], %s5913_s30 }
0x1308   : > { %4449 = vmatprep.subr.bf16.mxu0 %v5350_v26 }
0x1309   : > { %v2625_v45 = vpop.permute.xlu1 %2624 }
0x130c   : > { %v4765_v37 = vpop.eup %4764 }
0x130d   : > { %v2518_v41 = vmul.f32 %v4765_v37, %v4761_v33 }
0x130e   : > { %4440 = vmatmul.mubr.msk.bf16.vlgmr.msra.gmra.mrb[52].mxu0 %vm1047_vm6, %v2625_v45 }
0x130f   : > { %v2520_v47 = vpack.c.bf16 %v2518_v41, %v2518_v41  ;;  %4451 = vmatprep.mubr.msk.bf16.mxu0 %vm5351_vm5, %v5350_v26 }
0x1311   : > { %4434 = vmatmul.mubr.msk.bf16.vlgmr.msra.gmra.mrb[60].mxu1 %vm1047_vm6, %v2520_v47 }
0x1312   : > { %4444 = vmatpush3.bf16.xpose.msra.mxu1 %v2682_v48  ;;  %4445 = vmatprep.mubr.msk.bf16.mxu1 %vm5351_vm5, %v5350_v26 }
0x1313   : > { %4455 = vmatprep.subr.bf16.mxu1 %v5350_v26 }
0x1319   : > { %4446 = vmatmul.mubr.msk.bf16.vlgmr.msra.gmra.mrb[64].mxu1 %vm1047_vm6, %v2675_v49 }
0x131a   : > { %4457 = vmatprep.mubr.msk.bf16.mxu1 %vm5351_vm5, %v5350_v26 }
0x13d9   : > { %v2563_v50 = vpop.f32.mrb[48].mxu0 }
0x13da   : > { %v4429_v53 = vpop.f32.mrb[49].mxu0 }
0x13db   : > { %v2566_v55 = vpop.f32.mrb[50].mxu0  ;;  %v4654_v53 = vld [vmem:[%s5935_s29] ss:$16 sps:$4 sm:$0xff]  }
0x13dc   : > { %v4430_v56 = vpop.f32.mrb[51].mxu0  ;;  %v4657_v55 = vld [vmem:[%s5935_s29 + $0x8] ss:$16 sps:$4 sm:$0xff]  }
0x13dd   : > { %v4662_v56 = vld [vmem:[%s5935_s29 + $0x24] ss:$16 sps:$4 sm:$0xff]  }
0x13e1   : > { %v2668_v57 = vpop.f32.mrb[52].mxu0 }
0x13e2   : > { %v4441_v58 = vpop.f32.mrb[53].mxu0  ;;  %v2724_v59 = vsel %vm1047_vm6, %v2668_v57, -inf }
0x13e3   : > { %2725 = vmax.xlane.f32.xlu1 %v2724_v59  ;;  %v2671_v62 = vpop.f32.mrb[54].mxu0  ;;  %v4660_v58 = vld [vmem:[%s5935_s29 + $0x20] ss:$16 sps:$4 sm:$0xff]   ;;  %v4663_v59 = vld [vmem:[%s5935_s29 + $0x28] ss:$16 sps:$4 sm:$0xff]  }
0x13e4   : > { %v2611_v3 = vpop.f32.mrb[60].mxu1  ;;  %v4442_v9 = vpop.f32.mrb[55].mxu0  ;;  %v4671_v62 = vld [vmem:[%s5935_s29 + $0x4c] ss:$16 sps:$4 sm:$0xff]  }
0x13e5   : > { %v2617_v10 = vpack.c.bf16 %v2611_v3, %v2563_v50  ;;  %v4435_v11 = vpop.f32.mrb[61].mxu1  ;;  %v4659_v50 = vld [vmem:[%s5935_s29 + $0xc] ss:$16 sps:$4 sm:$0xff]   ;;  %v4666_v3 = vld [vmem:[%s5935_s29 + $0x40] ss:$16 sps:$4 sm:$0xff]  }
0x13e6   : > { %v2614_v12 = vpop.f32.mrb[62].mxu1  ;;  %v4669_v9 = vld [vmem:[%s5935_s29 + $0x48] ss:$16 sps:$4 sm:$0xff]   ;;  %v4677_v11 = vld [vmem:[%s5935_s29 + $0x6c] ss:$16 sps:$4 sm:$0xff]  }
0x13e7   : > { %v4436_v13 = vpop.f32.mrb[63].mxu1  ;;  %v4672_v12 = vld [vmem:[%s5935_s29 + $0x60] ss:$16 sps:$4 sm:$0xff]  }
0x13e8   : > { %v4675_v13 = vld [vmem:[%s5935_s29 + $0x68] ss:$16 sps:$4 sm:$0xff]  }
0x13ec   : > { %v2718_v15 = vpop.f32.mrb[64].mxu1 }
0x13ed   : > { %v4447_v18 = vpop.f32.mrb[65].mxu1  ;;  %v2727_v19 = vsel %vm1047_vm6, %v2718_v15, -inf }
0x13ee   : > { %2728 = vmax.xlane.f32.xlu0 %v2727_v19  ;;  %v2721_v20 = vpop.f32.mrb[66].mxu1  ;;  %v4679_v18 = vld [vmem:[%s5946_s27 + $0xc0] sm:$0xff]  }
0x13ef   : > { %v4448_v21 = vpop.f32.mrb[67].mxu1  ;;  %v4778_v20 = vld [vmem:[#allocation2] sm:$0xff] }
0x1470   : > { %v2726_v22 = vpop.xlane.xlu1 %2725 }
0x1471   : > { %v2730_v23 = vsub.f32 %v2668_v57, %v2726_v22  ;;  %v4665_v57 = vld [vmem:[%s5935_s29 + $0x2c] ss:$16 sps:$4 sm:$0xff]  }
0x1473   : > { %v2732_v24 = vmul.f32 1.442695, %v2730_v23 }
0x1475   : > { %4766 = vpow2.f32 %v2732_v24  ;;  %v4779_v24 = vld [vmem:[#allocation2 + $0x8] sm:$0xff] }
0x147b   : > { %v2729_v25 = vpop.xlane.xlu0 %2728 }
0x147c   : > { %v2731_v27 = vsub.f32 %v2718_v15, %v2729_v25  ;;  %v4678_v15 = vld [vmem:[%s5946_s27 + $0x40] sm:$0xff]  }
0x147e   : > { %v2734_v29 = vmul.f32 1.442695, %v2731_v27 }
0x147f   : > { %v4767_v30 = vpop.eup %4766 }
0x1480   : > { %4768 = vpow2.f32 %v2734_v29  ;;  %v2736_v31 = vsel %vm1047_vm6, %v4767_v30, 0.0 }
0x1481   : > { %2737 = vadd.xlane.f32.xlu0 %v2736_v31 }
0x148a   : > { %v4769_v33 = vpop.eup %4768 }
0x148b   : > { %v2739_v34 = vsel %vm1047_vm6, %v4769_v33, 0.0 }
0x148c   : > { %2740 = vadd.xlane.f32.xlu1 %v2739_v34 }
0x1497   : > { %2748 = vrot.lane.b32.xlu0 %v6024_v40, %s5366_s13 }
0x149b   : > { %1711 = vrot.lane.b32.xlu0 %v1709_v8, %s5363_s3 }
0x149d   : > { %2796 = vrot.lane.b32.xlu1 %v6051_v5, %s5366_s13 }
0x149f   : > { %2165 = vrot.lane.b32.xlu0 %v2163_v0, %s5359_s26 }
0x14a1   : > { %1484 = vrot.lane.b32.xlu1 %v1482_v17, %s5365_s14 }
0x14a3   : > { %2619 = vrot.lane.b32.xlu0 %v2617_v10, %s5355_s7  ;;  %v4674_v10 = vld [vmem:[%s5935_s29 + $0x64] ss:$16 sps:$4 sm:$0xff]  }
0x14a5   : > { %1938 = vrot.lane.b32.xlu1 %v1936_v1, %s5361_s24 }
0x14a9   : > { %2392 = vrot.lane.b32.xlu1 %v2390_v4, %s5357_s17 }
0x150e   : > { %v2738_v40 = vpop.xlane.xlu0 %2737 }
0x150f   : > { %4770 = vrcp.f32 %v2738_v40 }
0x1512   : > { %v2749_v5 = vpop.permute.xlu0 %2748 }
0x1513   : > { %v2754_v60 = vsel %vm1170_vm7, %v2749_v5, 0 }
0x1514   : > { %4450 = vmatpush3.bf16.msra.mxu0 %v2754_v60 }
0x1515   : > { %4461 = vmatprep.subr.bf16.mxu0 %v5350_v26 }
0x1516   : > { %v1712_v54 = vpop.permute.xlu0 %1711 }
0x1519   : > { %v4771_v6 = vpop.eup %4770  ;;  %v2741_v14 = vpop.xlane.xlu1 %2740 }
0x151a   : > { %v2744_v17 = vmul.f32 %v4771_v6, %v4767_v30  ;;  %4772 = vrcp.f32 %v2741_v14  ;;  %v2166_v61 = vpop.permute.xlu0 %2165 }
0x151c   : > { %v2746_v7 = vpack.c.bf16 %v2744_v17, %v2744_v17 }
0x151d   : > { %v2797_v8 = vpop.permute.xlu1 %2796 }
0x151e   : > { %v2802_v63 = vsel %vm1170_vm7, %v2797_v8, 0  ;;  %4452 = vmatmul.mubr.msk.bf16.vlgmr.msra.gmra.mrb[56].mxu0 %vm1047_vm6, %v2746_v7  ;;  %v2620_v35 = vpop.permute.xlu0 %2619 }
0x151f   : > { %4456 = vmatpush3.bf16.msra.mxu1 %v2802_v63  ;;  %4469 = vmatprep.mubr.msk.bf16.mxu0 %vm5351_vm5, %v5350_v26 }
0x1520   : > { %4462 = vmatpush3.bf16.msra.mxu0 %v4650_v36 }
0x1521   : > { %v1485_v1 = vpop.permute.xlu1 %1484  ;;  %4463 = vmatprep.subr.bf16.mxu0 %v5350_v26 }
0x1522   : > { %1488 = vst.msk [vmem:[#allocation3] sm:$0xff] %vm1487_vm8, %v1485_v1 }
0x1523   : > { %1715 = vst.msk [vmem:[#allocation3] sm:$0xff] %vm1714_vm9, %v1712_v54 }
0x1524   : > { %v4773_v51 = vpop.eup %4772  ;;  %4464 = vmatpush3.bf16.msra.mxu0 %v4651_v38 }
0x1525   : > { %v2745_v0 = vmul.f32 %v4773_v51, %v4769_v33  ;;  %v1939_v52 = vpop.permute.xlu1 %1938  ;;  %4465 = vmatprep.subr.bf16.mxu0 %v5350_v26 }
0x1526   : > { %1942 = vst.msk [vmem:[#allocation3] sm:$0xff] %vm1941_vm10, %v1939_v52 }
0x1527   : > { %v2747_v2 = vpack.c.bf16 %v2745_v0, %v2745_v0  ;;  %2169 = vst.msk [vmem:[#allocation3] sm:$0xff] %vm2168_vm11, %v2166_v61 }
0x1528   : > { %4466 = vmatpush3.bf16.msra.mxu0 %v4652_v42 }
0x1529   : > { %4458 = vmatmul.mubr.msk.bf16.vlgmr.msra.gmra.mrb[68].mxu1 %vm1047_vm6, %v2747_v2  ;;  %v2393_v4 = vpop.permute.xlu1 %2392  ;;  %4467 = vmatprep.subr.bf16.mxu0 %v5350_v26  ;;  %v4656_v26 = vld [vmem:[%s5935_s29 + $0x4] ss:$16 sps:$4 sm:$0xff]  }
0x152a   : > { %2396 = vst.msk [vmem:[#allocation3] sm:$0xff] %vm2395_vm12, %v2393_v4  ;;  %3130 = vmatprep.mubr.bf16.mxu1 %v5349_v16  ;;  %3098 = vmatprep.subr.bf16.mxu1 %v4656_v26  ;;  %v4683_v26 = vld [vmem:[%s5946_s27 + $0xc8] sm:$0xff]  }
0x152b   : > { %2623 = vst.msk [vmem:[#allocation3] sm:$0xff] %vm2622_vm13, %v2620_v35  ;;  %3099 = vmatpush1.bf16.msra.mxu1 %v4654_v53  ;;  %v4685_v53 = vld [vmem:[%s5946_s27 + $0x88] sm:$0xff]  }
0x152c   : > { %4468 = vmatpush3.bf16.msra.mxu0 %v4653_v44  ;;  %3100 = vmatprep.subr.bf16.mxu1 %v4662_v56  ;;  %v4687_v56 = vld [vmem:[%s5946_s27 + $0xd0] sm:$0xff]  }
0x152d   : > { %3141 = vmatprep.subr.bf16.mxu0 %v4659_v50  ;;  %v4684_v50 = vld [vmem:[%s5946_s27 + $0x8] sm:$0xff]  }
0x152f   : > { %3101 = vmatpush1.bf16.msra.mxu1 %v4660_v58  ;;  %v4689_v58 = vld [vmem:[%s5946_s27 + $0x90] sm:$0xff]  }
0x15f1   : > { %v2790_v39 = vpop.f32.mrb[56].mxu0 }
0x15f2   : > { %v4453_v32 = vpop.f32.mrb[57].mxu0 }
0x15f3   : > { %v2793_v28 = vpop.f32.mrb[58].mxu0  ;;  %v4068_v32 = vld [vmem:[%s683_s5] ss:$0 sm:$0xff]  ;;  %s6602_s5 = scalar_lea.vmem [#allocation20], %s5913_s30 }
0x15f4   : > { %v4454_v43 = vpop.f32.mrb[59].mxu0 }
0x15f5   : > { %v4069_v43 = vld [vmem:[%s691_s28] ss:$0 sm:$0xff]  ;;  %s6603_s28 = scalar_lea.vmem [#allocation22], %s5913_s30 }
0x15fc   : > { %v2838_v37 = vpop.f32.mrb[68].mxu1 }
0x15fd   : > { %v2844_v41 = vpack.c.bf16 %v2838_v37, %v2790_v39  ;;  %v4459_v45 = vpop.f32.mrb[69].mxu1 }
0x15fe   : > { %v2841_v46 = vpop.f32.mrb[70].mxu1 }
0x15ff   : > { %2846 = vrot.lane.b32.xlu1 %v2844_v41, %s5353_s25  ;;  %v4460_v47 = vpop.f32.mrb[71].mxu1  ;;  %v4680_v46 = vld [vmem:[%s5946_s27] sm:$0xff]  }
0x1600   : > { %v4681_v47 = vld [vmem:[%s5946_s27 + $0x80] sm:$0xff]  }
0x1671   : > { %v2847_v48 = vpop.permute.xlu1 %2846 }
0x1672   : > { %2850 = vst.msk [vmem:[#allocation3] sm:$0xff] %vm2849_vm14, %v2847_v48 }
0x1679   : > { %v2851_v49 = vld [vmem:[#allocation3] sm:$0xff] }
0x167a   : > { %4470 = vmatmul.mubr.msk.bf16.vlgmr.msra.gmra.mrb[60].mxu0 %vm979_vm4, %v2851_v49  ;;  %v4682_v49 = vld [vmem:[%s5946_s27 + $0x48] sm:$0xff]  }
0x167b   : > { %3173 = vmatprep.mubr.bf16.mxu0 %v5349_v16  ;;  %3142 = vmatpush1.bf16.msra.mxu0 %v4657_v55  ;;  %v4668_v16 = vld [vmem:[%s5935_s29 + $0x44] ss:$16 sps:$4 sm:$0xff]   ;;  %v4686_v55 = vld [vmem:[%s5946_s27 + $0x50] sm:$0xff]   ;;  %s6604_s29 = sld [smem:[#allocation53_spill]] }
0x167c   : > { %3143 = vmatprep.subr.bf16.mxu0 %v4665_v57  ;;  %3102 = vmatprep.subr.bf16.mxu1 %v4668_v16  ;;  %v4688_v57 = vld [vmem:[%s5946_s27 + $0x10] sm:$0xff]   ;;  %v4691_v16 = vld [vmem:[%s5946_s27 + $0xd8] sm:$0xff]  }
0x167d   : > { %3103 = vmatpush1.bf16.msra.mxu1 %v4666_v3  ;;  %v4693_v3 = vld [vmem:[%s5946_s27 + $0x98] sm:$0xff]  }
0x167e   : > { %3104 = vmatprep.subr.bf16.mxu1 %v4674_v10  ;;  %v4695_v10 = vld [vmem:[%s5946_s27 + $0xe0] sm:$0xff]  }
0x167f   : > { %3144 = vmatpush1.bf16.msra.mxu0 %v4663_v59  ;;  %v4690_v59 = vld [vmem:[%s5946_s27 + $0x58] sm:$0xff]  }
0x1680   : > { %3145 = vmatprep.subr.bf16.mxu0 %v4671_v62  ;;  %v4692_v62 = vld [vmem:[%s5946_s27 + $0x18] sm:$0xff]  }
0x1681   : > { %3105 = vmatpush1.bf16.msra.mxu1 %v4672_v12  ;;  %v4697_v12 = vld [vmem:[%s5946_s27 + $0xa0] sm:$0xff]   ;;  %p4123_p0 = scmp.ne.s32.totalorder %s6604_s29, 1 }
0x1682   : > { %4214 = vmatprep.subr.bf16.mxu1 %v4678_v15  ;;  %v4699_v15 = vld [vmem:[%s5946_s27 + $0xe8] sm:$0xff]  }
0x1683   : > { %3146 = vmatpush1.bf16.msra.mxu0 %v4669_v9  ;;  %v4694_v9 = vld [vmem:[%s5946_s27 + $0x60] sm:$0xff]  }
0x1684   : > { %3147 = vmatprep.subr.bf16.mxu0 %v4677_v11  ;;  %v4696_v11 = vld [vmem:[%s5946_s27 + $0x20] sm:$0xff]  }
0x1687   : > { %3148 = vmatpush1.bf16.msra.mxu0 %v4675_v13  ;;  %v4698_v13 = vld [vmem:[%s5946_s27 + $0x68] sm:$0xff]  }
0x1688   : > { %4236 = vmatprep.subr.bf16.mxu0 %v4679_v18  ;;  %v4700_v18 = vld [vmem:[%s5946_s27 + $0x28] sm:$0xff]  }
0x174d   : > { %v2921_v19 = vpop.f32.mrb[60].mxu0 }
0x174e   : > { %v2928_v21 = vadd.f32 %v4778_v20, %v2921_v19  ;;  %v4471_v22 = vpop.f32.mrb[61].mxu0  ;;  %v4701_v19 = vld [vmem:[%s5946_s27 + $0xa8] sm:$0xff]   ;;  %v4702_v20 = vld [vmem:[%s5946_s27 + $0x70] sm:$0xff]  }
0x174f   : > { %v2924_v23 = vpop.f32.mrb[62].mxu0  ;;  %v4704_v22 = vld [vmem:[%s5946_s27 + $0x30] sm:$0xff]  }
0x1750   : > { %v2929_v25 = vadd.f32 %v4779_v24, %v2924_v23  ;;  %v4472_v27 = vpop.f32.mrb[63].mxu0  ;;  %v2932_v29 = vsel %vm979_vm4, %v2928_v21, 0.0  ;;  %v4705_v23 = vld [vmem:[%s5946_s27 + $0xb0] sm:$0xff]   ;;  %v4706_v24 = vld [vmem:[%s5946_s27 + $0x78] sm:$0xff]  }
0x1751   : > { %v4708_v27 = vld [vmem:[%s5946_s27 + $0x38] sm:$0xff]  }
0x1752   : > { %v2933_v30 = vsel %vm979_vm4, %v2929_v25, 0.0 }
0x1753   : > { %v2934_v31 = vadd.f32 %v2933_v30, %v2932_v29  ;;  %v4709_v29 = vld [vmem:[%s5946_s27 + $0xb8] sm:$0xff]   ;;  %v2995_v30 = vlaneseq }
0x1755   : > { %v2935_v33 = vrot.slane %v2934_v31, 4 }
0x1757   : > { %v2936_v34 = vadd.f32 %v2935_v33, %v2934_v31  ;;  %v2996_v31 = vshrl.u32 %v2995_v30, 7 }
0x1759   : > { %v2937_v40 = vrot.slane %v2936_v34, 2  ;;  %v2997_v33 = vsub.s32 0, %v2996_v31 }
0x175b   : > { %v2938_v5 = vadd.f32 %v2937_v40, %v2936_v34  ;;  %v3005_v34 = vsub.s32 2, %v2996_v31  ;;  %v2993_v40 = vld [vmem:[%s5943_s0] sm:$0xf] }
0x175d   : > { %v2939_v60 = vrot.slane %v2938_v5, 1 }
0x175f   : > { %v2940_v6 = vadd.f32 %v2939_v60, %v2938_v5  ;;  %v3001_v5 = vsub.s32 1, %v2996_v31  ;;  %v3009_v60 = vsub.s32 3, %v2996_v31 }
0x1761   : > { %v2941_v14 = vmul.f32 0.0625, %v2940_v6  ;;  %v2998_v6 = vrot.slane %v2993_v40, %v2997_v33 }
0x1763   : > { %v2942_v17 = vsub.f32 %v2928_v21, %v2941_v14  ;;  %v2943_v7 = vsub.f32 %v2929_v25, %v2941_v14  ;;  %v4703_v21 = vld [vmem:[%s5946_s27 + $0xf0] sm:$0xff]   ;;  %v4707_v25 = vld [vmem:[%s5946_s27 + $0xf8] sm:$0xff]   ;;  %v3006_v14 = vrot.slane %v2993_v40, %v3005_v34 }
0x1765   : > { %v2944_v8 = vmul.f32 %v2942_v17, %v2942_v17  ;;  %v2945_v54 = vmul.f32 %v2943_v7, %v2943_v7 }
0x1767   : > { %v2946_v63 = vsel %vm979_vm4, %v2944_v8, 0.0  ;;  %v2947_v1 = vsel %vm979_vm4, %v2945_v54, 0.0 }
0x1768   : > { %v2948_v51 = vadd.f32 %v2947_v1, %v2946_v63 }
0x176a   : > { %v2949_v61 = vrot.slane %v2948_v51, 4 }
0x176c   : > { %v2950_v0 = vadd.f32 %v2949_v61, %v2948_v51 }
0x176e   : > { %v2951_v52 = vrot.slane %v2950_v0, 2 }
0x1770   : > { %v2952_v2 = vadd.f32 %v2951_v52, %v2950_v0 }
0x1772   : > { %v2953_v4 = vrot.slane %v2952_v2, 1 }
0x1774   : > { %v2954_v35 = vadd.f32 %v2953_v4, %v2952_v2 }
0x1776   : > { %v2955_v36 = vmul.f32 0.0625, %v2954_v35 }
0x1778   : > { %v2956_v38 = vadd.f32 1e-05, %v2955_v36 }
0x177a   : > { %4774 = vrsqrt.f32 %v2956_v38 }
0x1784   : > { %v4775_v39 = vpop.eup %4774 }
0x1785   : > { %v2958_v42 = vmul.f32 %v4775_v39, %v2942_v17  ;;  %v2959_v28 = vmul.f32 %v4775_v39, %v2943_v7  ;;  %v3002_v17 = vrot.slane %v2993_v40, %v3001_v5  ;;  %v3010_v7 = vrot.slane %v2993_v40, %v3009_v60 }
0x1787   : > { %v2966_v44 = vmul.f32 %v4068_v32, %v2958_v42  ;;  %v2967_v37 = vmul.f32 %v4068_v32, %v2959_v28 }
0x1789   : > { %v6390_v41 = vadd.f32 %v4069_v43, %v2966_v44  ;;  %v6392_v45 = vadd.f32 %v4069_v43, %v2967_v37 }
0x178b   : > { %v2976_v48 = vpack.c.bf16 %v6392_v45, %v6390_v41 }
0x178d   : > { %4086 = vmatmul.mubr.msk.bf16.vlgmr.msra.gmra.mrb[72].mxu1 %vm979_vm4, %v2976_v48  ;;  %4087 = vmatmul.mubr.msk.bf16.vlgmr.msra.gmra.mrb[64].mxu0 %vm979_vm4, %v2976_v48 }
0x178e   : > { %4215 = vmatpush3.bf16.msra.mxu1 %v4680_v46  ;;  %4237 = vmatpush3.bf16.msra.mxu0 %v4681_v47 }
0x178f   : > { %4216 = vmatprep.subr.bf16.mxu1 %v4682_v49  ;;  %4238 = vmatprep.subr.bf16.mxu0 %v4683_v26 }
0x1792   : > { %4217 = vmatpush3.bf16.msra.mxu1 %v4684_v50  ;;  %4239 = vmatpush3.bf16.msra.mxu0 %v4685_v53 }
0x1793   : > { %4218 = vmatprep.subr.bf16.mxu1 %v4686_v55  ;;  %4240 = vmatprep.subr.bf16.mxu0 %v4687_v56 }
0x1796   : > { %4219 = vmatpush3.bf16.msra.mxu1 %v4688_v57  ;;  %4241 = vmatpush3.bf16.msra.mxu0 %v4689_v58  ;;  %v4088_v58 = vld [vmem:[%s6601_s16] ss:$0 sm:$0xff] }
0x1797   : > { %4220 = vmatprep.subr.bf16.mxu1 %v4690_v59  ;;  %4242 = vmatprep.subr.bf16.mxu0 %v4691_v16 }
0x179a   : > { %4221 = vmatpush3.bf16.msra.mxu1 %v4692_v62  ;;  %4243 = vmatpush3.bf16.msra.mxu0 %v4693_v3 }
0x179b   : > { %4222 = vmatprep.subr.bf16.mxu1 %v4694_v9  ;;  %4244 = vmatprep.subr.bf16.mxu0 %v4695_v10 }
0x179e   : > { %4223 = vmatpush3.bf16.msra.mxu1 %v4696_v11  ;;  %4245 = vmatpush3.bf16.msra.mxu0 %v4697_v12 }
0x179f   : > { %4224 = vmatprep.subr.bf16.mxu1 %v4698_v13  ;;  %4246 = vmatprep.subr.bf16.mxu0 %v4699_v15 }
0x17a2   : > { %4225 = vmatpush3.bf16.msra.mxu1 %v4700_v18  ;;  %4247 = vmatpush3.bf16.msra.mxu0 %v4701_v19 }
0x17a3   : > { %4226 = vmatprep.subr.bf16.mxu1 %v4702_v20  ;;  %4248 = vmatprep.subr.bf16.mxu0 %v4703_v21 }
0x17a6   : > { %4227 = vmatpush3.bf16.msra.mxu1 %v4704_v22  ;;  %4249 = vmatpush3.bf16.msra.mxu0 %v4705_v23 }
0x17a7   : > { %4228 = vmatprep.subr.bf16.mxu1 %v4706_v24  ;;  %4250 = vmatprep.subr.bf16.mxu0 %v4707_v25 }
0x17aa   : > { %4229 = vmatpush3.bf16.msra.mxu1 %v4708_v27  ;;  %4251 = vmatpush3.bf16.msra.mxu0 %v4709_v29 }
0x1860   : > { %v3132_v8 = vpop.f32.mrb[72].mxu1  ;;  %v3175_v54 = vpop.f32.mrb[64].mxu0 }
0x1861   : > { %v3133_v63 = vadd.f32 %v3132_v8, %v2998_v6  ;;  %v3176_v1 = vadd.f32 %v3175_v54, %v3006_v14  ;;  %v3134_v51 = vpop.f32.mrb[73].mxu1  ;;  %v3177_v61 = vpop.f32.mrb[65].mxu0 }
0x1862   : > { %v3135_v0 = vadd.f32 %v3134_v51, %v3002_v17  ;;  %v3178_v52 = vadd.f32 %v3177_v61, %v3010_v7  ;;  %v3136_v2 = vpop.f32.mrb[74].mxu1  ;;  %v3179_v4 = vpop.f32.mrb[66].mxu0 }
0x1863   : > { %v3137_v35 = vadd.f32 %v3136_v2, %v2998_v6  ;;  %v3180_v36 = vadd.f32 %v3179_v4, %v3006_v14  ;;  %v3138_v38 = vpop.f32.mrb[75].mxu1  ;;  %v3181_v39 = vpop.f32.mrb[67].mxu0  ;;  %v3184_v28 = vmax.f32 %v3133_v63, 0.0  ;;  %v3186_v43 = vmax.f32 %v3176_v1, 0.0  ;;  %v4121_v4 = vld [vmem:[%s6602_s5] ss:$0 sm:$0xff] }
0x1864   : > { %v3139_v32 = vadd.f32 %v3138_v38, %v3002_v17  ;;  %v3182_v42 = vadd.f32 %v3181_v39, %v3010_v7  ;;  %v3185_v46 = vmax.f32 %v3135_v0, 0.0  ;;  %v3187_v47 = vmax.f32 %v3178_v52, 0.0  ;;  %v4122_v38 = vld [vmem:[%s6603_s28] ss:$0 sm:$0xff] }
0x1865   : > { %v3188_v44 = vmax.f32 %v3137_v35, 0.0  ;;  %v3190_v37 = vmax.f32 %v3180_v36, 0.0 }
0x1866   : > { %v3189_v48 = vmax.f32 %v3139_v32, 0.0  ;;  %v3191_v49 = vmax.f32 %v3182_v42, 0.0 }
0x1867   : > { %v3192_v26 = vpack.c.bf16 %v3188_v44, %v3184_v28  ;;  %v3194_v50 = vpack.c.bf16 %v3190_v37, %v3186_v43 }
0x1868   : > { %v3193_v53 = vpack.c.bf16 %v3189_v48, %v3185_v46  ;;  %v3195_v55 = vpack.c.bf16 %v3191_v49, %v3187_v47 }
0x186a   : > { %3491 = vmatprep.mubr.bf16.mxu1 %v3193_v53  ;;  %3532 = vmatprep.mubr.bf16.mxu0 %v3195_v55 }
0x186b   : > { %3492 = vmatmul.mubr.bf16.vlgmr.msra.gmra.mrb[76].mxu1 %v3192_v26  ;;  %3533 = vmatmul.mubr.bf16.vlgmr.msra.gmra.mrb[68].mxu0 %v3194_v50 }
0x193e   : > { %v4230_v56 = vpop.f32.mrb[76].mxu1  ;;  %v4252_v57 = vpop.f32.mrb[68].mxu0 }
0x193f   : > { %v4231_v59 = vpop.f32.mrb[77].mxu1  ;;  %v4253_v16 = vpop.f32.mrb[69].mxu0 }
0x1940   : > { %v4232_v62 = vadd.f32 %v4231_v59, %v4230_v56  ;;  %v4254_v3 = vadd.f32 %v4253_v16, %v4252_v57  ;;  %v4233_v9 = vpop.f32.mrb[78].mxu1  ;;  %v4255_v10 = vpop.f32.mrb[70].mxu0 }
0x1941   : > { %v4234_v11 = vpop.f32.mrb[79].mxu1  ;;  %v4256_v12 = vpop.f32.mrb[71].mxu0 }
0x1942   : > { %v3494_v13 = vadd.f32 %v4232_v62, %v4088_v58  ;;  %v4235_v15 = vadd.f32 %v4234_v11, %v4233_v9  ;;  %v4257_v18 = vadd.f32 %v4256_v12, %v4255_v10 }
0x1944   : > { %v3535_v19 = vadd.f32 %v4254_v3, %v3494_v13  ;;  %v3497_v20 = vadd.f32 %v4235_v15, %v4088_v58 }
0x1946   : > { %v3541_v21 = vadd.f32 %v3535_v19, %v6390_v41  ;;  %v3538_v22 = vadd.f32 %v4257_v18, %v3497_v20 }
0x1948   : > { %v3542_v23 = vadd.f32 %v3538_v22, %v6392_v45  ;;  %v3545_v24 = vsel %vm979_vm4, %v3541_v21, 0.0 }
0x194a   : > { %v3546_v25 = vsel %vm979_vm4, %v3542_v23, 0.0 }
0x194b   : > { %v3547_v27 = vadd.f32 %v3546_v25, %v3545_v24 }
0x194d   : > { %v3548_v29 = vrot.slane %v3547_v27, 4 }
0x194f   : > { %v3549_v30 = vadd.f32 %v3548_v29, %v3547_v27 }
0x1951   : > { %v3550_v31 = vrot.slane %v3549_v30, 2 }
0x1953   : > { %v3551_v33 = vadd.f32 %v3550_v31, %v3549_v30 }
0x1955   : > { %v3552_v34 = vrot.slane %v3551_v33, 1 }
0x1957   : > { %v3553_v40 = vadd.f32 %v3552_v34, %v3551_v33 }
0x1959   : > { %v3554_v5 = vmul.f32 0.0625, %v3553_v40 }
0x195b   : > { %v3555_v60 = vsub.f32 %v3541_v21, %v3554_v5  ;;  %v3556_v6 = vsub.f32 %v3542_v23, %v3554_v5 }
0x195d   : > { %v3557_v14 = vmul.f32 %v3555_v60, %v3555_v60  ;;  %v3558_v41 = vmul.f32 %v3556_v6, %v3556_v6 }
0x195f   : > { %v3559_v17 = vsel %vm979_vm4, %v3557_v14, 0.0  ;;  %v3560_v45 = vsel %vm979_vm4, %v3558_v41, 0.0 }
0x1960   : > { %v3561_v7 = vadd.f32 %v3560_v45, %v3559_v17 }
0x1962   : > { %v3562_v8 = vrot.slane %v3561_v7, 4 }
0x1964   : > { %v3563_v54 = vadd.f32 %v3562_v8, %v3561_v7 }
0x1966   : > { %v3564_v63 = vrot.slane %v3563_v54, 2 }
0x1968   : > { %v3565_v1 = vadd.f32 %v3564_v63, %v3563_v54 }
0x196a   : > { %v3566_v51 = vrot.slane %v3565_v1, 1 }
0x196c   : > { %v3567_v61 = vadd.f32 %v3566_v51, %v3565_v1 }
0x196e   : > { %v3568_v0 = vmul.f32 0.0625, %v3567_v61 }
0x1970   : > { %v3569_v52 = vadd.f32 1e-05, %v3568_v0 }
0x1972   : > { %4776 = vrsqrt.f32 %v3569_v52 }
0x197c   : > { %v4777_v2 = vpop.eup %4776 }
0x197d   : > { %v3571_v35 = vmul.f32 %v4777_v2, %v3555_v60  ;;  %v3572_v36 = vmul.f32 %v4777_v2, %v3556_v6  ;;  %3594 = sbr.rel (%p4123_p0) target bundleno = 6940 (0x1b1c), region = 145 }
0x197f   : > { %v3579_v39 = vmul.f32 %v4121_v4, %v3571_v35  ;;  %v3580_v32 = vmul.f32 %v4121_v4, %v3572_v36 }
0x1981   : > { %v3587_v42 = vadd.f32 %v4122_v38, %v3579_v39  ;;  %v3588_v28 = vadd.f32 %v4122_v38, %v3580_v32 }
0x1983   : > { %3589 = vst.msk [vmem:[#allocation2] sm:$0xff] %vm979_vm4, %v3587_v42  ;;  %3590 = vst.msk [vmem:[#allocation2 + $0x8] sm:$0xff] %vm979_vm4, %v3588_v28 }
0x1984   : > { %s5367_s0 = smov [#allocation36]   ;;  %s6605_s18 = sld [smem:[#allocation63_spill]] }
0x1985   : > { %s3602_s27 = sshll.u32 %s5367_s0, 4  ;;  %s3603_s27 = int_to_ptr.vmem [resolvable:$true] %s3602_s27 }
0x198a   : > { %s5208_s17 = scalar_lea.hbm %s6605_s18, 512 }
0x198b   : > { %p5209_p13 = scmp.ne.s32.totalorder %s6605_s18, %s5208_s17  ;;  %p5212_p4 = scmp.lt.u32.totalorder %s5208_s17, %s6605_s18 }
0x198d   : > { %p5214_p11 = pnand %p5212_p4, %p5209_p13 }
0x198f   : > { %5217 = shalt.err (!%p5214_p11)  }
0x1990   : > { %s5218_s24 = scalar_lea.vmem %s3603_s27, 512  ;;  %p5223_p6 = scmp.lt.s32.totalorder %s3603_s27, %s3603_s27 }
0x1991   : > { %p5219_p12 = scmp.ne.s32.totalorder %s3603_s27, %s5218_s24  ;;  %p5224_p2 = scmp.lt.s32.totalorder %s5218_s24, %s5218_s24 }
0x1993   : > { %p5225_p1 = por %p5224_p2, %p5223_p6 }
0x1995   : > { %p5226_p9 = pnand %p5225_p1, %p5219_p12 }
0x1997   : > { %5229 = shalt.err (!%p5226_p9)  }
0x1998   : > { %3605 = dma.hbm_to_vmem [thread:$0]  %s6605_s18, 512, %s3603_s27, [#allocation37] }
0x1999   : > { %5304 = dma.done.wait [#allocation37], 512 }
0x199a   : > { %5305 = vsyncadd [#allocation37], 4294966784  ;;  %v3610_v43 = vsel %vm979_vm4, %v3587_v42, 0.0  ;;  %v3617_v44 = vsel %vm979_vm4, %v3588_v28, 0.0  ;;  %v5368_v37 = vmov 0.0   ;;  %vm5369_vm15 = vmmov 0  }
0x199b   : > { %4473 = vmatprep.subr.bf16.mxu0 %v5368_v37  ;;  %4481 = vmatprep.mubr.msk.bf16.mxu0 %vm5369_vm15, %v5368_v37  ;;  %v3611_v46 = vrot.slane %v3610_v43, 4  ;;  %v3618_v47 = vrot.slane %v3617_v44, 4  ;;  %v3629_v53 = vld [vmem:[#allocation36] sm:$0xff]  ;;  %v3630_v57 = vld [vmem:[#allocation36 + $0x8] sm:$0xff]  ;;  %v3631_v3 = vld [vmem:[#allocation36 + $0x10] sm:$0xff]  ;;  %vm3644_vm0 = vcmask 1041409  }
0x199c   : > { %4474 = vmatpush3.bf16.msra.mxu0 %v3629_v53  ;;  %v3632_v13 = vld [vmem:[#allocation36 + $0x18] sm:$0xff]  ;;  %vm3699_vm1 = vcmask 254976   ;;  %v4127_v34 = vld [vmem:[#allocation4] ss:$0 sm:$0xff]  ;;  %vm3711_vm2 = vcmask 1024  }
0x199d   : > { %v3612_v48 = vadd.f32 %v3611_v46, %v3610_v43  ;;  %v3619_v49 = vadd.f32 %v3618_v47, %v3617_v44  ;;  %4475 = vmatprep.subr.bf16.mxu0 %v5368_v37  ;;  %v4124_v21 = vld [vmem:[#allocation23] ss:$0 sm:$0xff]  ;;  %v4126_v27 = vld [vmem:[#allocation25] ss:$0 sm:$0xff] }
0x199f   : > { %v3613_v26 = vrot.slane %v3612_v48, 2  ;;  %v3620_v50 = vrot.slane %v3619_v49, 2 }
0x19a0   : > { %4476 = vmatpush3.bf16.msra.mxu0 %v3630_v57 }
0x19a1   : > { %v3614_v55 = vadd.f32 %v3613_v26, %v3612_v48  ;;  %v3621_v56 = vadd.f32 %v3620_v50, %v3619_v49  ;;  %4477 = vmatprep.subr.bf16.mxu0 %v5368_v37 }
0x19a3   : > { %v3615_v58 = vrot.slane %v3614_v55, 1  ;;  %v3622_v59 = vrot.slane %v3621_v56, 1 }
0x19a4   : > { %4478 = vmatpush3.bf16.msra.mxu0 %v3631_v3 }
0x19a5   : > { %v3616_v16 = vadd.f32 %v3615_v58, %v3614_v55  ;;  %v3623_v62 = vadd.f32 %v3622_v59, %v3621_v56  ;;  %4479 = vmatprep.subr.bf16.mxu0 %v5368_v37 }
0x19a7   : > { %v3625_v9 = vmul.f32 0.125, %v3616_v16  ;;  %v3626_v10 = vmul.f32 0.125, %v3623_v62 }
0x19a8   : > { %4480 = vmatpush3.bf16.msra.mxu0 %v3632_v13 }
0x19a9   : > { %v3627_v11 = vpack.c.bf16 %v3625_v9, %v3625_v9  ;;  %v3628_v12 = vpack.c.bf16 %v3626_v10, %v3626_v10 }
0x19ab   : > { %v3642_v15 = vunpack.c.l.b16 %v3627_v11  ;;  %v3643_v18 = vunpack.c.l.b16 %v3628_v12 }
0x19ad   : > { %v3645_v19 = vsel %vm3644_vm0, %v3643_v18, %v3642_v15 }
0x19ae   : > { %v3646_v20 = vpack.c.b16 %v3645_v19, %v3645_v19 }
0x19b0   : > { %4482 = vmatmul.mubr.msk.bf16.vlgmr.msra.gmra.mrb[0].mxu0 %vm979_vm4, %v3646_v20 }
0x1a83   : > { %v3684_v22 = vpop.f32.mrb[0].mxu0 }
0x1a84   : > { %v3685_v23 = vadd.f32 %v4124_v21, %v3684_v22  ;;  %v4483_v24 = vpop.f32.mrb[1].mxu0 }
0x1a85   : > { %v3687_v25 = vpop.f32.mrb[2].mxu0 }
0x1a86   : > { %v3690_v29 = vmax.f32 %v3685_v23, 0.0  ;;  %v4484_v30 = vpop.f32.mrb[3].mxu0 }
0x1a88   : > { %v3698_v31 = vmul.f32 %v4126_v27, %v3690_v29 }
0x1a8a   : > { %v3700_v33 = vsel %vm3699_vm1, %v3698_v31, 0.0 }
0x1a8b   : > { %3701 = vadd.xlane.f32.xlu0 %v3700_v33 }
0x1b18   : > { %v3702_v40 = vpop.xlane.xlu0 %3701 }
0x1b19   : > { %v3710_v5 = vadd.f32 %v4127_v34, %v3702_v40 }
0x1b1b   : > { %3712 = vst.msk [vmem:[#allocation26] sm:$0x3] %vm3711_vm2, %v3710_v5 }
0x1b1c PF: > { %s6606_s19 = sld [smem:[#allocation53_spill]]  ;;  %s5370_s14 = smov [#allocation26]  }
0x1b1d   : > { %s3720_s13 = sshll.u32 %s5370_s14, 4  ;;  %s3721_s13 = int_to_ptr.vmem [resolvable:$true] %s3720_s13 }
0x1b1e   : > { %s5230_s16 = scalar_lea.vmem %s3721_s13, 32  ;;  %p5237_p3 = scmp.lt.s32.totalorder %s3721_s13, %s3721_s13 }
0x1b1f   : > { %p5231_p7 = scmp.ne.s32.totalorder %s3721_s13, %s5230_s16  ;;  %p5238_p0 = scmp.lt.s32.totalorder %s5230_s16, %s5230_s16 }
0x1b21   : > { %p5239_p13 = por %p5238_p0, %p5237_p3 }
0x1b22   : > { %p4569_p8 = scmp.eq.s32.totalorder %s6606_s19, 1 }
0x1b24   : > { %p5232_p10 = pnand %p5231_p7, %p4569_p8 }
0x1b26   : > { %p5233_p5 = pneg %p5232_p10 }
0x1b28   : > { %p5240_p4 = pnand %p5239_p13, %p5233_p5 }
0x1b2a   : > { %5243 = shalt.err (!%p5240_p4)
}
0x1b2b   : > { %s6607_s29 = sld [smem:[#allocation65_spill]] }
0x1b31   : > { %s5244_s0 = scalar_lea.hbm %s6607_s29, 32 }
0x1b32   : > { %p5245_p11 = scmp.ne.s32.totalorder %s6607_s29, %s5244_s0  ;;  %p5250_p2 = scmp.lt.u32.totalorder %s5244_s0, %s6607_s29 }
0x1b34   : > { %p5246_p12 = pnand %p5245_p11, %p4569_p8 }
0x1b36   : > { %p5247_p6 = pneg %p5246_p12 }
0x1b38   : > { %p5252_p1 = pnand %p5250_p2, %p5247_p6 }
0x1b3a   : > { %5255 = shalt.err (!%p5252_p1)
}
0x1b3b   : > { %4518 = dma.vmem_to_hbm [thread:$0]  (%p4569_p8), %s3721_s13, 32, %s6607_s29, [#allocation7]  }
0x1b3c   : > { %5307 = dma.done.wait (%p4569_p8), [#allocation7], 32  }
0x1b3d   : > { %5309 = vsyncadd (%p4569_p8), [#allocation7], 4294967264 }
0x1b3e PF: > { %s6608_s16 = sld [smem:[#allocation54_spill]]  ;;  %s6609_s26 = sld [smem:[#allocation51_spill]] }
0x1b3f   : > { %s6610_s27 = sld [smem:[#allocation52_spill]]  ;;  %s6611_s28 = sld [smem:[#allocation55_spill]] }
0x1b44   : > { %p44_p9 = scmp.ge.s32.totalorder %s6608_s16, 4  }
0x1b46   :  { %46 = sbr.rel (!%p44_p9) target bundleno = 23 (0x17), region = 256 }
0x1b4d   :  { %3733 = vsyncpa [#allocation6], 1 }
0x1b4e   :  { %3735 = vsyncpa [#allocation6 + $0x1], 1 }
0x1b4f   :  { %3736 = vsyncpa [#allocation9], 1 }
0x1b50   :  { %3738 = vsyncpa [#allocation9 + $0x1], 1 }
0x1b51   :  { %3739 = vsyncpa [#allocation12], 1 }
0x1b52   :  { %3741 = vsyncpa [#allocation12 + $0x1], 1 }
0x1b53   :  { %3742 = vsyncpa [#allocation15], 1 }
0x1b54   :  { %3744 = vsyncpa [#allocation15 + $0x1], 1 }
0x1b55   :  { %3745 = vsyncpa [#allocation18], 1 }
0x1b56   :  { %3747 = vsyncpa [#allocation18 + $0x1], 1 }
0x1b57   :  { %3748 = vsyncpa [#allocation21], 1 }
0x1b58   :  { %3750 = vsyncpa [#allocation21 + $0x1], 1 }
0x1b59   :  { %3751 = vsyncpa [#allocation24], 1 }
0x1b5a   :  { %3752 = vsyncpa [#allocation7], 1 }
0x1b5b   :  { %3754 = vsyncpa [#allocation7 + $0x1], 1 }

</bundles_post_ra>
